<compile_context>
chip_gen: v5e
topology: v5e:2x2
jax: 0.10.0
libtpu: 0.0.40
codegen_flags: <defaults>
</compile_context>

<pallas_src>
import functools

import jax
import jax.numpy as jnp
from jax.experimental import pallas as pl
from jax.experimental.pallas import tpu as pltpu


def se_conv_kernel(s_ref, w1_ref, b1_ref, x_ref, w2_ref, o_ref):
    # Gate: 1x1 conv (Cin -> Cmid) on the 1x1-spatial input == lane-dense matvec.
    #   [1, Cin] @ [Cin, Cmid_p] -> [1, Cmid_p]   (MXU, N = Cmid_p: lane-dense)
    gate = jnp.dot(s_ref[...], w1_ref[...],
                   preferred_element_type=jnp.float32) + b1_ref[...]
    gate = jax.nn.sigmoid(gate)                      # EUP, ~17 dense vregs

    # Broadcast-multiply over spatial rows (sublane broadcast of the gate row).
    y = x_ref[...] * gate                            # [HW_p, Cmid_p]

    # 1x1 conv (Cmid -> Cout), no bias: one 128-lane output tile per grid step.
    #   [HW_p, Cmid_p] @ [Cmid_p, TN] -> [HW_p, TN]
    o_ref[...] = jnp.dot(y, w2_ref[...], preferred_element_type=jnp.float32)


@functools.partial(jax.jit, static_argnames=())
def se_conv_block(x599, x596, w1, b1, w2):
    """x599: [1, Cin, 1, 1], x596: [1, Cmid, H, W] -> [1, Cout, H, W]."""
    N, Cin, _, _ = x599.shape
    _, Cmid, H, W = x596.shape
    Cout = w2.shape[0]
    assert N == 1, "kernel written for batch=1 (as in the reference module)"
    HW = H * W

    LANE, SUB, TN = 128, 8, 128
    Cmid_p = pl.cdiv(Cmid, LANE) * LANE   # 2064 -> 2176
    Cout_p = pl.cdiv(Cout, LANE) * LANE   # 344  -> 384
    HW_p = pl.cdiv(HW, SUB) * SUB         # 49   -> 56

    f32 = jnp.float32
    # Channels-last, zero-padded, lane-dense operands (padding is numerically inert:
    # padded w1 cols + zero bias -> gate=0.5 but padded x cols are 0, so y cols are 0;
    # padded w2 cols are 0 and padded Cout/HW rows are sliced off below).
    s = x599.reshape(1, Cin).astype(f32)
    x_t = jnp.zeros((HW_p, Cmid_p), f32).at[:HW, :Cmid].set(
        x596.reshape(Cmid, HW).T.astype(f32))
    w1_t = jnp.zeros((Cin, Cmid_p), f32).at[:, :Cmid].set(
        w1.reshape(Cmid, Cin).T.astype(f32))
    b1_t = jnp.zeros((1, Cmid_p), f32).at[:, :Cmid].set(
        b1.reshape(1, Cmid).astype(f32))
    w2_t = jnp.zeros((Cmid_p, Cout_p), f32).at[:Cmid, :Cout].set(
        w2.reshape(Cout, Cmid).T.astype(f32))
    # TODO(synk): optional bf16 storage of x_t / w2_t would halve the dominant HBM
    # traffic but perturbs numerics beyond the module's f32 forward; kept f32.

    cost = pl.CostEstimate(
        flops=2 * HW * Cmid * Cout + 2 * Cin * Cmid + HW * Cmid,
        transcendentals=Cmid,
        bytes_accessed=4 * (s.size + x_t.size + w1_t.size + b1_t.size
                            + w2_t.size + HW_p * Cout_p),
    )

    out_t = pl.pallas_call(
        se_conv_kernel,
        out_shape=jax.ShapeDtypeStruct((HW_p, Cout_p), f32),
        grid=(Cout_p // TN,),
        in_specs=[
            pl.BlockSpec((1, Cin), lambda j: (0, 0)),          # s   (resident)
            pl.BlockSpec((Cin, Cmid_p), lambda j: (0, 0)),     # w1  (resident)
            pl.BlockSpec((1, Cmid_p), lambda j: (0, 0)),       # b1  (resident)
            pl.BlockSpec((HW_p, Cmid_p), lambda j: (0, 0)),    # x   (resident)
            pl.BlockSpec((Cmid_p, TN), lambda j: (0, j)),      # w2  (streamed)
        ],
        out_specs=pl.BlockSpec((HW_p, TN), lambda j: (0, j)),
        compiler_params=pltpu.CompilerParams(
            dimension_semantics=("parallel",)),
        cost_estimate=cost,
    )(s, w1_t, b1_t, x_t, w2_t)

    # [HW, Cout] -> NCHW [1, Cout, H, W]
    return out_t[:HW, :Cout].T.reshape(N, Cout, H, W)


def reference(x599, x596, w1, b1, w2):
    """Pure-JAX reference of the PyTorch forward (1x1 convs as einsums)."""
    g = jnp.einsum("oc,ncij->noij", w1[:, :, 0, 0], x599) + b1[None, :, None, None]
    g = jax.nn.sigmoid(g)
    y = g * x596
    return jnp.einsum("oc,nchw->nohw", w2[:, :, 0, 0], y)


if __name__ == "__main__":
    key = jax.random.PRNGKey(0)
    k1, k2, k3, k4, k5 = jax.random.split(key, 5)

    Cin, Cmid, Cout, H, W = 86, 2064, 344, 7, 7

    # Inputs (matching the module's forward signature shapes).
    x599 = jax.random.normal(k1, (1, Cin, 1, 1), dtype=jnp.float32)
    x596 = jax.random.normal(k2, (1, Cmid, H, W), dtype=jnp.float32)

    # Deterministic parameter init (Conv2d weight shapes [out, in, 1, 1]).
    w1 = jax.random.normal(k3, (Cmid, Cin, 1, 1), dtype=jnp.float32) * 0.05
    b1 = jax.random.normal(k4, (Cmid,), dtype=jnp.float32) * 0.05
    w2 = jax.random.normal(k5, (Cout, Cmid, 1, 1), dtype=jnp.float32) * 0.05

    out = jax.block_until_ready(se_conv_block(x599, x596, w1, b1, w2))
    ref = jax.block_until_ready(reference(x599, x596, w1, b1, w2))

    assert out.shape == (1, Cout, H, W), out.shape
    assert jnp.allclose(out, ref, atol=1e-3, rtol=1e-3), float(jnp.max(jnp.abs(out - ref)))

    print("KERNEL_OK")
</pallas_src>

<mosaic_0001>
module attributes {stable_mosaic.version = 11 : i64} {
  func.func @se_conv_kernel(%arg0: i32, %arg1: memref<1x86xf32, #tpu.memory_space<vmem>>, %arg2: memref<86x2176xf32, #tpu.memory_space<vmem>>, %arg3: memref<1x2176xf32, #tpu.memory_space<vmem>>, %arg4: memref<56x2176xf32, #tpu.memory_space<vmem>>, %arg5: memref<2176x128xf32, #tpu.memory_space<vmem>>, %arg6: memref<56x128xf32, #tpu.memory_space<vmem>>) attributes {dimension_semantics = [#tpu.dimension_semantics<parallel>], iteration_bounds = array<i64: 3>, scalar_prefetch = 0 : i64, scratch_operands = 0 : i64, tpu.core_type = #tpu.core_type<tc>, window_params = [{pipeline_mode = #tpu.pipeline_mode<synchronous>, transform_indices = @transform_0, window_bounds = array<i64: 1, 86>}, {pipeline_mode = #tpu.pipeline_mode<synchronous>, transform_indices = @transform_1, window_bounds = array<i64: 86, 2176>}, {pipeline_mode = #tpu.pipeline_mode<synchronous>, transform_indices = @transform_2, window_bounds = array<i64: 1, 2176>}, {pipeline_mode = #tpu.pipeline_mode<synchronous>, transform_indices = @transform_3, window_bounds = array<i64: 56, 2176>}, {transform_indices = @transform_4, window_bounds = array<i64: 2176, 128>}, {transform_indices = @transform_5, window_bounds = array<i64: 56, 128>}]} {
    %c0 = arith.constant 0 : index
    %c0_0 = arith.constant 0 : index
    %0 = vector.load %arg1[%c0, %c0_0] : memref<1x86xf32, #tpu.memory_space<vmem>>, vector<1x86xf32>
    %c0_1 = arith.constant 0 : index
    %c0_2 = arith.constant 0 : index
    %1 = vector.load %arg2[%c0_1, %c0_2] : memref<86x2176xf32, #tpu.memory_space<vmem>>, vector<86x2176xf32>
    %cst = arith.constant dense<0.000000e+00> : vector<1x2176xf32>
    %2 = tpu.matmul %0, %1, %cst {dimension_numbers = #tpu.dot_dimension_numbers<[1], [0], [0], [1], [0, 0, 1, 1], [], []>} : vector<1x86xf32>, vector<86x2176xf32>, vector<1x2176xf32> -> vector<1x2176xf32>
    %c0_3 = arith.constant 0 : index
    %c0_4 = arith.constant 0 : index
    %3 = vector.load %arg3[%c0_3, %c0_4] : memref<1x2176xf32, #tpu.memory_space<vmem>>, vector<1x2176xf32>
    %4 = arith.addf %2, %3 : vector<1x2176xf32>
    %5 = arith.negf %4 : vector<1x2176xf32>
    %6 = math.exp %5 : vector<1x2176xf32>
    %cst_5 = arith.constant 1.000000e+00 : f32
    %7 = vector.broadcast %cst_5 : f32 to vector<1x2176xf32>
    %8 = arith.addf %7, %6 : vector<1x2176xf32>
    %9 = arith.divf %7, %8 : vector<1x2176xf32>
    %c0_6 = arith.constant 0 : index
    %c0_7 = arith.constant 0 : index
    %10 = vector.load %arg4[%c0_6, %c0_7] : memref<56x2176xf32, #tpu.memory_space<vmem>>, vector<56x2176xf32>
    %11 = vector.broadcast %9 : vector<1x2176xf32> to vector<56x2176xf32>
    %12 = arith.mulf %10, %11 : vector<56x2176xf32>
    %c0_8 = arith.constant 0 : index
    %c0_9 = arith.constant 0 : index
    %13 = vector.load %arg5[%c0_8, %c0_9] : memref<2176x128xf32, #tpu.memory_space<vmem>>, vector<2176x128xf32>
    %cst_10 = arith.constant dense<0.000000e+00> : vector<56x128xf32>
    %14 = tpu.matmul %12, %13, %cst_10 {dimension_numbers = #tpu.dot_dimension_numbers<[1], [0], [0], [1], [0, 0, 1, 1], [], []>} : vector<56x2176xf32>, vector<2176x128xf32>, vector<56x128xf32> -> vector<56x128xf32>
    %c0_11 = arith.constant 0 : index
    %c0_12 = arith.constant 0 : index
    %15 = vector.load %arg6[%c0_11, %c0_12] : memref<56x128xf32, #tpu.memory_space<vmem>>, vector<56x128xf32>
    tpu.vector_store %arg6[%c0_11, %c0_12], %14 {strides = array<i32>} : memref<56x128xf32, #tpu.memory_space<vmem>>, vector<56x128xf32>,
    return
  }
  func.func @transform_0(%arg0: i32) -> (i32, i32) {
    %c0_i32 = arith.constant 0 : i32
    %c0_i32_0 = arith.constant 0 : i32
    %c0_i32_1 = arith.constant 0 : i32
    return %c0_i32, %c0_i32_0 : i32, i32
  }
  func.func @transform_1(%arg0: i32) -> (i32, i32) {
    %c0_i32 = arith.constant 0 : i32
    %c0_i32_0 = arith.constant 0 : i32
    %c0_i32_1 = arith.constant 0 : i32
    return %c0_i32, %c0_i32_0 : i32, i32
  }
  func.func @transform_2(%arg0: i32) -> (i32, i32) {
    %c0_i32 = arith.constant 0 : i32
    %c0_i32_0 = arith.constant 0 : i32
    %c0_i32_1 = arith.constant 0 : i32
    return %c0_i32, %c0_i32_0 : i32, i32
  }
  func.func @transform_3(%arg0: i32) -> (i32, i32) {
    %c0_i32 = arith.constant 0 : i32
    %c0_i32_0 = arith.constant 0 : i32
    %c0_i32_1 = arith.constant 0 : i32
    return %c0_i32, %c0_i32_0 : i32, i32
  }
  func.func @transform_4(%arg0: i32) -> (i32, i32) {
    %c0_i32 = arith.constant 0 : i32
    %c0_i32_0 = arith.constant 0 : i32
    return %c0_i32, %arg0 : i32, i32
  }
  func.func @transform_5(%arg0: i32) -> (i32, i32) {
    %c0_i32 = arith.constant 0 : i32
    %c0_i32_0 = arith.constant 0 : i32
    return %c0_i32, %arg0 : i32, i32
  }
}

</mosaic_0001>

<bundles_post_ra>
// kernel: se_conv_block.1
= control target key start
LH: loop header
LB: loop body
LE: loop exit
PB: predicated region body
PF: predicated region fallthrough
CT: control target
= control target key end

     0   :  { %s4947_s18 = smov 0   ;;  %s4949_s19 = smov 0   ;;  %s7587_s0 = inlined_call_operand.vmem [shape: f32[1,86], index: 0, kind: input, shape index: {}]   ;;  %s7588_s1 = inlined_call_operand.vmem [shape: f32[86,2176], index: 1, kind: input, shape index: {}]   ;;  %s7589_s2 = inlined_call_operand.vmem [shape: f32[1,2176], index: 2, kind: input, shape index: {}]   ;;  %s7590_s3 = inlined_call_operand.vmem [shape: f32[56,2176], index: 3, kind: input, shape index: {}]   ;;  %s7591_s4 = inlined_call_operand.vmem [shape: f32[2176,384], index: 4, kind: input, shape index: {}]   ;;  %s7592_s5 = inlined_call_operand.vmem [shape: f32[56,384], index: 5, kind: output, shape index: {}]  }
   0x1   :  { %s4951_s20 = smov 0  }
   0x2 LB: > { %s4720_s21 = sadd.s32 4294967295, %s4915_s20   ;;  %s4964_s22 = sadd.s32 1, %s4915_s20   ;;  %s4915_s20 = sphi %s4951_s20, %s7654_s20   ;;  %s4911_s19 = sphi %s4949_s19, %s7653_s19   ;;  %s4907_s18 = sphi %s4947_s18, %s7652_s18  }
   0x3   : > { %s103_s23 = ssub.s32 %s4915_s20, %s4964_s22  ;;  %s106_s24 = sadd.s32 1, %s4911_s19 }
   0x4   : > { %p104_p0 = scmp.eq.s32.totalorder %s103_s23, 0  ;;  %p113_p1 = scmp.ne.s32.totalorder %s4911_s19, %s4907_s18 }
   0x5   : > { %p114_p2 = scmp.eq.s32.totalorder %s4915_s20, 0  ;;  %p143_p3 = scmp.eq.s32.totalorder %s4720_s21, 2 }
   0x6   : > { %s4975_s25 = scalar_select %p104_p0, %s4911_s19, %s106_s24  }
   0x7   : > { %p115_p4 = por %p114_p2, %p113_p1  ;;  %p4977_p5 = por %p143_p3, %p113_p1 }
   0x8   : > { %p4723_p6 = scmp.ge.s32.totalorder %s4915_s20, 3 }
   0xa   : > { %177 = sbr.rel (%p4723_p6) target bundleno = 291 (0x123), region = 32 }
   0xf   : > { %180 = sbr.rel (!%p115_p4) target bundleno = 291 (0x123), region = 36  ;;  %s182_s27 = sand.u32 (%p115_p4), 1, %s4911_s19  }
  0x10   : > { %s4724_s28 = sshll.u32 (%p115_p4), %s4915_s20, 3  ;;  %s4796_s29 = smul.u32 (%p115_p4), 2176, %s182_s27 }
  0x11   : > { %s4987_s7 = scalar_lea.vmem (%p115_p4), %s7591_s4, %s4724_s28 }
  0x12   : > { %v758_v0 = vld [vmem:[%s4987_s7] sm:$0xff] (%p115_p4)  ;;  %v760_v1 = vld [vmem:[%s4987_s7 + $0x18] sm:$0xff] (%p115_p4)  ;;  %v762_v2 = vld [vmem:[%s4987_s7 + $0x30] sm:$0xff] (%p115_p4)  ;;  %s4992_s8 = scalar_lea.vmem (%p115_p4), [#allocation2], %s4796_s29 }
  0x13   : > { %759 = vst [vmem:[%s4992_s8] sm:$0xff] (%p115_p4), %v758_v0  ;;  %v764_v3 = vld [vmem:[%s4987_s7 + $0x48] sm:$0xff] (%p115_p4)  ;;  %v766_v4 = vld [vmem:[%s4987_s7 + $0x60] sm:$0xff] (%p115_p4)  ;;  %v768_v5 = vld [vmem:[%s4987_s7 + $0x78] sm:$0xff] (%p115_p4) }
  0x14   : > { %761 = vst [vmem:[%s4992_s8 + $0x8] sm:$0xff] %v760_v1  ;;  %v770_v6 = vld [vmem:[%s4987_s7 + $0x90] sm:$0xff]  ;;  %v772_v7 = vld [vmem:[%s4987_s7 + $0xa8] sm:$0xff]  ;;  %v774_v8 = vld [vmem:[%s4987_s7 + $0xc0] sm:$0xff] }
  0x15   : > { %763 = vst [vmem:[%s4992_s8 + $0x10] sm:$0xff] %v762_v2  ;;  %v776_v9 = vld [vmem:[%s4987_s7 + $0xd8] sm:$0xff]  ;;  %v778_v10 = vld [vmem:[%s4987_s7 + $0xf0] sm:$0xff]  ;;  %v780_v11 = vld [vmem:[%s4987_s7 + $0x108] sm:$0xff] }
  0x16   : > { %765 = vst [vmem:[%s4992_s8 + $0x18] sm:$0xff] %v764_v3  ;;  %v782_v12 = vld [vmem:[%s4987_s7 + $0x120] sm:$0xff]  ;;  %v784_v13 = vld [vmem:[%s4987_s7 + $0x138] sm:$0xff]  ;;  %v786_v14 = vld [vmem:[%s4987_s7 + $0x150] sm:$0xff] }
  0x17   : > { %767 = vst [vmem:[%s4992_s8 + $0x20] sm:$0xff] %v766_v4  ;;  %v788_v15 = vld [vmem:[%s4987_s7 + $0x168] sm:$0xff]  ;;  %v790_v16 = vld [vmem:[%s4987_s7 + $0x180] sm:$0xff]  ;;  %v792_v17 = vld [vmem:[%s4987_s7 + $0x198] sm:$0xff] }
  0x18   : > { %769 = vst [vmem:[%s4992_s8 + $0x28] sm:$0xff] %v768_v5  ;;  %v794_v18 = vld [vmem:[%s4987_s7 + $0x1b0] sm:$0xff]  ;;  %v796_v19 = vld [vmem:[%s4987_s7 + $0x1c8] sm:$0xff]  ;;  %v798_v20 = vld [vmem:[%s4987_s7 + $0x1e0] sm:$0xff] }
  0x19   : > { %771 = vst [vmem:[%s4992_s8 + $0x30] sm:$0xff] %v770_v6  ;;  %v800_v21 = vld [vmem:[%s4987_s7 + $0x1f8] sm:$0xff]  ;;  %v802_v22 = vld [vmem:[%s4987_s7 + $0x210] sm:$0xff]  ;;  %v804_v23 = vld [vmem:[%s4987_s7 + $0x228] sm:$0xff] }
  0x1a   : > { %773 = vst [vmem:[%s4992_s8 + $0x38] sm:$0xff] %v772_v7  ;;  %v806_v24 = vld [vmem:[%s4987_s7 + $0x240] sm:$0xff]  ;;  %v808_v25 = vld [vmem:[%s4987_s7 + $0x258] sm:$0xff]  ;;  %v810_v26 = vld [vmem:[%s4987_s7 + $0x270] sm:$0xff] }
  0x1b   : > { %775 = vst [vmem:[%s4992_s8 + $0x40] sm:$0xff] %v774_v8  ;;  %v812_v27 = vld [vmem:[%s4987_s7 + $0x288] sm:$0xff]  ;;  %v814_v28 = vld [vmem:[%s4987_s7 + $0x2a0] sm:$0xff]  ;;  %v816_v29 = vld [vmem:[%s4987_s7 + $0x2b8] sm:$0xff] }
  0x1c   : > { %777 = vst [vmem:[%s4992_s8 + $0x48] sm:$0xff] %v776_v9  ;;  %v818_v30 = vld [vmem:[%s4987_s7 + $0x2d0] sm:$0xff]  ;;  %v820_v31 = vld [vmem:[%s4987_s7 + $0x2e8] sm:$0xff]  ;;  %v822_v32 = vld [vmem:[%s4987_s7 + $0x300] sm:$0xff] }
  0x1d   : > { %779 = vst [vmem:[%s4992_s8 + $0x50] sm:$0xff] %v778_v10  ;;  %v824_v33 = vld [vmem:[%s4987_s7 + $0x318] sm:$0xff]  ;;  %v826_v34 = vld [vmem:[%s4987_s7 + $0x330] sm:$0xff]  ;;  %v828_v35 = vld [vmem:[%s4987_s7 + $0x348] sm:$0xff] }
  0x1e   : > { %781 = vst [vmem:[%s4992_s8 + $0x58] sm:$0xff] %v780_v11  ;;  %v830_v36 = vld [vmem:[%s4987_s7 + $0x360] sm:$0xff]  ;;  %v832_v37 = vld [vmem:[%s4987_s7 + $0x378] sm:$0xff]  ;;  %v834_v38 = vld [vmem:[%s4987_s7 + $0x390] sm:$0xff] }
  0x1f   : > { %783 = vst [vmem:[%s4992_s8 + $0x60] sm:$0xff] %v782_v12  ;;  %v836_v39 = vld [vmem:[%s4987_s7 + $0x3a8] sm:$0xff]  ;;  %v838_v40 = vld [vmem:[%s4987_s7 + $0x3c0] sm:$0xff]  ;;  %v840_v41 = vld [vmem:[%s4987_s7 + $0x3d8] sm:$0xff] }
  0x20   : > { %785 = vst [vmem:[%s4992_s8 + $0x68] sm:$0xff] %v784_v13  ;;  %v842_v42 = vld [vmem:[%s4987_s7 + $0x3f0] sm:$0xff]  ;;  %v844_v43 = vld [vmem:[%s4987_s7 + $0x408] sm:$0xff]  ;;  %v846_v44 = vld [vmem:[%s4987_s7 + $0x420] sm:$0xff] }
  0x21   : > { %787 = vst [vmem:[%s4992_s8 + $0x70] sm:$0xff] %v786_v14  ;;  %v848_v45 = vld [vmem:[%s4987_s7 + $0x438] sm:$0xff]  ;;  %v850_v46 = vld [vmem:[%s4987_s7 + $0x450] sm:$0xff]  ;;  %v852_v47 = vld [vmem:[%s4987_s7 + $0x468] sm:$0xff] }
  0x22   : > { %789 = vst [vmem:[%s4992_s8 + $0x78] sm:$0xff] %v788_v15  ;;  %v854_v48 = vld [vmem:[%s4987_s7 + $0x480] sm:$0xff]  ;;  %v856_v49 = vld [vmem:[%s4987_s7 + $0x498] sm:$0xff]  ;;  %v858_v50 = vld [vmem:[%s4987_s7 + $0x4b0] sm:$0xff] }
  0x23   : > { %791 = vst [vmem:[%s4992_s8 + $0x80] sm:$0xff] %v790_v16  ;;  %v860_v51 = vld [vmem:[%s4987_s7 + $0x4c8] sm:$0xff]  ;;  %v862_v52 = vld [vmem:[%s4987_s7 + $0x4e0] sm:$0xff]  ;;  %v864_v53 = vld [vmem:[%s4987_s7 + $0x4f8] sm:$0xff] }
  0x24   : > { %793 = vst [vmem:[%s4992_s8 + $0x88] sm:$0xff] %v792_v17  ;;  %v866_v54 = vld [vmem:[%s4987_s7 + $0x510] sm:$0xff]  ;;  %v868_v55 = vld [vmem:[%s4987_s7 + $0x528] sm:$0xff]  ;;  %v870_v56 = vld [vmem:[%s4987_s7 + $0x540] sm:$0xff] }
  0x25   : > { %795 = vst [vmem:[%s4992_s8 + $0x90] sm:$0xff] %v794_v18  ;;  %v872_v57 = vld [vmem:[%s4987_s7 + $0x558] sm:$0xff]  ;;  %v874_v58 = vld [vmem:[%s4987_s7 + $0x570] sm:$0xff]  ;;  %v876_v59 = vld [vmem:[%s4987_s7 + $0x588] sm:$0xff] }
  0x26   : > { %797 = vst [vmem:[%s4992_s8 + $0x98] sm:$0xff] %v796_v19  ;;  %v878_v60 = vld [vmem:[%s4987_s7 + $0x5a0] sm:$0xff]  ;;  %v880_v61 = vld [vmem:[%s4987_s7 + $0x5b8] sm:$0xff]  ;;  %v882_v62 = vld [vmem:[%s4987_s7 + $0x5d0] sm:$0xff] }
  0x27   : > { %799 = vst [vmem:[%s4992_s8 + $0xa0] sm:$0xff] %v798_v20  ;;  %v884_v63 = vld [vmem:[%s4987_s7 + $0x5e8] sm:$0xff]  ;;  %v886_v0 = vld [vmem:[%s4987_s7 + $0x600] sm:$0xff]  ;;  %v888_v1 = vld [vmem:[%s4987_s7 + $0x618] sm:$0xff] }
  0x28   : > { %801 = vst [vmem:[%s4992_s8 + $0xa8] sm:$0xff] %v800_v21  ;;  %v890_v2 = vld [vmem:[%s4987_s7 + $0x630] sm:$0xff]  ;;  %v892_v3 = vld [vmem:[%s4987_s7 + $0x648] sm:$0xff]  ;;  %v894_v4 = vld [vmem:[%s4987_s7 + $0x660] sm:$0xff] }
  0x29   : > { %803 = vst [vmem:[%s4992_s8 + $0xb0] sm:$0xff] %v802_v22  ;;  %v896_v5 = vld [vmem:[%s4987_s7 + $0x678] sm:$0xff]  ;;  %v898_v6 = vld [vmem:[%s4987_s7 + $0x690] sm:$0xff]  ;;  %v900_v7 = vld [vmem:[%s4987_s7 + $0x6a8] sm:$0xff] }
  0x2a   : > { %805 = vst [vmem:[%s4992_s8 + $0xb8] sm:$0xff] %v804_v23  ;;  %v902_v8 = vld [vmem:[%s4987_s7 + $0x6c0] sm:$0xff]  ;;  %v904_v9 = vld [vmem:[%s4987_s7 + $0x6d8] sm:$0xff]  ;;  %v906_v10 = vld [vmem:[%s4987_s7 + $0x6f0] sm:$0xff] }
  0x2b   : > { %807 = vst [vmem:[%s4992_s8 + $0xc0] sm:$0xff] %v806_v24  ;;  %v908_v11 = vld [vmem:[%s4987_s7 + $0x708] sm:$0xff]  ;;  %v910_v12 = vld [vmem:[%s4987_s7 + $0x720] sm:$0xff]  ;;  %v912_v13 = vld [vmem:[%s4987_s7 + $0x738] sm:$0xff] }
  0x2c   : > { %809 = vst [vmem:[%s4992_s8 + $0xc8] sm:$0xff] %v808_v25  ;;  %v914_v14 = vld [vmem:[%s4987_s7 + $0x750] sm:$0xff]  ;;  %v916_v15 = vld [vmem:[%s4987_s7 + $0x768] sm:$0xff]  ;;  %v918_v16 = vld [vmem:[%s4987_s7 + $0x780] sm:$0xff] }
  0x2d   : > { %811 = vst [vmem:[%s4992_s8 + $0xd0] sm:$0xff] %v810_v26  ;;  %v920_v17 = vld [vmem:[%s4987_s7 + $0x798] sm:$0xff]  ;;  %v922_v18 = vld [vmem:[%s4987_s7 + $0x7b0] sm:$0xff]  ;;  %v924_v19 = vld [vmem:[%s4987_s7 + $0x7c8] sm:$0xff] }
  0x2e   : > { %813 = vst [vmem:[%s4992_s8 + $0xd8] sm:$0xff] %v812_v27  ;;  %v926_v20 = vld [vmem:[%s4987_s7 + $0x7e0] sm:$0xff]  ;;  %v928_v21 = vld [vmem:[%s4987_s7 + $0x7f8] sm:$0xff]  ;;  %v930_v22 = vld [vmem:[%s4987_s7 + $0x810] sm:$0xff] }
  0x2f   : > { %815 = vst [vmem:[%s4992_s8 + $0xe0] sm:$0xff] %v814_v28  ;;  %v932_v23 = vld [vmem:[%s4987_s7 + $0x828] sm:$0xff]  ;;  %v934_v24 = vld [vmem:[%s4987_s7 + $0x840] sm:$0xff]  ;;  %v936_v25 = vld [vmem:[%s4987_s7 + $0x858] sm:$0xff] }
  0x30   : > { %817 = vst [vmem:[%s4992_s8 + $0xe8] sm:$0xff] %v816_v29  ;;  %v938_v26 = vld [vmem:[%s4987_s7 + $0x870] sm:$0xff]  ;;  %v940_v27 = vld [vmem:[%s4987_s7 + $0x888] sm:$0xff]  ;;  %v942_v28 = vld [vmem:[%s4987_s7 + $0x8a0] sm:$0xff] }
  0x31   : > { %819 = vst [vmem:[%s4992_s8 + $0xf0] sm:$0xff] %v818_v30  ;;  %v944_v29 = vld [vmem:[%s4987_s7 + $0x8b8] sm:$0xff]  ;;  %v946_v30 = vld [vmem:[%s4987_s7 + $0x8d0] sm:$0xff] }
  0x32   : > { %821 = vst [vmem:[%s4992_s8 + $0xf8] sm:$0xff] %v820_v31  ;;  %v948_v31 = vld [vmem:[%s4987_s7 + $0x8e8] sm:$0xff] }
  0x33   : > { %823 = vst [vmem:[%s4992_s8 + $0x100] sm:$0xff] %v822_v32  ;;  %v950_v32 = vld [vmem:[%s4987_s7 + $0x900] sm:$0xff] }
  0x34   : > { %825 = vst [vmem:[%s4992_s8 + $0x108] sm:$0xff] %v824_v33  ;;  %v952_v33 = vld [vmem:[%s4987_s7 + $0x918] sm:$0xff] }
  0x35   : > { %827 = vst [vmem:[%s4992_s8 + $0x110] sm:$0xff] %v826_v34  ;;  %v954_v34 = vld [vmem:[%s4987_s7 + $0x930] sm:$0xff] }
  0x36   : > { %829 = vst [vmem:[%s4992_s8 + $0x118] sm:$0xff] %v828_v35  ;;  %v956_v35 = vld [vmem:[%s4987_s7 + $0x948] sm:$0xff] }
  0x37   : > { %831 = vst [vmem:[%s4992_s8 + $0x120] sm:$0xff] %v830_v36  ;;  %v958_v36 = vld [vmem:[%s4987_s7 + $0x960] sm:$0xff] }
  0x38   : > { %833 = vst [vmem:[%s4992_s8 + $0x128] sm:$0xff] %v832_v37  ;;  %v960_v37 = vld [vmem:[%s4987_s7 + $0x978] sm:$0xff] }
  0x39   : > { %835 = vst [vmem:[%s4992_s8 + $0x130] sm:$0xff] %v834_v38  ;;  %v962_v38 = vld [vmem:[%s4987_s7 + $0x990] sm:$0xff] }
  0x3a   : > { %837 = vst [vmem:[%s4992_s8 + $0x138] sm:$0xff] %v836_v39  ;;  %v964_v39 = vld [vmem:[%s4987_s7 + $0x9a8] sm:$0xff] }
  0x3b   : > { %839 = vst [vmem:[%s4992_s8 + $0x140] sm:$0xff] %v838_v40  ;;  %v966_v40 = vld [vmem:[%s4987_s7 + $0x9c0] sm:$0xff] }
  0x3c   : > { %841 = vst [vmem:[%s4992_s8 + $0x148] sm:$0xff] %v840_v41  ;;  %v968_v41 = vld [vmem:[%s4987_s7 + $0x9d8] sm:$0xff] }
  0x3d   : > { %843 = vst [vmem:[%s4992_s8 + $0x150] sm:$0xff] %v842_v42  ;;  %v970_v42 = vld [vmem:[%s4987_s7 + $0x9f0] sm:$0xff] }
  0x3e   : > { %845 = vst [vmem:[%s4992_s8 + $0x158] sm:$0xff] %v844_v43  ;;  %v972_v43 = vld [vmem:[%s4987_s7 + $0xa08] sm:$0xff] }
  0x3f   : > { %847 = vst [vmem:[%s4992_s8 + $0x160] sm:$0xff] %v846_v44  ;;  %v974_v44 = vld [vmem:[%s4987_s7 + $0xa20] sm:$0xff] }
  0x40   : > { %849 = vst [vmem:[%s4992_s8 + $0x168] sm:$0xff] %v848_v45  ;;  %v976_v45 = vld [vmem:[%s4987_s7 + $0xa38] sm:$0xff] }
  0x41   : > { %851 = vst [vmem:[%s4992_s8 + $0x170] sm:$0xff] %v850_v46  ;;  %v978_v46 = vld [vmem:[%s4987_s7 + $0xa50] sm:$0xff] }
  0x42   : > { %853 = vst [vmem:[%s4992_s8 + $0x178] sm:$0xff] %v852_v47  ;;  %v980_v47 = vld [vmem:[%s4987_s7 + $0xa68] sm:$0xff] }
  0x43   : > { %855 = vst [vmem:[%s4992_s8 + $0x180] sm:$0xff] %v854_v48  ;;  %v982_v48 = vld [vmem:[%s4987_s7 + $0xa80] sm:$0xff] }
  0x44   : > { %857 = vst [vmem:[%s4992_s8 + $0x188] sm:$0xff] %v856_v49  ;;  %v984_v49 = vld [vmem:[%s4987_s7 + $0xa98] sm:$0xff] }
  0x45   : > { %859 = vst [vmem:[%s4992_s8 + $0x190] sm:$0xff] %v858_v50  ;;  %v986_v50 = vld [vmem:[%s4987_s7 + $0xab0] sm:$0xff] }
  0x46   : > { %861 = vst [vmem:[%s4992_s8 + $0x198] sm:$0xff] %v860_v51  ;;  %v988_v51 = vld [vmem:[%s4987_s7 + $0xac8] sm:$0xff] }
  0x47   : > { %863 = vst [vmem:[%s4992_s8 + $0x1a0] sm:$0xff] %v862_v52  ;;  %v990_v52 = vld [vmem:[%s4987_s7 + $0xae0] sm:$0xff] }
  0x48   : > { %865 = vst [vmem:[%s4992_s8 + $0x1a8] sm:$0xff] %v864_v53  ;;  %v992_v53 = vld [vmem:[%s4987_s7 + $0xaf8] sm:$0xff] }
  0x49   : > { %867 = vst [vmem:[%s4992_s8 + $0x1b0] sm:$0xff] %v866_v54  ;;  %v994_v54 = vld [vmem:[%s4987_s7 + $0xb10] sm:$0xff] }
  0x4a   : > { %869 = vst [vmem:[%s4992_s8 + $0x1b8] sm:$0xff] %v868_v55  ;;  %v996_v55 = vld [vmem:[%s4987_s7 + $0xb28] sm:$0xff] }
  0x4b   : > { %871 = vst [vmem:[%s4992_s8 + $0x1c0] sm:$0xff] %v870_v56  ;;  %v998_v56 = vld [vmem:[%s4987_s7 + $0xb40] sm:$0xff] }
  0x4c   : > { %873 = vst [vmem:[%s4992_s8 + $0x1c8] sm:$0xff] %v872_v57  ;;  %v1000_v57 = vld [vmem:[%s4987_s7 + $0xb58] sm:$0xff] }
  0x4d   : > { %875 = vst [vmem:[%s4992_s8 + $0x1d0] sm:$0xff] %v874_v58  ;;  %v1002_v58 = vld [vmem:[%s4987_s7 + $0xb70] sm:$0xff] }
  0x4e   : > { %877 = vst [vmem:[%s4992_s8 + $0x1d8] sm:$0xff] %v876_v59  ;;  %v1004_v59 = vld [vmem:[%s4987_s7 + $0xb88] sm:$0xff] }
  0x4f   : > { %879 = vst [vmem:[%s4992_s8 + $0x1e0] sm:$0xff] %v878_v60  ;;  %v1006_v60 = vld [vmem:[%s4987_s7 + $0xba0] sm:$0xff] }
  0x50   : > { %881 = vst [vmem:[%s4992_s8 + $0x1e8] sm:$0xff] %v880_v61  ;;  %v1008_v61 = vld [vmem:[%s4987_s7 + $0xbb8] sm:$0xff] }
  0x51   : > { %883 = vst [vmem:[%s4992_s8 + $0x1f0] sm:$0xff] %v882_v62  ;;  %v1010_v62 = vld [vmem:[%s4987_s7 + $0xbd0] sm:$0xff] }
  0x52   : > { %885 = vst [vmem:[%s4992_s8 + $0x1f8] sm:$0xff] %v884_v63  ;;  %v1012_v63 = vld [vmem:[%s4987_s7 + $0xbe8] sm:$0xff] }
  0x53   : > { %887 = vst [vmem:[%s4992_s8 + $0x200] sm:$0xff] %v886_v0  ;;  %v1014_v0 = vld [vmem:[%s4987_s7 + $0xc00] sm:$0xff] }
  0x54   : > { %889 = vst [vmem:[%s4992_s8 + $0x208] sm:$0xff] %v888_v1  ;;  %v1016_v1 = vld [vmem:[%s4987_s7 + $0xc18] sm:$0xff] }
  0x55   : > { %891 = vst [vmem:[%s4992_s8 + $0x210] sm:$0xff] %v890_v2  ;;  %v1018_v2 = vld [vmem:[%s4987_s7 + $0xc30] sm:$0xff] }
  0x56   : > { %893 = vst [vmem:[%s4992_s8 + $0x218] sm:$0xff] %v892_v3  ;;  %v1020_v3 = vld [vmem:[%s4987_s7 + $0xc48] sm:$0xff] }
  0x57   : > { %895 = vst [vmem:[%s4992_s8 + $0x220] sm:$0xff] %v894_v4  ;;  %v1022_v4 = vld [vmem:[%s4987_s7 + $0xc60] sm:$0xff] }
  0x58   : > { %897 = vst [vmem:[%s4992_s8 + $0x228] sm:$0xff] %v896_v5  ;;  %v1024_v5 = vld [vmem:[%s4987_s7 + $0xc78] sm:$0xff] }
  0x59   : > { %899 = vst [vmem:[%s4992_s8 + $0x230] sm:$0xff] %v898_v6  ;;  %v1026_v6 = vld [vmem:[%s4987_s7 + $0xc90] sm:$0xff] }
  0x5a   : > { %901 = vst [vmem:[%s4992_s8 + $0x238] sm:$0xff] %v900_v7  ;;  %v1028_v7 = vld [vmem:[%s4987_s7 + $0xca8] sm:$0xff] }
  0x5b   : > { %903 = vst [vmem:[%s4992_s8 + $0x240] sm:$0xff] %v902_v8  ;;  %v1030_v8 = vld [vmem:[%s4987_s7 + $0xcc0] sm:$0xff] }
  0x5c   : > { %905 = vst [vmem:[%s4992_s8 + $0x248] sm:$0xff] %v904_v9  ;;  %v1032_v9 = vld [vmem:[%s4987_s7 + $0xcd8] sm:$0xff] }
  0x5d   : > { %907 = vst [vmem:[%s4992_s8 + $0x250] sm:$0xff] %v906_v10  ;;  %v1034_v10 = vld [vmem:[%s4987_s7 + $0xcf0] sm:$0xff] }
  0x5e   : > { %909 = vst [vmem:[%s4992_s8 + $0x258] sm:$0xff] %v908_v11  ;;  %v1036_v11 = vld [vmem:[%s4987_s7 + $0xd08] sm:$0xff] }
  0x5f   : > { %911 = vst [vmem:[%s4992_s8 + $0x260] sm:$0xff] %v910_v12  ;;  %v1038_v12 = vld [vmem:[%s4987_s7 + $0xd20] sm:$0xff] }
  0x60   : > { %913 = vst [vmem:[%s4992_s8 + $0x268] sm:$0xff] %v912_v13  ;;  %v1040_v13 = vld [vmem:[%s4987_s7 + $0xd38] sm:$0xff] }
  0x61   : > { %915 = vst [vmem:[%s4992_s8 + $0x270] sm:$0xff] %v914_v14  ;;  %v1042_v14 = vld [vmem:[%s4987_s7 + $0xd50] sm:$0xff] }
  0x62   : > { %917 = vst [vmem:[%s4992_s8 + $0x278] sm:$0xff] %v916_v15  ;;  %v1044_v15 = vld [vmem:[%s4987_s7 + $0xd68] sm:$0xff] }
  0x63   : > { %919 = vst [vmem:[%s4992_s8 + $0x280] sm:$0xff] %v918_v16  ;;  %v1046_v16 = vld [vmem:[%s4987_s7 + $0xd80] sm:$0xff] }
  0x64   : > { %921 = vst [vmem:[%s4992_s8 + $0x288] sm:$0xff] %v920_v17  ;;  %v1048_v17 = vld [vmem:[%s4987_s7 + $0xd98] sm:$0xff] }
  0x65   : > { %923 = vst [vmem:[%s4992_s8 + $0x290] sm:$0xff] %v922_v18  ;;  %v1050_v18 = vld [vmem:[%s4987_s7 + $0xdb0] sm:$0xff] }
  0x66   : > { %925 = vst [vmem:[%s4992_s8 + $0x298] sm:$0xff] %v924_v19  ;;  %v1052_v19 = vld [vmem:[%s4987_s7 + $0xdc8] sm:$0xff] }
  0x67   : > { %927 = vst [vmem:[%s4992_s8 + $0x2a0] sm:$0xff] %v926_v20  ;;  %v1054_v20 = vld [vmem:[%s4987_s7 + $0xde0] sm:$0xff] }
  0x68   : > { %929 = vst [vmem:[%s4992_s8 + $0x2a8] sm:$0xff] %v928_v21  ;;  %v1056_v21 = vld [vmem:[%s4987_s7 + $0xdf8] sm:$0xff] }
  0x69   : > { %931 = vst [vmem:[%s4992_s8 + $0x2b0] sm:$0xff] %v930_v22  ;;  %v1058_v22 = vld [vmem:[%s4987_s7 + $0xe10] sm:$0xff] }
  0x6a   : > { %933 = vst [vmem:[%s4992_s8 + $0x2b8] sm:$0xff] %v932_v23  ;;  %v1060_v23 = vld [vmem:[%s4987_s7 + $0xe28] sm:$0xff] }
  0x6b   : > { %935 = vst [vmem:[%s4992_s8 + $0x2c0] sm:$0xff] %v934_v24  ;;  %v1062_v24 = vld [vmem:[%s4987_s7 + $0xe40] sm:$0xff] }
  0x6c   : > { %937 = vst [vmem:[%s4992_s8 + $0x2c8] sm:$0xff] %v936_v25  ;;  %v1064_v25 = vld [vmem:[%s4987_s7 + $0xe58] sm:$0xff] }
  0x6d   : > { %939 = vst [vmem:[%s4992_s8 + $0x2d0] sm:$0xff] %v938_v26  ;;  %v1066_v26 = vld [vmem:[%s4987_s7 + $0xe70] sm:$0xff] }
  0x6e   : > { %941 = vst [vmem:[%s4992_s8 + $0x2d8] sm:$0xff] %v940_v27  ;;  %v1068_v27 = vld [vmem:[%s4987_s7 + $0xe88] sm:$0xff] }
  0x6f   : > { %943 = vst [vmem:[%s4992_s8 + $0x2e0] sm:$0xff] %v942_v28  ;;  %v1070_v28 = vld [vmem:[%s4987_s7 + $0xea0] sm:$0xff] }
  0x70   : > { %945 = vst [vmem:[%s4992_s8 + $0x2e8] sm:$0xff] %v944_v29  ;;  %v1072_v29 = vld [vmem:[%s4987_s7 + $0xeb8] sm:$0xff] }
  0x71   : > { %947 = vst [vmem:[%s4992_s8 + $0x2f0] sm:$0xff] %v946_v30  ;;  %v1074_v30 = vld [vmem:[%s4987_s7 + $0xed0] sm:$0xff] }
  0x72   : > { %949 = vst [vmem:[%s4992_s8 + $0x2f8] sm:$0xff] %v948_v31  ;;  %v1076_v31 = vld [vmem:[%s4987_s7 + $0xee8] sm:$0xff] }
  0x73   : > { %951 = vst [vmem:[%s4992_s8 + $0x300] sm:$0xff] %v950_v32  ;;  %v1078_v32 = vld [vmem:[%s4987_s7 + $0xf00] sm:$0xff] }
  0x74   : > { %953 = vst [vmem:[%s4992_s8 + $0x308] sm:$0xff] %v952_v33  ;;  %v1080_v33 = vld [vmem:[%s4987_s7 + $0xf18] sm:$0xff] }
  0x75   : > { %955 = vst [vmem:[%s4992_s8 + $0x310] sm:$0xff] %v954_v34  ;;  %v1082_v34 = vld [vmem:[%s4987_s7 + $0xf30] sm:$0xff] }
  0x76   : > { %957 = vst [vmem:[%s4992_s8 + $0x318] sm:$0xff] %v956_v35  ;;  %v1084_v35 = vld [vmem:[%s4987_s7 + $0xf48] sm:$0xff] }
  0x77   : > { %959 = vst [vmem:[%s4992_s8 + $0x320] sm:$0xff] %v958_v36  ;;  %v1086_v36 = vld [vmem:[%s4987_s7 + $0xf60] sm:$0xff] }
  0x78   : > { %961 = vst [vmem:[%s4992_s8 + $0x328] sm:$0xff] %v960_v37  ;;  %v1088_v37 = vld [vmem:[%s4987_s7 + $0xf78] sm:$0xff] }
  0x79   : > { %963 = vst [vmem:[%s4992_s8 + $0x330] sm:$0xff] %v962_v38  ;;  %v1090_v38 = vld [vmem:[%s4987_s7 + $0xf90] sm:$0xff] }
  0x7a   : > { %965 = vst [vmem:[%s4992_s8 + $0x338] sm:$0xff] %v964_v39  ;;  %v1092_v39 = vld [vmem:[%s4987_s7 + $0xfa8] sm:$0xff] }
  0x7b   : > { %967 = vst [vmem:[%s4992_s8 + $0x340] sm:$0xff] %v966_v40  ;;  %v1094_v40 = vld [vmem:[%s4987_s7 + $0xfc0] sm:$0xff] }
  0x7c   : > { %969 = vst [vmem:[%s4992_s8 + $0x348] sm:$0xff] %v968_v41  ;;  %v1096_v41 = vld [vmem:[%s4987_s7 + $0xfd8] sm:$0xff] }
  0x7d   : > { %971 = vst [vmem:[%s4992_s8 + $0x350] sm:$0xff] %v970_v42  ;;  %v1098_v42 = vld [vmem:[%s4987_s7 + $0xff0] sm:$0xff] }
  0x7e   : > { %973 = vst [vmem:[%s4992_s8 + $0x358] sm:$0xff] %v972_v43  ;;  %v1100_v43 = vld [vmem:[%s4987_s7 + $0x1008] sm:$0xff] }
  0x7f   : > { %975 = vst [vmem:[%s4992_s8 + $0x360] sm:$0xff] %v974_v44  ;;  %v1102_v44 = vld [vmem:[%s4987_s7 + $0x1020] sm:$0xff] }
  0x80   : > { %977 = vst [vmem:[%s4992_s8 + $0x368] sm:$0xff] %v976_v45  ;;  %v1104_v45 = vld [vmem:[%s4987_s7 + $0x1038] sm:$0xff] }
  0x81   : > { %979 = vst [vmem:[%s4992_s8 + $0x370] sm:$0xff] %v978_v46  ;;  %v1106_v46 = vld [vmem:[%s4987_s7 + $0x1050] sm:$0xff] }
  0x82   : > { %981 = vst [vmem:[%s4992_s8 + $0x378] sm:$0xff] %v980_v47  ;;  %v1108_v47 = vld [vmem:[%s4987_s7 + $0x1068] sm:$0xff] }
  0x83   : > { %983 = vst [vmem:[%s4992_s8 + $0x380] sm:$0xff] %v982_v48  ;;  %v1110_v48 = vld [vmem:[%s4987_s7 + $0x1080] sm:$0xff] }
  0x84   : > { %985 = vst [vmem:[%s4992_s8 + $0x388] sm:$0xff] %v984_v49  ;;  %v1112_v49 = vld [vmem:[%s4987_s7 + $0x1098] sm:$0xff] }
  0x85   : > { %987 = vst [vmem:[%s4992_s8 + $0x390] sm:$0xff] %v986_v50  ;;  %v1114_v50 = vld [vmem:[%s4987_s7 + $0x10b0] sm:$0xff] }
  0x86   : > { %989 = vst [vmem:[%s4992_s8 + $0x398] sm:$0xff] %v988_v51  ;;  %v1116_v51 = vld [vmem:[%s4987_s7 + $0x10c8] sm:$0xff] }
  0x87   : > { %991 = vst [vmem:[%s4992_s8 + $0x3a0] sm:$0xff] %v990_v52  ;;  %v1118_v52 = vld [vmem:[%s4987_s7 + $0x10e0] sm:$0xff] }
  0x88   : > { %993 = vst [vmem:[%s4992_s8 + $0x3a8] sm:$0xff] %v992_v53  ;;  %v1120_v53 = vld [vmem:[%s4987_s7 + $0x10f8] sm:$0xff] }
  0x89   : > { %995 = vst [vmem:[%s4992_s8 + $0x3b0] sm:$0xff] %v994_v54  ;;  %v1122_v54 = vld [vmem:[%s4987_s7 + $0x1110] sm:$0xff] }
  0x8a   : > { %997 = vst [vmem:[%s4992_s8 + $0x3b8] sm:$0xff] %v996_v55  ;;  %v1124_v55 = vld [vmem:[%s4987_s7 + $0x1128] sm:$0xff] }
  0x8b   : > { %999 = vst [vmem:[%s4992_s8 + $0x3c0] sm:$0xff] %v998_v56  ;;  %v1126_v56 = vld [vmem:[%s4987_s7 + $0x1140] sm:$0xff] }
  0x8c   : > { %1001 = vst [vmem:[%s4992_s8 + $0x3c8] sm:$0xff] %v1000_v57  ;;  %v1128_v57 = vld [vmem:[%s4987_s7 + $0x1158] sm:$0xff] }
  0x8d   : > { %1003 = vst [vmem:[%s4992_s8 + $0x3d0] sm:$0xff] %v1002_v58  ;;  %v1130_v58 = vld [vmem:[%s4987_s7 + $0x1170] sm:$0xff] }
  0x8e   : > { %1005 = vst [vmem:[%s4992_s8 + $0x3d8] sm:$0xff] %v1004_v59  ;;  %v1132_v59 = vld [vmem:[%s4987_s7 + $0x1188] sm:$0xff] }
  0x8f   : > { %1007 = vst [vmem:[%s4992_s8 + $0x3e0] sm:$0xff] %v1006_v60  ;;  %v1134_v60 = vld [vmem:[%s4987_s7 + $0x11a0] sm:$0xff] }
  0x90   : > { %1009 = vst [vmem:[%s4992_s8 + $0x3e8] sm:$0xff] %v1008_v61  ;;  %v1136_v61 = vld [vmem:[%s4987_s7 + $0x11b8] sm:$0xff] }
  0x91   : > { %1011 = vst [vmem:[%s4992_s8 + $0x3f0] sm:$0xff] %v1010_v62  ;;  %v1138_v62 = vld [vmem:[%s4987_s7 + $0x11d0] sm:$0xff] }
  0x92   : > { %1013 = vst [vmem:[%s4992_s8 + $0x3f8] sm:$0xff] %v1012_v63  ;;  %v1140_v63 = vld [vmem:[%s4987_s7 + $0x11e8] sm:$0xff] }
  0x93   : > { %1015 = vst [vmem:[%s4992_s8 + $0x400] sm:$0xff] %v1014_v0  ;;  %v1142_v0 = vld [vmem:[%s4987_s7 + $0x1200] sm:$0xff] }
  0x94   : > { %1017 = vst [vmem:[%s4992_s8 + $0x408] sm:$0xff] %v1016_v1  ;;  %v1144_v1 = vld [vmem:[%s4987_s7 + $0x1218] sm:$0xff] }
  0x95   : > { %1019 = vst [vmem:[%s4992_s8 + $0x410] sm:$0xff] %v1018_v2  ;;  %v1146_v2 = vld [vmem:[%s4987_s7 + $0x1230] sm:$0xff] }
  0x96   : > { %1021 = vst [vmem:[%s4992_s8 + $0x418] sm:$0xff] %v1020_v3  ;;  %v1148_v3 = vld [vmem:[%s4987_s7 + $0x1248] sm:$0xff] }
  0x97   : > { %1023 = vst [vmem:[%s4992_s8 + $0x420] sm:$0xff] %v1022_v4  ;;  %v1150_v4 = vld [vmem:[%s4987_s7 + $0x1260] sm:$0xff] }
  0x98   : > { %1025 = vst [vmem:[%s4992_s8 + $0x428] sm:$0xff] %v1024_v5  ;;  %v1152_v5 = vld [vmem:[%s4987_s7 + $0x1278] sm:$0xff] }
  0x99   : > { %1027 = vst [vmem:[%s4992_s8 + $0x430] sm:$0xff] %v1026_v6  ;;  %v1154_v6 = vld [vmem:[%s4987_s7 + $0x1290] sm:$0xff] }
  0x9a   : > { %1029 = vst [vmem:[%s4992_s8 + $0x438] sm:$0xff] %v1028_v7  ;;  %v1156_v7 = vld [vmem:[%s4987_s7 + $0x12a8] sm:$0xff] }
  0x9b   : > { %1031 = vst [vmem:[%s4992_s8 + $0x440] sm:$0xff] %v1030_v8  ;;  %v1158_v8 = vld [vmem:[%s4987_s7 + $0x12c0] sm:$0xff] }
  0x9c   : > { %1033 = vst [vmem:[%s4992_s8 + $0x448] sm:$0xff] %v1032_v9  ;;  %v1160_v9 = vld [vmem:[%s4987_s7 + $0x12d8] sm:$0xff] }
  0x9d   : > { %1035 = vst [vmem:[%s4992_s8 + $0x450] sm:$0xff] %v1034_v10  ;;  %v1162_v10 = vld [vmem:[%s4987_s7 + $0x12f0] sm:$0xff] }
  0x9e   : > { %1037 = vst [vmem:[%s4992_s8 + $0x458] sm:$0xff] %v1036_v11  ;;  %v1164_v11 = vld [vmem:[%s4987_s7 + $0x1308] sm:$0xff] }
  0x9f   : > { %1039 = vst [vmem:[%s4992_s8 + $0x460] sm:$0xff] %v1038_v12  ;;  %v1166_v12 = vld [vmem:[%s4987_s7 + $0x1320] sm:$0xff] }
  0xa0   : > { %1041 = vst [vmem:[%s4992_s8 + $0x468] sm:$0xff] %v1040_v13  ;;  %v1168_v13 = vld [vmem:[%s4987_s7 + $0x1338] sm:$0xff] }
  0xa1   : > { %1043 = vst [vmem:[%s4992_s8 + $0x470] sm:$0xff] %v1042_v14  ;;  %v1170_v14 = vld [vmem:[%s4987_s7 + $0x1350] sm:$0xff] }
  0xa2   : > { %1045 = vst [vmem:[%s4992_s8 + $0x478] sm:$0xff] %v1044_v15  ;;  %v1172_v15 = vld [vmem:[%s4987_s7 + $0x1368] sm:$0xff] }
  0xa3   : > { %1047 = vst [vmem:[%s4992_s8 + $0x480] sm:$0xff] %v1046_v16  ;;  %v1174_v16 = vld [vmem:[%s4987_s7 + $0x1380] sm:$0xff] }
  0xa4   : > { %1049 = vst [vmem:[%s4992_s8 + $0x488] sm:$0xff] %v1048_v17  ;;  %v1176_v17 = vld [vmem:[%s4987_s7 + $0x1398] sm:$0xff] }
  0xa5   : > { %1051 = vst [vmem:[%s4992_s8 + $0x490] sm:$0xff] %v1050_v18  ;;  %v1178_v18 = vld [vmem:[%s4987_s7 + $0x13b0] sm:$0xff] }
  0xa6   : > { %1053 = vst [vmem:[%s4992_s8 + $0x498] sm:$0xff] %v1052_v19  ;;  %v1180_v19 = vld [vmem:[%s4987_s7 + $0x13c8] sm:$0xff] }
  0xa7   : > { %1055 = vst [vmem:[%s4992_s8 + $0x4a0] sm:$0xff] %v1054_v20  ;;  %v1182_v20 = vld [vmem:[%s4987_s7 + $0x13e0] sm:$0xff] }
  0xa8   : > { %1057 = vst [vmem:[%s4992_s8 + $0x4a8] sm:$0xff] %v1056_v21  ;;  %v1184_v21 = vld [vmem:[%s4987_s7 + $0x13f8] sm:$0xff] }
  0xa9   : > { %1059 = vst [vmem:[%s4992_s8 + $0x4b0] sm:$0xff] %v1058_v22  ;;  %v1186_v22 = vld [vmem:[%s4987_s7 + $0x1410] sm:$0xff] }
  0xaa   : > { %1061 = vst [vmem:[%s4992_s8 + $0x4b8] sm:$0xff] %v1060_v23  ;;  %v1188_v23 = vld [vmem:[%s4987_s7 + $0x1428] sm:$0xff] }
  0xab   : > { %1063 = vst [vmem:[%s4992_s8 + $0x4c0] sm:$0xff] %v1062_v24  ;;  %v1190_v24 = vld [vmem:[%s4987_s7 + $0x1440] sm:$0xff] }
  0xac   : > { %1065 = vst [vmem:[%s4992_s8 + $0x4c8] sm:$0xff] %v1064_v25  ;;  %v1192_v25 = vld [vmem:[%s4987_s7 + $0x1458] sm:$0xff] }
  0xad   : > { %1067 = vst [vmem:[%s4992_s8 + $0x4d0] sm:$0xff] %v1066_v26  ;;  %v1194_v26 = vld [vmem:[%s4987_s7 + $0x1470] sm:$0xff] }
  0xae   : > { %1069 = vst [vmem:[%s4992_s8 + $0x4d8] sm:$0xff] %v1068_v27  ;;  %v1196_v27 = vld [vmem:[%s4987_s7 + $0x1488] sm:$0xff] }
  0xaf   : > { %1071 = vst [vmem:[%s4992_s8 + $0x4e0] sm:$0xff] %v1070_v28  ;;  %v1198_v28 = vld [vmem:[%s4987_s7 + $0x14a0] sm:$0xff] }
  0xb0   : > { %1073 = vst [vmem:[%s4992_s8 + $0x4e8] sm:$0xff] %v1072_v29  ;;  %v1200_v29 = vld [vmem:[%s4987_s7 + $0x14b8] sm:$0xff] }
  0xb1   : > { %1075 = vst [vmem:[%s4992_s8 + $0x4f0] sm:$0xff] %v1074_v30  ;;  %v1202_v30 = vld [vmem:[%s4987_s7 + $0x14d0] sm:$0xff] }
  0xb2   : > { %1077 = vst [vmem:[%s4992_s8 + $0x4f8] sm:$0xff] %v1076_v31  ;;  %v1204_v31 = vld [vmem:[%s4987_s7 + $0x14e8] sm:$0xff] }
  0xb3   : > { %1079 = vst [vmem:[%s4992_s8 + $0x500] sm:$0xff] %v1078_v32  ;;  %v1206_v32 = vld [vmem:[%s4987_s7 + $0x1500] sm:$0xff] }
  0xb4   : > { %1081 = vst [vmem:[%s4992_s8 + $0x508] sm:$0xff] %v1080_v33  ;;  %v1208_v33 = vld [vmem:[%s4987_s7 + $0x1518] sm:$0xff] }
  0xb5   : > { %1083 = vst [vmem:[%s4992_s8 + $0x510] sm:$0xff] %v1082_v34  ;;  %v1210_v34 = vld [vmem:[%s4987_s7 + $0x1530] sm:$0xff] }
  0xb6   : > { %1085 = vst [vmem:[%s4992_s8 + $0x518] sm:$0xff] %v1084_v35  ;;  %v1212_v35 = vld [vmem:[%s4987_s7 + $0x1548] sm:$0xff] }
  0xb7   : > { %1087 = vst [vmem:[%s4992_s8 + $0x520] sm:$0xff] %v1086_v36  ;;  %v1214_v36 = vld [vmem:[%s4987_s7 + $0x1560] sm:$0xff] }
  0xb8   : > { %1089 = vst [vmem:[%s4992_s8 + $0x528] sm:$0xff] %v1088_v37  ;;  %v1216_v37 = vld [vmem:[%s4987_s7 + $0x1578] sm:$0xff] }
  0xb9   : > { %1091 = vst [vmem:[%s4992_s8 + $0x530] sm:$0xff] %v1090_v38  ;;  %v1218_v38 = vld [vmem:[%s4987_s7 + $0x1590] sm:$0xff] }
  0xba   : > { %1093 = vst [vmem:[%s4992_s8 + $0x538] sm:$0xff] %v1092_v39  ;;  %v1220_v39 = vld [vmem:[%s4987_s7 + $0x15a8] sm:$0xff] }
  0xbb   : > { %1095 = vst [vmem:[%s4992_s8 + $0x540] sm:$0xff] %v1094_v40  ;;  %v1222_v40 = vld [vmem:[%s4987_s7 + $0x15c0] sm:$0xff] }
  0xbc   : > { %1097 = vst [vmem:[%s4992_s8 + $0x548] sm:$0xff] %v1096_v41  ;;  %v1224_v41 = vld [vmem:[%s4987_s7 + $0x15d8] sm:$0xff] }
  0xbd   : > { %1099 = vst [vmem:[%s4992_s8 + $0x550] sm:$0xff] %v1098_v42  ;;  %v1226_v42 = vld [vmem:[%s4987_s7 + $0x15f0] sm:$0xff] }
  0xbe   : > { %1101 = vst [vmem:[%s4992_s8 + $0x558] sm:$0xff] %v1100_v43  ;;  %v1228_v43 = vld [vmem:[%s4987_s7 + $0x1608] sm:$0xff] }
  0xbf   : > { %1103 = vst [vmem:[%s4992_s8 + $0x560] sm:$0xff] %v1102_v44  ;;  %v1230_v44 = vld [vmem:[%s4987_s7 + $0x1620] sm:$0xff] }
  0xc0   : > { %1105 = vst [vmem:[%s4992_s8 + $0x568] sm:$0xff] %v1104_v45  ;;  %v1232_v45 = vld [vmem:[%s4987_s7 + $0x1638] sm:$0xff] }
  0xc1   : > { %1107 = vst [vmem:[%s4992_s8 + $0x570] sm:$0xff] %v1106_v46  ;;  %v1234_v46 = vld [vmem:[%s4987_s7 + $0x1650] sm:$0xff] }
  0xc2   : > { %1109 = vst [vmem:[%s4992_s8 + $0x578] sm:$0xff] %v1108_v47  ;;  %v1236_v47 = vld [vmem:[%s4987_s7 + $0x1668] sm:$0xff] }
  0xc3   : > { %1111 = vst [vmem:[%s4992_s8 + $0x580] sm:$0xff] %v1110_v48  ;;  %v1238_v48 = vld [vmem:[%s4987_s7 + $0x1680] sm:$0xff] }
  0xc4   : > { %1113 = vst [vmem:[%s4992_s8 + $0x588] sm:$0xff] %v1112_v49  ;;  %v1240_v49 = vld [vmem:[%s4987_s7 + $0x1698] sm:$0xff] }
  0xc5   : > { %1115 = vst [vmem:[%s4992_s8 + $0x590] sm:$0xff] %v1114_v50  ;;  %v1242_v50 = vld [vmem:[%s4987_s7 + $0x16b0] sm:$0xff] }
  0xc6   : > { %1117 = vst [vmem:[%s4992_s8 + $0x598] sm:$0xff] %v1116_v51  ;;  %v1244_v51 = vld [vmem:[%s4987_s7 + $0x16c8] sm:$0xff] }
  0xc7   : > { %1119 = vst [vmem:[%s4992_s8 + $0x5a0] sm:$0xff] %v1118_v52  ;;  %v1246_v52 = vld [vmem:[%s4987_s7 + $0x16e0] sm:$0xff] }
  0xc8   : > { %1121 = vst [vmem:[%s4992_s8 + $0x5a8] sm:$0xff] %v1120_v53  ;;  %v1248_v53 = vld [vmem:[%s4987_s7 + $0x16f8] sm:$0xff] }
  0xc9   : > { %1123 = vst [vmem:[%s4992_s8 + $0x5b0] sm:$0xff] %v1122_v54  ;;  %v1250_v54 = vld [vmem:[%s4987_s7 + $0x1710] sm:$0xff] }
  0xca   : > { %1125 = vst [vmem:[%s4992_s8 + $0x5b8] sm:$0xff] %v1124_v55  ;;  %v1252_v55 = vld [vmem:[%s4987_s7 + $0x1728] sm:$0xff] }
  0xcb   : > { %1127 = vst [vmem:[%s4992_s8 + $0x5c0] sm:$0xff] %v1126_v56  ;;  %v1254_v56 = vld [vmem:[%s4987_s7 + $0x1740] sm:$0xff] }
  0xcc   : > { %1129 = vst [vmem:[%s4992_s8 + $0x5c8] sm:$0xff] %v1128_v57  ;;  %v1256_v57 = vld [vmem:[%s4987_s7 + $0x1758] sm:$0xff] }
  0xcd   : > { %1131 = vst [vmem:[%s4992_s8 + $0x5d0] sm:$0xff] %v1130_v58  ;;  %v1258_v58 = vld [vmem:[%s4987_s7 + $0x1770] sm:$0xff] }
  0xce   : > { %1133 = vst [vmem:[%s4992_s8 + $0x5d8] sm:$0xff] %v1132_v59  ;;  %v1260_v59 = vld [vmem:[%s4987_s7 + $0x1788] sm:$0xff] }
  0xcf   : > { %1135 = vst [vmem:[%s4992_s8 + $0x5e0] sm:$0xff] %v1134_v60  ;;  %v1262_v60 = vld [vmem:[%s4987_s7 + $0x17a0] sm:$0xff] }
  0xd0   : > { %1137 = vst [vmem:[%s4992_s8 + $0x5e8] sm:$0xff] %v1136_v61  ;;  %v1264_v61 = vld [vmem:[%s4987_s7 + $0x17b8] sm:$0xff] }
  0xd1   : > { %1139 = vst [vmem:[%s4992_s8 + $0x5f0] sm:$0xff] %v1138_v62  ;;  %v1266_v62 = vld [vmem:[%s4987_s7 + $0x17d0] sm:$0xff] }
  0xd2   : > { %1141 = vst [vmem:[%s4992_s8 + $0x5f8] sm:$0xff] %v1140_v63  ;;  %v1268_v63 = vld [vmem:[%s4987_s7 + $0x17e8] sm:$0xff] }
  0xd3   : > { %1143 = vst [vmem:[%s4992_s8 + $0x600] sm:$0xff] %v1142_v0  ;;  %v1270_v0 = vld [vmem:[%s4987_s7 + $0x1800] sm:$0xff] }
  0xd4   : > { %1145 = vst [vmem:[%s4992_s8 + $0x608] sm:$0xff] %v1144_v1  ;;  %v1272_v1 = vld [vmem:[%s4987_s7 + $0x1818] sm:$0xff] }
  0xd5   : > { %1147 = vst [vmem:[%s4992_s8 + $0x610] sm:$0xff] %v1146_v2  ;;  %v1274_v2 = vld [vmem:[%s4987_s7 + $0x1830] sm:$0xff] }
  0xd6   : > { %1149 = vst [vmem:[%s4992_s8 + $0x618] sm:$0xff] %v1148_v3  ;;  %v1276_v3 = vld [vmem:[%s4987_s7 + $0x1848] sm:$0xff] }
  0xd7   : > { %1151 = vst [vmem:[%s4992_s8 + $0x620] sm:$0xff] %v1150_v4  ;;  %v1278_v4 = vld [vmem:[%s4987_s7 + $0x1860] sm:$0xff] }
  0xd8   : > { %1153 = vst [vmem:[%s4992_s8 + $0x628] sm:$0xff] %v1152_v5  ;;  %v1280_v5 = vld [vmem:[%s4987_s7 + $0x1878] sm:$0xff] }
  0xd9   : > { %1155 = vst [vmem:[%s4992_s8 + $0x630] sm:$0xff] %v1154_v6  ;;  %v1282_v6 = vld [vmem:[%s4987_s7 + $0x1890] sm:$0xff] }
  0xda   : > { %1157 = vst [vmem:[%s4992_s8 + $0x638] sm:$0xff] %v1156_v7  ;;  %v1284_v7 = vld [vmem:[%s4987_s7 + $0x18a8] sm:$0xff] }
  0xdb   : > { %1159 = vst [vmem:[%s4992_s8 + $0x640] sm:$0xff] %v1158_v8  ;;  %v1286_v8 = vld [vmem:[%s4987_s7 + $0x18c0] sm:$0xff] }
  0xdc   : > { %1161 = vst [vmem:[%s4992_s8 + $0x648] sm:$0xff] %v1160_v9  ;;  %v1288_v9 = vld [vmem:[%s4987_s7 + $0x18d8] sm:$0xff] }
  0xdd   : > { %1163 = vst [vmem:[%s4992_s8 + $0x650] sm:$0xff] %v1162_v10  ;;  %v1290_v10 = vld [vmem:[%s4987_s7 + $0x18f0] sm:$0xff] }
  0xde   : > { %1165 = vst [vmem:[%s4992_s8 + $0x658] sm:$0xff] %v1164_v11  ;;  %v1292_v11 = vld [vmem:[%s4987_s7 + $0x1908] sm:$0xff] }
  0xdf   : > { %1167 = vst [vmem:[%s4992_s8 + $0x660] sm:$0xff] %v1166_v12  ;;  %v1294_v12 = vld [vmem:[%s4987_s7 + $0x1920] sm:$0xff] }
  0xe0   : > { %1169 = vst [vmem:[%s4992_s8 + $0x668] sm:$0xff] %v1168_v13  ;;  %v1296_v13 = vld [vmem:[%s4987_s7 + $0x1938] sm:$0xff] }
  0xe1   : > { %1171 = vst [vmem:[%s4992_s8 + $0x670] sm:$0xff] %v1170_v14  ;;  %v1298_v14 = vld [vmem:[%s4987_s7 + $0x1950] sm:$0xff] }
  0xe2   : > { %1173 = vst [vmem:[%s4992_s8 + $0x678] sm:$0xff] %v1172_v15  ;;  %v1300_v15 = vld [vmem:[%s4987_s7 + $0x1968] sm:$0xff] }
  0xe3   : > { %1175 = vst [vmem:[%s4992_s8 + $0x680] sm:$0xff] %v1174_v16 }
  0xe4   : > { %1177 = vst [vmem:[%s4992_s8 + $0x688] sm:$0xff] %v1176_v17 }
  0xe5   : > { %1179 = vst [vmem:[%s4992_s8 + $0x690] sm:$0xff] %v1178_v18 }
  0xe6   : > { %1181 = vst [vmem:[%s4992_s8 + $0x698] sm:$0xff] %v1180_v19 }
  0xe7   : > { %1183 = vst [vmem:[%s4992_s8 + $0x6a0] sm:$0xff] %v1182_v20 }
  0xe8   : > { %1185 = vst [vmem:[%s4992_s8 + $0x6a8] sm:$0xff] %v1184_v21 }
  0xe9   : > { %1187 = vst [vmem:[%s4992_s8 + $0x6b0] sm:$0xff] %v1186_v22 }
  0xea   : > { %1189 = vst [vmem:[%s4992_s8 + $0x6b8] sm:$0xff] %v1188_v23 }
  0xeb   : > { %1191 = vst [vmem:[%s4992_s8 + $0x6c0] sm:$0xff] %v1190_v24 }
  0xec   : > { %1193 = vst [vmem:[%s4992_s8 + $0x6c8] sm:$0xff] %v1192_v25 }
  0xed   : > { %1195 = vst [vmem:[%s4992_s8 + $0x6d0] sm:$0xff] %v1194_v26 }
  0xee   : > { %1197 = vst [vmem:[%s4992_s8 + $0x6d8] sm:$0xff] %v1196_v27 }
  0xef   : > { %1199 = vst [vmem:[%s4992_s8 + $0x6e0] sm:$0xff] %v1198_v28 }
  0xf0   : > { %1201 = vst [vmem:[%s4992_s8 + $0x6e8] sm:$0xff] %v1200_v29 }
  0xf1   : > { %1203 = vst [vmem:[%s4992_s8 + $0x6f0] sm:$0xff] %v1202_v30 }
  0xf2   : > { %1205 = vst [vmem:[%s4992_s8 + $0x6f8] sm:$0xff] %v1204_v31 }
  0xf3   : > { %1207 = vst [vmem:[%s4992_s8 + $0x700] sm:$0xff] %v1206_v32 }
  0xf4   : > { %1209 = vst [vmem:[%s4992_s8 + $0x708] sm:$0xff] %v1208_v33 }
  0xf5   : > { %1211 = vst [vmem:[%s4992_s8 + $0x710] sm:$0xff] %v1210_v34 }
  0xf6   : > { %1213 = vst [vmem:[%s4992_s8 + $0x718] sm:$0xff] %v1212_v35 }
  0xf7   : > { %1215 = vst [vmem:[%s4992_s8 + $0x720] sm:$0xff] %v1214_v36 }
  0xf8   : > { %1217 = vst [vmem:[%s4992_s8 + $0x728] sm:$0xff] %v1216_v37 }
  0xf9   : > { %1219 = vst [vmem:[%s4992_s8 + $0x730] sm:$0xff] %v1218_v38 }
  0xfa   : > { %1221 = vst [vmem:[%s4992_s8 + $0x738] sm:$0xff] %v1220_v39 }
  0xfb   : > { %1223 = vst [vmem:[%s4992_s8 + $0x740] sm:$0xff] %v1222_v40 }
  0xfc   : > { %1225 = vst [vmem:[%s4992_s8 + $0x748] sm:$0xff] %v1224_v41 }
  0xfd   : > { %1227 = vst [vmem:[%s4992_s8 + $0x750] sm:$0xff] %v1226_v42 }
  0xfe   : > { %1229 = vst [vmem:[%s4992_s8 + $0x758] sm:$0xff] %v1228_v43 }
  0xff   : > { %1231 = vst [vmem:[%s4992_s8 + $0x760] sm:$0xff] %v1230_v44 }
 0x100   : > { %1233 = vst [vmem:[%s4992_s8 + $0x768] sm:$0xff] %v1232_v45 }
 0x101   : > { %1235 = vst [vmem:[%s4992_s8 + $0x770] sm:$0xff] %v1234_v46 }
 0x102   : > { %1237 = vst [vmem:[%s4992_s8 + $0x778] sm:$0xff] %v1236_v47 }
 0x103   : > { %1239 = vst [vmem:[%s4992_s8 + $0x780] sm:$0xff] %v1238_v48 }
 0x104   : > { %1241 = vst [vmem:[%s4992_s8 + $0x788] sm:$0xff] %v1240_v49 }
 0x105   : > { %1243 = vst [vmem:[%s4992_s8 + $0x790] sm:$0xff] %v1242_v50 }
 0x106   : > { %1245 = vst [vmem:[%s4992_s8 + $0x798] sm:$0xff] %v1244_v51 }
 0x107   : > { %1247 = vst [vmem:[%s4992_s8 + $0x7a0] sm:$0xff] %v1246_v52 }
 0x108   : > { %1249 = vst [vmem:[%s4992_s8 + $0x7a8] sm:$0xff] %v1248_v53 }
 0x109   : > { %1251 = vst [vmem:[%s4992_s8 + $0x7b0] sm:$0xff] %v1250_v54 }
 0x10a   : > { %1253 = vst [vmem:[%s4992_s8 + $0x7b8] sm:$0xff] %v1252_v55 }
 0x10b   : > { %1255 = vst [vmem:[%s4992_s8 + $0x7c0] sm:$0xff] %v1254_v56 }
 0x10c   : > { %1257 = vst [vmem:[%s4992_s8 + $0x7c8] sm:$0xff] %v1256_v57 }
 0x10d   : > { %1259 = vst [vmem:[%s4992_s8 + $0x7d0] sm:$0xff] %v1258_v58 }
 0x10e   : > { %1261 = vst [vmem:[%s4992_s8 + $0x7d8] sm:$0xff] %v1260_v59 }
 0x10f   : > { %1263 = vst [vmem:[%s4992_s8 + $0x7e0] sm:$0xff] %v1262_v60 }
 0x110   : > { %1265 = vst [vmem:[%s4992_s8 + $0x7e8] sm:$0xff] %v1264_v61 }
 0x111   : > { %1267 = vst [vmem:[%s4992_s8 + $0x7f0] sm:$0xff] %v1266_v62 }
 0x112   : > { %1269 = vst [vmem:[%s4992_s8 + $0x7f8] sm:$0xff] %v1268_v63 }
 0x113   : > { %1271 = vst [vmem:[%s4992_s8 + $0x800] sm:$0xff] %v1270_v0 }
 0x114   : > { %1273 = vst [vmem:[%s4992_s8 + $0x808] sm:$0xff] %v1272_v1 }
 0x115   : > { %1275 = vst [vmem:[%s4992_s8 + $0x810] sm:$0xff] %v1274_v2 }
 0x116   : > { %1277 = vst [vmem:[%s4992_s8 + $0x818] sm:$0xff] %v1276_v3 }
 0x117   : > { %1279 = vst [vmem:[%s4992_s8 + $0x820] sm:$0xff] %v1278_v4 }
 0x118   : > { %1281 = vst [vmem:[%s4992_s8 + $0x828] sm:$0xff] %v1280_v5 }
 0x119   : > { %1283 = vst [vmem:[%s4992_s8 + $0x830] sm:$0xff] %v1282_v6 }
 0x11a   : > { %1285 = vst [vmem:[%s4992_s8 + $0x838] sm:$0xff] %v1284_v7 }
 0x11b   : > { %1287 = vst [vmem:[%s4992_s8 + $0x840] sm:$0xff] %v1286_v8 }
 0x11c   : > { %1289 = vst [vmem:[%s4992_s8 + $0x848] sm:$0xff] %v1288_v9 }
 0x11d   : > { %1291 = vst [vmem:[%s4992_s8 + $0x850] sm:$0xff] %v1290_v10 }
 0x11e   : > { %1293 = vst [vmem:[%s4992_s8 + $0x858] sm:$0xff] %v1292_v11 }
 0x11f   : > { %1295 = vst [vmem:[%s4992_s8 + $0x860] sm:$0xff] %v1294_v12 }
 0x120   : > { %1297 = vst [vmem:[%s4992_s8 + $0x868] sm:$0xff] %v1296_v13 }
 0x121   : > { %1299 = vst [vmem:[%s4992_s8 + $0x870] sm:$0xff] %v1298_v14 }
 0x122   : > { %1301 = vst [vmem:[%s4992_s8 + $0x878] sm:$0xff] %v1300_v15 }
 0x123 PF: > { %p4725_p7 = scmp.ge.s32.totalorder %s4915_s20, 1  ;;  %p2429_p8 = scmp.lt.s32.totalorder %s4915_s20, 4 }
 0x125   : > { %p2430_p9 = pnand %p4725_p7, %p2429_p8 }
 0x126   : > { %s2436_s17 = sand.u32 (!%p2430_p9), 1, %s4907_s18  }
 0x127   : > { %2433 = sbr.rel (%p2430_p9) target bundleno = 871 (0x367), region = 88 }
 0x128   : > { %s4797_s10 = smul.u32 (!%p2430_p9), 2176, %s2436_s17 }
 0x12a   : > { %s6069_s15 = scalar_lea.vmem (!%p2430_p9), [#allocation2], %s4797_s10  ;;  %s4798_s10 = smul.u32 (!%p2430_p9), 56, %s2436_s17 }
 0x12c   : > { %v2633_v16 = vld [vmem:[%s7588_s1 + $0x550] sm:$0x3f]  ;;  %vm2694_vm0 = vcmask 1045504   ;;  %v2634_v17 = vld [vmem:[%s7588_s1 + $0x558] sm:$0x3f]  ;;  %v2616_v18 = vld [vmem:[%s7588_s1 + $0x4c8] sm:$0xff] }
 0x12d   : > { %4726 = vmatpush.msk.msra.mxu0 %vm2694_vm0, %v2633_v16  ;;  %4728 = vmatpush.msk.msra.mxu3 %vm2694_vm0, %v2634_v17  ;;  %v2635_v19 = vld [vmem:[%s7588_s1 + $0x560] sm:$0x3f]  ;;  %v2617_v20 = vld [vmem:[%s7588_s1 + $0x4d0] sm:$0xff]  ;;  %v2618_v21 = vld [vmem:[%s7588_s1 + $0x4d8] sm:$0xff]  ;;  %vm2690_vm1 = vcmask 703488   ;;  %s7541_s28 = scalar_lea.vmem [#allocation3], %s4798_s10 }
 0x12e   : > { %4730 = vmatpush.msk.msra.mxu2 %vm2694_vm0, %v2635_v19  ;;  %v2599_v22 = vld [vmem:[%s7588_s1 + $0x440] sm:$0xff]  ;;  %v2600_v23 = vld [vmem:[%s7588_s1 + $0x448] sm:$0xff]  ;;  %v2601_v24 = vld [vmem:[%s7588_s1 + $0x450] sm:$0xff]  ;;  %s4777_s18 = sshll.u32 (%p4977_p5), %s4720_s21, 3 }
 0x12f   : > { %2752 = vmatpush.msra.mxu0 %v2616_v18  ;;  %2772 = vmatpush.msra.mxu3 %v2617_v20  ;;  %v2582_v25 = vld [vmem:[%s7588_s1 + $0x3b8] sm:$0xff]  ;;  %v2583_v26 = vld [vmem:[%s7588_s1 + $0x3c0] sm:$0xff]  ;;  %v2584_v27 = vld [vmem:[%s7588_s1 + $0x3c8] sm:$0xff]  ;;  %s4597_s30 = scalar_lea.vmem (%p4977_p5), %s7592_s5, %s4777_s18 }
 0x130   : > { %2792 = vmatpush.msra.mxu2 %v2618_v21  ;;  %v2565_v28 = vld [vmem:[%s7588_s1 + $0x330] sm:$0xff]  ;;  %v2566_v29 = vld [vmem:[%s7588_s1 + $0x338] sm:$0xff]  ;;  %v2567_v30 = vld [vmem:[%s7588_s1 + $0x340] sm:$0xff] }
 0x131   : > { %2753 = vmatpush.msra.mxu0 %v2599_v22  ;;  %2773 = vmatpush.msra.mxu3 %v2600_v23  ;;  %v2548_v31 = vld [vmem:[%s7588_s1 + $0x2a8] sm:$0xff]  ;;  %v2549_v32 = vld [vmem:[%s7588_s1 + $0x2b0] sm:$0xff]  ;;  %v2550_v33 = vld [vmem:[%s7588_s1 + $0x2b8] sm:$0xff] }
 0x132   : > { %2793 = vmatpush.msra.mxu2 %v2601_v24  ;;  %v2531_v34 = vld [vmem:[%s7588_s1 + $0x220] sm:$0xff]  ;;  %v2532_v35 = vld [vmem:[%s7588_s1 + $0x228] sm:$0xff]  ;;  %v2533_v36 = vld [vmem:[%s7588_s1 + $0x230] sm:$0xff] }
 0x133   : > { %2754 = vmatpush.msra.mxu0 %v2582_v25  ;;  %2774 = vmatpush.msra.mxu3 %v2583_v26  ;;  %v2514_v37 = vld [vmem:[%s7588_s1 + $0x198] sm:$0xff]  ;;  %v2515_v38 = vld [vmem:[%s7588_s1 + $0x1a0] sm:$0xff]  ;;  %v2516_v39 = vld [vmem:[%s7588_s1 + $0x1a8] sm:$0xff] }
 0x134   : > { %2794 = vmatpush.msra.mxu2 %v2584_v27  ;;  %v2497_v40 = vld [vmem:[%s7588_s1 + $0x110] sm:$0xff]  ;;  %v2498_v41 = vld [vmem:[%s7588_s1 + $0x118] sm:$0xff]  ;;  %v2499_v42 = vld [vmem:[%s7588_s1 + $0x120] sm:$0xff] }
 0x135   : > { %2755 = vmatpush.msra.mxu0 %v2565_v28  ;;  %2775 = vmatpush.msra.mxu3 %v2566_v29  ;;  %v2480_v43 = vld [vmem:[%s7588_s1 + $0x88] sm:$0xff]  ;;  %v2481_v44 = vld [vmem:[%s7588_s1 + $0x90] sm:$0xff]  ;;  %v2482_v45 = vld [vmem:[%s7588_s1 + $0x98] sm:$0xff] }
 0x136   : > { %2795 = vmatpush.msra.mxu2 %v2567_v30  ;;  %v2463_v46 = vld [vmem:[%s7588_s1] sm:$0xff]  ;;  %v2464_v47 = vld [vmem:[%s7588_s1 + $0x8] sm:$0xff]  ;;  %v2465_v48 = vld [vmem:[%s7588_s1 + $0x10] sm:$0xff] }
 0x137   : > { %2756 = vmatpush.msra.mxu0 %v2548_v31  ;;  %2776 = vmatpush.msra.mxu3 %v2549_v32  ;;  %v5642_v49 = vld [vmem:[%s7587_s0] sm:$0x1]  ;;  %v2636_v50 = vld [vmem:[%s7588_s1 + $0x568] sm:$0x3f]  ;;  %v2637_v51 = vld [vmem:[%s7588_s1 + $0x570] sm:$0x3f] }
 0x138   : > { %2796 = vmatpush.msra.mxu2 %v2550_v33  ;;  %v2619_v52 = vld [vmem:[%s7588_s1 + $0x4e0] sm:$0xff]  ;;  %v2620_v54 = vld [vmem:[%s7588_s1 + $0x4e8] sm:$0xff]  ;;  %v2638_v55 = vld [vmem:[%s7588_s1 + $0x578] sm:$0x3f] }
 0x139   : > { %2757 = vmatpush.msra.mxu0 %v2531_v34  ;;  %2777 = vmatpush.msra.mxu3 %v2532_v35  ;;  %v2639_v53 = vld [vmem:[%s7588_s1 + $0x580] sm:$0x3f]  ;;  %v2602_v56 = vld [vmem:[%s7588_s1 + $0x458] sm:$0xff]  ;;  %v2621_v59 = vld [vmem:[%s7588_s1 + $0x4f0] sm:$0xff] }
 0x13a   : > { %2797 = vmatpush.msra.mxu2 %v2533_v36  ;;  %v2622_v57 = vld [vmem:[%s7588_s1 + $0x4f8] sm:$0xff]  ;;  %v2603_v58 = vld [vmem:[%s7588_s1 + $0x460] sm:$0xff]  ;;  %v2585_v60 = vld [vmem:[%s7588_s1 + $0x3d0] sm:$0xff]  ;;  %4736 = vmatpush.msk.msra.mxu1 %vm2694_vm0, %v2638_v55 }
 0x13b   : > { %2758 = vmatpush.msra.mxu0 %v2514_v37  ;;  %2778 = vmatpush.msra.mxu3 %v2515_v38  ;;  %v2605_v61 = vld [vmem:[%s7588_s1 + $0x470] sm:$0xff]  ;;  %v2586_v62 = vld [vmem:[%s7588_s1 + $0x3d8] sm:$0xff]  ;;  %v2604_v63 = vld [vmem:[%s7588_s1 + $0x468] sm:$0xff] }
 0x13c   : > { %2798 = vmatpush.msra.mxu2 %v2516_v39  ;;  %v2568_v0 = vld [vmem:[%s7588_s1 + $0x348] sm:$0xff]  ;;  %2852 = vmatpush.msra.mxu1 %v2621_v59  ;;  %v2569_v2 = vld [vmem:[%s7588_s1 + $0x350] sm:$0xff]  ;;  %v2587_v3 = vld [vmem:[%s7588_s1 + $0x3e0] sm:$0xff] }
 0x13d   : > { %2759 = vmatpush.msra.mxu0 %v2497_v40  ;;  %2779 = vmatpush.msra.mxu3 %v2498_v41  ;;  %v2588_v1 = vld [vmem:[%s7588_s1 + $0x3e8] sm:$0xff]  ;;  %v2551_v4 = vld [vmem:[%s7588_s1 + $0x2c0] sm:$0xff]  ;;  %v2570_v7 = vld [vmem:[%s7588_s1 + $0x358] sm:$0xff] }
 0x13e   : > { %2799 = vmatpush.msra.mxu2 %v2499_v42  ;;  %v2571_v5 = vld [vmem:[%s7588_s1 + $0x360] sm:$0xff]  ;;  %2853 = vmatpush.msra.mxu1 %v2604_v63  ;;  %v2552_v6 = vld [vmem:[%s7588_s1 + $0x2c8] sm:$0xff]  ;;  %v2534_v8 = vld [vmem:[%s7588_s1 + $0x238] sm:$0xff] }
 0x13f   : > { %2760 = vmatpush.msra.mxu0 %v2480_v43  ;;  %2780 = vmatpush.msra.mxu3 %v2481_v44  ;;  %v2554_v9 = vld [vmem:[%s7588_s1 + $0x2d8] sm:$0xff]  ;;  %v2535_v10 = vld [vmem:[%s7588_s1 + $0x240] sm:$0xff]  ;;  %v2553_v11 = vld [vmem:[%s7588_s1 + $0x2d0] sm:$0xff] }
 0x140   : > { %2800 = vmatpush.msra.mxu2 %v2482_v45  ;;  %2854 = vmatpush.msra.mxu1 %v2587_v3  ;;  %v2517_v12 = vld [vmem:[%s7588_s1 + $0x1b0] sm:$0xff]  ;;  %v2518_v14 = vld [vmem:[%s7588_s1 + $0x1b8] sm:$0xff]  ;;  %v2536_v15 = vld [vmem:[%s7588_s1 + $0x248] sm:$0xff] }
 0x141   : > { %2761 = vmatpush.msra.mxu0 %v2463_v46  ;;  %2781 = vmatpush.msra.mxu3 %v2464_v47  ;;  %v2537_v13 = vld [vmem:[%s7588_s1 + $0x250] sm:$0xff]  ;;  %v2500_v16 = vld [vmem:[%s7588_s1 + $0x128] sm:$0xff]  ;;  %v2519_v19 = vld [vmem:[%s7588_s1 + $0x1c0] sm:$0xff] }
 0x142   : > { %2801 = vmatpush.msra.mxu2 %v2465_v48  ;;  %4727 = vmatmul.msk.f32.vlgmr.msra.gmra.mxu0 %vm2690_vm1, %v5642_v49  ;;  %v2520_v17 = vld [vmem:[%s7588_s1 + $0x1c8] sm:$0xff]  ;;  %v2501_v18 = vld [vmem:[%s7588_s1 + $0x130] sm:$0xff]  ;;  %v2483_v20 = vld [vmem:[%s7588_s1 + $0xa0] sm:$0xff] }
 0x143   : > { %4731 = vmatmul.msk.f32.vlgmr.msra.gmra.mxu2 %vm2690_vm1, %v5642_v49  ;;  %4732 = vmatpush.msk.msrb.mxu3 %vm2694_vm0, %v2636_v50  ;;  %v2503_v21 = vld [vmem:[%s7588_s1 + $0x140] sm:$0xff]  ;;  %v2484_v22 = vld [vmem:[%s7588_s1 + $0xa8] sm:$0xff]  ;;  %v2502_v23 = vld [vmem:[%s7588_s1 + $0x138] sm:$0xff] }
 0x144   : > { %4734 = vmatpush.msk.msrb.mxu0 %vm2694_vm0, %v2637_v51  ;;  %4729 = vmatmul.msk.f32.vlgmr.msra.gmra.mxu3 %vm2690_vm1, %v5642_v49  ;;  %v2466_v24 = vld [vmem:[%s7588_s1 + $0x18] sm:$0xff]  ;;  %v2467_v26 = vld [vmem:[%s7588_s1 + $0x20] sm:$0xff]  ;;  %v2640_v27 = vld [vmem:[%s7588_s1 + $0x588] sm:$0x3f] }
 0x145   : > { %2812 = vmatpush.msrb.mxu3 %v2619_v52  ;;  %4738 = vmatpush.msk.msrb.mxu2 %vm2694_vm0, %v2639_v53  ;;  %v2486_v25 = vld [vmem:[%s7588_s1 + $0xb8] sm:$0xff]  ;;  %v2469_v28 = vld [vmem:[%s7588_s1 + $0x30] sm:$0xff]  ;;  %v2623_v30 = vld [vmem:[%s7588_s1 + $0x500] sm:$0xff] }
 0x146   : > { %2832 = vmatpush.msrb.mxu0 %v2620_v54  ;;  %2855 = vmatpush.msra.mxu1 %v2570_v7  ;;  %v2641_v29 = vld [vmem:[%s7588_s1 + $0x590] sm:$0x3f]  ;;  %v2624_v31 = vld [vmem:[%s7588_s1 + $0x508] sm:$0xff]  ;;  %v2606_v33 = vld [vmem:[%s7588_s1 + $0x478] sm:$0xff] }
 0x147   : > { %2813 = vmatpush.msrb.mxu3 %v2602_v56  ;;  %2872 = vmatpush.msrb.mxu2 %v2622_v57  ;;  %v2485_v32 = vld [vmem:[%s7588_s1 + $0xb0] sm:$0xff]  ;;  %v2643_v34 = vld [vmem:[%s7588_s1 + $0x5a0] sm:$0x3f]  ;;  %v2468_v36 = vld [vmem:[%s7588_s1 + $0x28] sm:$0xff] }
 0x148   : > { %2833 = vmatpush.msrb.mxu0 %v2603_v58  ;;  %2856 = vmatpush.msra.mxu1 %v2553_v11  ;;  %v2607_v35 = vld [vmem:[%s7588_s1 + $0x480] sm:$0xff]  ;;  %v2589_v37 = vld [vmem:[%s7588_s1 + $0x3f0] sm:$0xff]  ;;  %v2590_v38 = vld [vmem:[%s7588_s1 + $0x3f8] sm:$0xff] }
 0x149   : > { %2814 = vmatpush.msrb.mxu3 %v2585_v60  ;;  %2873 = vmatpush.msrb.mxu2 %v2605_v61  ;;  %v2626_v39 = vld [vmem:[%s7588_s1 + $0x518] sm:$0xff]  ;;  %v2572_v40 = vld [vmem:[%s7588_s1 + $0x368] sm:$0xff]  ;;  %v2573_v42 = vld [vmem:[%s7588_s1 + $0x370] sm:$0xff] }
 0x14a   : > { %2834 = vmatpush.msrb.mxu0 %v2586_v62  ;;  %2857 = vmatpush.msra.mxu1 %v2536_v15  ;;  %v2642_v41 = vld [vmem:[%s7588_s1 + $0x598] sm:$0x3f]  ;;  %v2609_v43 = vld [vmem:[%s7588_s1 + $0x490] sm:$0xff]  ;;  %v2555_v44 = vld [vmem:[%s7588_s1 + $0x2e0] sm:$0xff] }
 0x14b   : > { %2815 = vmatpush.msrb.mxu3 %v2568_v0  ;;  %2874 = vmatpush.msrb.mxu2 %v2588_v1  ;;  %v2625_v45 = vld [vmem:[%s7588_s1 + $0x510] sm:$0xff]  ;;  %v2556_v46 = vld [vmem:[%s7588_s1 + $0x2e8] sm:$0xff]  ;;  %v2538_v48 = vld [vmem:[%s7588_s1 + $0x258] sm:$0xff] }
 0x14c   : > { %2835 = vmatpush.msrb.mxu0 %v2569_v2  ;;  %2858 = vmatpush.msra.mxu1 %v2519_v19  ;;  %v2592_v47 = vld [vmem:[%s7588_s1 + $0x408] sm:$0xff]  ;;  %v2539_v51 = vld [vmem:[%s7588_s1 + $0x260] sm:$0xff]  ;;  %v2521_v53 = vld [vmem:[%s7588_s1 + $0x1d0] sm:$0xff] }
 0x14d   : > { %2816 = vmatpush.msrb.mxu3 %v2551_v4  ;;  %2875 = vmatpush.msrb.mxu2 %v2571_v5  ;;  %v2608_v50 = vld [vmem:[%s7588_s1 + $0x488] sm:$0xff]  ;;  %v2575_v52 = vld [vmem:[%s7588_s1 + $0x380] sm:$0xff]  ;;  %v2522_v55 = vld [vmem:[%s7588_s1 + $0x1d8] sm:$0xff] }
 0x14e   : > { %2836 = vmatpush.msrb.mxu0 %v2552_v6  ;;  %2859 = vmatpush.msra.mxu1 %v2502_v23  ;;  %v2591_v54 = vld [vmem:[%s7588_s1 + $0x400] sm:$0xff]  ;;  %v2558_v56 = vld [vmem:[%s7588_s1 + $0x2f8] sm:$0xff]  ;;  %v2504_v57 = vld [vmem:[%s7588_s1 + $0x148] sm:$0xff] }
 0x14f   : > { %2817 = vmatpush.msrb.mxu3 %v2534_v8  ;;  %2876 = vmatpush.msrb.mxu2 %v2554_v9  ;;  %v2574_v58 = vld [vmem:[%s7588_s1 + $0x378] sm:$0xff]  ;;  %v2505_v59 = vld [vmem:[%s7588_s1 + $0x150] sm:$0xff]  ;;  %v2487_v61 = vld [vmem:[%s7588_s1 + $0xc0] sm:$0xff] }
 0x150   : > { %2837 = vmatpush.msrb.mxu0 %v2535_v10  ;;  %2860 = vmatpush.msra.mxu1 %v2485_v32  ;;  %v2541_v60 = vld [vmem:[%s7588_s1 + $0x270] sm:$0xff]  ;;  %v2488_v63 = vld [vmem:[%s7588_s1 + $0xc8] sm:$0xff]  ;;  %v2470_v1 = vld [vmem:[%s7588_s1 + $0x38] sm:$0xff] }
 0x151   : > { %2818 = vmatpush.msrb.mxu3 %v2517_v12  ;;  %2877 = vmatpush.msrb.mxu2 %v2537_v13  ;;  %v2557_v62 = vld [vmem:[%s7588_s1 + $0x2f0] sm:$0xff]  ;;  %v2524_v0 = vld [vmem:[%s7588_s1 + $0x1e8] sm:$0xff]  ;;  %v2471_v3 = vld [vmem:[%s7588_s1 + $0x40] sm:$0xff] }
 0x152   : > { %2838 = vmatpush.msrb.mxu0 %v2518_v14  ;;  %2861 = vmatpush.msra.mxu1 %v2468_v36  ;;  %v2540_v2 = vld [vmem:[%s7588_s1 + $0x268] sm:$0xff]  ;;  %v2507_v5 = vld [vmem:[%s7588_s1 + $0x160] sm:$0xff]  ;;  %v2645_v8 = vld [vmem:[%s7588_s1 + $0x5b0] sm:$0x3f] }
 0x153   : > { %2819 = vmatpush.msrb.mxu3 %v2500_v16  ;;  %2878 = vmatpush.msrb.mxu2 %v2520_v17  ;;  %v2644_v4 = vld [vmem:[%s7588_s1 + $0x5a8] sm:$0x3f]  ;;  %v2523_v6 = vld [vmem:[%s7588_s1 + $0x1e0] sm:$0xff]  ;;  %v2490_v9 = vld [vmem:[%s7588_s1 + $0xd8] sm:$0xff] }
 0x154   : > { %2839 = vmatpush.msrb.mxu0 %v2501_v18  ;;  %4737 = vmatmul.msk.f32.vlgmr.msra.gmra.mxu1 %vm2690_vm1, %v5642_v49  ;;  %v2627_v7 = vld [vmem:[%s7588_s1 + $0x520] sm:$0xff]  ;;  %v2506_v10 = vld [vmem:[%s7588_s1 + $0x158] sm:$0xff]  ;;  %v2628_v12 = vld [vmem:[%s7588_s1 + $0x528] sm:$0xff] }
 0x155   : > { %2820 = vmatpush.msrb.mxu3 %v2483_v20  ;;  %2879 = vmatpush.msrb.mxu2 %v2503_v21  ;;  %v2610_v11 = vld [vmem:[%s7588_s1 + $0x498] sm:$0xff]  ;;  %v2473_v13 = vld [vmem:[%s7588_s1 + $0x50] sm:$0xff]  ;;  %v2647_v16 = vld [vmem:[%s7588_s1 + $0x5c0] sm:$0x3f] }
 0x156   : > { %2840 = vmatpush.msrb.mxu0 %v2484_v22  ;;  %4744 = vmatpush.msk.msrb.mxu1 %vm2694_vm0, %v2642_v41  ;;  %v2489_v14 = vld [vmem:[%s7588_s1 + $0xd0] sm:$0xff]  ;;  %v2472_v17 = vld [vmem:[%s7588_s1 + $0x48] sm:$0xff]  ;;  %v2630_v19 = vld [vmem:[%s7588_s1 + $0x538] sm:$0xff] }
 0x157   : > { %2821 = vmatpush.msrb.mxu3 %v2466_v24  ;;  %2880 = vmatpush.msrb.mxu2 %v2486_v25  ;;  %v2593_v15 = vld [vmem:[%s7588_s1 + $0x410] sm:$0xff]  ;;  %v2576_v18 = vld [vmem:[%s7588_s1 + $0x388] sm:$0xff]  ;;  %v2646_v20 = vld [vmem:[%s7588_s1 + $0x5b8] sm:$0x3f] }
 0x158   : > { %4733 = vmatmul.msk.f32.vlgmr.msrb.gmra.mxu3 %vm2690_vm1, %v5642_v49  ;;  %2841 = vmatpush.msrb.mxu0 %v2467_v26  ;;  %v2611_v21 = vld [vmem:[%s7588_s1 + $0x4a0] sm:$0xff]  ;;  %v2613_v23 = vld [vmem:[%s7588_s1 + $0x4b0] sm:$0xff]  ;;  %v2594_v25 = vld [vmem:[%s7588_s1 + $0x418] sm:$0xff] }
 0x159   : > { %4735 = vmatmul.msk.f32.vlgmr.msrb.gmra.mxu0 %vm2690_vm1, %v5642_v49  ;;  %4740 = vmatpush.msk.msra.mxu3 %vm2694_vm0, %v2640_v27  ;;  %v2559_v22 = vld [vmem:[%s7588_s1 + $0x300] sm:$0xff]  ;;  %v2629_v24 = vld [vmem:[%s7588_s1 + $0x530] sm:$0xff]  ;;  %v2542_v26 = vld [vmem:[%s7588_s1 + $0x278] sm:$0xff] }
 0x15a   : > { %2881 = vmatpush.msrb.mxu2 %v2469_v28  ;;  %4742 = vmatpush.msk.msra.mxu0 %vm2694_vm0, %v2641_v29  ;;  %v2596_v27 = vld [vmem:[%s7588_s1 + $0x428] sm:$0xff]  ;;  %v2577_v29 = vld [vmem:[%s7588_s1 + $0x390] sm:$0xff]  ;;  %v2595_v32 = vld [vmem:[%s7588_s1 + $0x420] sm:$0xff] }
 0x15b   : > { %2892 = vmatpush.msra.mxu3 %v2623_v30  ;;  %4739 = vmatmul.msk.f32.vlgmr.msrb.gmra.mxu2 %vm2690_vm1, %v5642_v49  ;;  %v2612_v28 = vld [vmem:[%s7588_s1 + $0x4a8] sm:$0xff]  ;;  %v2525_v30 = vld [vmem:[%s7588_s1 + $0x1f0] sm:$0xff]  ;;  %v2578_v36 = vld [vmem:[%s7588_s1 + $0x398] sm:$0xff] }
 0x15c   : > { %2912 = vmatpush.msra.mxu0 %v2624_v31  ;;  %4746 = vmatpush.msk.msra.mxu2 %vm2694_vm0, %v2643_v34  ;;  %v2579_v31 = vld [vmem:[%s7588_s1 + $0x3a0] sm:$0xff]  ;;  %v2508_v34 = vld [vmem:[%s7588_s1 + $0x168] sm:$0xff] }
 0x15d   : > { %2893 = vmatpush.msra.mxu3 %v2606_v33  ;;  %2932 = vmatpush.msrb.mxu1 %v2625_v45  ;;  %v2560_v33 = vld [vmem:[%s7588_s1 + $0x308] sm:$0xff]  ;;  %v2631_v45 = vld [vmem:[%s7588_s1 + $0x540] sm:$0xff] }
 0x15e   : > { %2913 = vmatpush.msra.mxu0 %v2607_v35  ;;  %2952 = vmatpush.msra.mxu2 %v2626_v39  ;;  %v2562_v35 = vld [vmem:[%s7588_s1 + $0x318] sm:$0xff]  ;;  %v2561_v39 = vld [vmem:[%s7588_s1 + $0x310] sm:$0xff]  ;;  %v2528_v41 = vld [vmem:[%s7588_s1 + $0x208] sm:$0xff] }
 0x15f   : > { %2894 = vmatpush.msra.mxu3 %v2589_v37  ;;  %2933 = vmatpush.msrb.mxu1 %v2608_v50  ;;  %v2491_v37 = vld [vmem:[%s7588_s1 + $0xe0] sm:$0xff]  ;;  %v2477_v50 = vld [vmem:[%s7588_s1 + $0x70] sm:$0xff] }
 0x160   : > { %2914 = vmatpush.msra.mxu0 %v2590_v38  ;;  %2953 = vmatpush.msra.mxu2 %v2609_v43  ;;  %v2545_v38 = vld [vmem:[%s7588_s1 + $0x290] sm:$0xff]  ;;  %v2511_v43 = vld [vmem:[%s7588_s1 + $0x180] sm:$0xff] }
 0x161   : > { %2895 = vmatpush.msra.mxu3 %v2572_v40  ;;  %2934 = vmatpush.msrb.mxu1 %v2591_v54  ;;  %v2474_v40 = vld [vmem:[%s7588_s1 + $0x58] sm:$0xff]  ;;  %v2580_v54 = vld [vmem:[%s7588_s1 + $0x3a8] sm:$0xff] }
 0x162   : > { %2915 = vmatpush.msra.mxu0 %v2573_v42  ;;  %2954 = vmatpush.msra.mxu2 %v2592_v47  ;;  %v2648_v42 = vld [vmem:[%s7588_s1 + $0x5c8] sm:$0x3f]  ;;  %v2527_v47 = vld [vmem:[%s7588_s1 + $0x200] sm:$0xff] }
 0x163   : > { %2896 = vmatpush.msra.mxu3 %v2555_v44  ;;  %2935 = vmatpush.msrb.mxu1 %v2574_v58  ;;  %v2544_v44 = vld [vmem:[%s7588_s1 + $0x288] sm:$0xff]  ;;  %v2493_v58 = vld [vmem:[%s7588_s1 + $0xf0] sm:$0xff] }
 0x164   : > { %2916 = vmatpush.msra.mxu0 %v2556_v46  ;;  %2955 = vmatpush.msra.mxu2 %v2575_v52  ;;  %v2494_v46 = vld [vmem:[%s7588_s1 + $0xf8] sm:$0xff]  ;;  %v2597_v52 = vld [vmem:[%s7588_s1 + $0x430] sm:$0xff] }
 0x165   : > { %2897 = vmatpush.msra.mxu3 %v2538_v48  ;;  %2936 = vmatpush.msrb.mxu1 %v2557_v62  ;;  %v2614_v48 = vld [vmem:[%s7588_s1 + $0x4b8] sm:$0xff]  ;;  %v2476_v62 = vld [vmem:[%s7588_s1 + $0x68] sm:$0xff] }
 0x166   : > { %2917 = vmatpush.msra.mxu0 %v2539_v51  ;;  %2956 = vmatpush.msra.mxu2 %v2558_v56  ;;  %v2510_v51 = vld [vmem:[%s7588_s1 + $0x178] sm:$0xff]  ;;  %v2563_v56 = vld [vmem:[%s7588_s1 + $0x320] sm:$0xff] }
 0x167   : > { %2898 = vmatpush.msra.mxu3 %v2521_v53  ;;  %2937 = vmatpush.msrb.mxu1 %v2540_v2  ;;  %v3679_v53 = vld [vmem:[%s6069_s15 + $0x78] sm:$0xff]  ;;  %v2512_v2 = vld [vmem:[%s7588_s1 + $0x188] sm:$0xff] }
 0x168   : > { %2918 = vmatpush.msra.mxu0 %v2522_v55  ;;  %2957 = vmatpush.msra.mxu2 %v2541_v60  ;;  %v3678_v55 = vld [vmem:[%s6069_s15 + $0x70] sm:$0xff]  ;;  %v3677_v60 = vld [vmem:[%s6069_s15 + $0x68] sm:$0xff] }
 0x169   : > { %2899 = vmatpush.msra.mxu3 %v2504_v57  ;;  %2938 = vmatpush.msrb.mxu1 %v2523_v6  ;;  %v2543_v57 = vld [vmem:[%s7588_s1 + $0x280] sm:$0xff]  ;;  %v3674_v6 = vld [vmem:[%s6069_s15 + $0x50] sm:$0xff] }
 0x16a   : > { %2919 = vmatpush.msra.mxu0 %v2505_v59  ;;  %2958 = vmatpush.msra.mxu2 %v2524_v0  ;;  %v2546_v59 = vld [vmem:[%s7588_s1 + $0x298] sm:$0xff]  ;;  %v3676_v0 = vld [vmem:[%s6069_s15 + $0x60] sm:$0xff] }
 0x16b   : > { %2900 = vmatpush.msra.mxu3 %v2487_v61  ;;  %2939 = vmatpush.msrb.mxu1 %v2506_v10  ;;  %v2526_v61 = vld [vmem:[%s7588_s1 + $0x1f8] sm:$0xff]  ;;  %v2649_v10 = vld [vmem:[%s7588_s1 + $0x5d0] sm:$0x3f] }
 0x16c   : > { %2920 = vmatpush.msra.mxu0 %v2488_v63  ;;  %2959 = vmatpush.msra.mxu2 %v2507_v5  ;;  %v2529_v63 = vld [vmem:[%s7588_s1 + $0x210] sm:$0xff]  ;;  %v2495_v5 = vld [vmem:[%s7588_s1 + $0x100] sm:$0xff] }
 0x16d   : > { %2901 = vmatpush.msra.mxu3 %v2470_v1  ;;  %2940 = vmatpush.msrb.mxu1 %v2489_v14  ;;  %v2509_v1 = vld [vmem:[%s7588_s1 + $0x170] sm:$0xff] }
 0x16e   : > { %4741 = vmatmul.msk.f32.vlgmr.msra.gmra.mxu3 %vm2690_vm1, %v5642_v49  ;;  %2921 = vmatpush.msra.mxu0 %v2471_v3  ;;  %v3675_v3 = vld [vmem:[%s6069_s15 + $0x58] sm:$0xff]  ;;  %v3710_v14 = vld [vmem:[%s6069_s15 + $0x170] sm:$0xff] }
 0x16f   : > { %4743 = vmatmul.msk.f32.vlgmr.msra.gmra.mxu0 %vm2690_vm1, %v5642_v49  ;;  %4748 = vmatpush.msk.msrb.mxu3 %vm2694_vm0, %v2644_v4  ;;  %v2492_v4 = vld [vmem:[%s7588_s1 + $0xe8] sm:$0xff] }
 0x170   : > { %4750 = vmatpush.msk.msrb.mxu0 %vm2694_vm0, %v2645_v8  ;;  %2960 = vmatpush.msra.mxu2 %v2490_v9  ;;  %v2478_v8 = vld [vmem:[%s7588_s1 + $0x78] sm:$0xff]  ;;  %v3673_v9 = vld [vmem:[%s6069_s15 + $0x48] sm:$0xff] }
 0x171   : > { %2972 = vmatpush.msrb.mxu3 %v2627_v7  ;;  %2941 = vmatpush.msrb.mxu1 %v2472_v17  ;;  %v2475_v7 = vld [vmem:[%s7588_s1 + $0x60] sm:$0xff]  ;;  %v3709_v17 = vld [vmem:[%s6069_s15 + $0x168] sm:$0xff] }
 0x172   : > { %2992 = vmatpush.msrb.mxu0 %v2628_v12  ;;  %2961 = vmatpush.msra.mxu2 %v2473_v13  ;;  %v3672_v12 = vld [vmem:[%s6069_s15 + $0x40] sm:$0xff]  ;;  %v2632_v13 = vld [vmem:[%s7588_s1 + $0x548] sm:$0xff] }
 0x173   : > { %2973 = vmatpush.msrb.mxu3 %v2610_v11  ;;  %4747 = vmatmul.msk.f32.vlgmr.msra.gmra.mxu2 %vm2690_vm1, %v5642_v49  ;;  %v3711_v11 = vld [vmem:[%s6069_s15 + $0x178] sm:$0xff] }
 0x174   : > { %4754 = vmatpush.msk.msrb.mxu2 %vm2694_vm0, %v2647_v16  ;;  %4752 = vmatpush.msk.msra.mxu1 %vm2694_vm0, %v2646_v20  ;;  %v2615_v16 = vld [vmem:[%s7588_s1 + $0x4c0] sm:$0xff] }
 0x175   : > { %2974 = vmatpush.msrb.mxu3 %v2593_v15  ;;  %2993 = vmatpush.msrb.mxu0 %v2611_v21  ;;  %v3671_v15 = vld [vmem:[%s6069_s15 + $0x38] sm:$0xff]  ;;  %v3708_v20 = vld [vmem:[%s6069_s15 + $0x160] sm:$0xff]  ;;  %v3669_v21 = vld [vmem:[%s6069_s15 + $0x28] sm:$0xff] }
 0x176   : > { %3032 = vmatpush.msrb.mxu2 %v2630_v19  ;;  %3012 = vmatpush.msra.mxu1 %v2629_v24  ;;  %v2598_v19 = vld [vmem:[%s7588_s1 + $0x438] sm:$0xff]  ;;  %v3668_v24 = vld [vmem:[%s6069_s15 + $0x20] sm:$0xff] }
 0x177   : > { %2975 = vmatpush.msrb.mxu3 %v2576_v18  ;;  %2994 = vmatpush.msrb.mxu0 %v2594_v25  ;;  %v3670_v18 = vld [vmem:[%s6069_s15 + $0x30] sm:$0xff]  ;;  %v2564_v25 = vld [vmem:[%s7588_s1 + $0x328] sm:$0xff] }
 0x178   : > { %3033 = vmatpush.msrb.mxu2 %v2613_v23  ;;  %3013 = vmatpush.msra.mxu1 %v2612_v28  ;;  %v3707_v23 = vld [vmem:[%s6069_s15 + $0x158] sm:$0xff]  ;;  %v2547_v28 = vld [vmem:[%s7588_s1 + $0x2a0] sm:$0xff] }
 0x179   : > { %2976 = vmatpush.msrb.mxu3 %v2559_v22  ;;  %2995 = vmatpush.msrb.mxu0 %v2577_v29  ;;  %v2581_v22 = vld [vmem:[%s7588_s1 + $0x3b0] sm:$0xff]  ;;  %v3705_v29 = vld [vmem:[%s6069_s15 + $0x148] sm:$0xff] }
 0x17a   : > { %3034 = vmatpush.msrb.mxu2 %v2596_v27  ;;  %3014 = vmatpush.msra.mxu1 %v2595_v32  ;;  %v3667_v27 = vld [vmem:[%s6069_s15 + $0x18] sm:$0xff]  ;;  %v3704_v32 = vld [vmem:[%s6069_s15 + $0x140] sm:$0xff] }
 0x17b   : > { %2977 = vmatpush.msrb.mxu3 %v2542_v26  ;;  %2996 = vmatpush.msrb.mxu0 %v2560_v33  ;;  %v3706_v26 = vld [vmem:[%s6069_s15 + $0x150] sm:$0xff]  ;;  %v3665_v33 = vld [vmem:[%s6069_s15 + $0x8] sm:$0xff] }
 0x17c   : > { %3035 = vmatpush.msrb.mxu2 %v2579_v31  ;;  %3015 = vmatpush.msra.mxu1 %v2578_v36  ;;  %v2530_v31 = vld [vmem:[%s7588_s1 + $0x218] sm:$0xff] }
 0x17d   : > { %2978 = vmatpush.msrb.mxu3 %v2525_v30  ;;  %4745 = vmatmul.msk.f32.vlgmr.msrb.gmra.mxu1 %vm2690_vm1, %v5642_v49  ;;  %v3666_v30 = vld [vmem:[%s6069_s15 + $0x10] sm:$0xff]  ;;  %v3703_v36 = vld [vmem:[%s6069_s15 + $0x138] sm:$0xff] }
 0x17e   : > { %3036 = vmatpush.msrb.mxu2 %v2562_v35  ;;  %3016 = vmatpush.msra.mxu1 %v2561_v39  ;;  %v2513_v35 = vld [vmem:[%s7588_s1 + $0x190] sm:$0xff] }
 0x17f   : > { %2979 = vmatpush.msrb.mxu3 %v2508_v34  ;;  %2997 = vmatpush.msrb.mxu0 %v2543_v57  ;;  %v6172_v34 = vld [vmem:[%s7589_s2] sm:$0xff] }
 0x180   : > { %3037 = vmatpush.msrb.mxu2 %v2545_v38  ;;  %3017 = vmatpush.msra.mxu1 %v2544_v44  ;;  %v2496_v38 = vld [vmem:[%s7588_s1 + $0x108] sm:$0xff]  ;;  %v2656_v39 = vperm.slane %v6172_v34, 0  ;;  %v2657_v57 = vperm.slane %v6172_v34, 1 }
 0x181   : > { %2980 = vmatpush.msrb.mxu3 %v2491_v37  ;;  %2998 = vmatpush.msrb.mxu0 %v2526_v61  ;;  %v3664_v37 = vld [vmem:[%s6069_s15] sm:$0xff]  ;;  %v3701_v44 = vld [vmem:[%s6069_s15 + $0x128] sm:$0xff] }
 0x182   : > { %3038 = vmatpush.msrb.mxu2 %v2528_v41  ;;  %3018 = vmatpush.msra.mxu1 %v2527_v47  ;;  %v3702_v41 = vld [vmem:[%s6069_s15 + $0x130] sm:$0xff]  ;;  %v3724_v61 = vld [vmem:[%s6069_s15 + $0x1e0] sm:$0xff] }
 0x183   : > { %2981 = vmatpush.msrb.mxu3 %v2474_v40  ;;  %2999 = vmatpush.msrb.mxu0 %v2509_v1  ;;  %v3695_v40 = vld [vmem:[%s6069_s15 + $0xf8] sm:$0xff] }
 0x184   : > { %3039 = vmatpush.msrb.mxu2 %v2511_v43  ;;  %3019 = vmatpush.msra.mxu1 %v2510_v51  ;;  %v3694_v43 = vld [vmem:[%s6069_s15 + $0xf0] sm:$0xff] }
 0x185   : > { %4756 = vmatpush.msk.msra.mxu3 %vm2694_vm0, %v2648_v42  ;;  %3000 = vmatpush.msrb.mxu0 %v2492_v4  ;;  %v2479_v42 = vld [vmem:[%s7588_s1 + $0x80] sm:$0xff]  ;;  %v3726_v51 = vld [vmem:[%s6069_s15 + $0x1f0] sm:$0xff]  ;;  %v3723_v4 = vld [vmem:[%s6069_s15 + $0x1d8] sm:$0xff] }
 0x186   : > { %3040 = vmatpush.msrb.mxu2 %v2494_v46  ;;  %4749 = vmatmul.msk.f32.vlgmr.msrb.gmra.mxu3 %vm2690_vm1, %v5642_v49  ;;  %v3727_v46 = vld [vmem:[%s6069_s15 + $0x1f8] sm:$0xff] }
 0x187   : > { %3052 = vmatpush.msra.mxu3 %v2631_v45  ;;  %3020 = vmatpush.msra.mxu1 %v2493_v58  ;;  %v3691_v58 = vld [vmem:[%s6069_s15 + $0xd8] sm:$0xff] }
 0x188   : > { %3041 = vmatpush.msrb.mxu2 %v2477_v50  ;;  %3001 = vmatpush.msrb.mxu0 %v2475_v7  ;;  %v3700_v50 = vld [vmem:[%s6069_s15 + $0x120] sm:$0xff]  ;;  %v3741_v7 = vld [vmem:[%s6069_s15 + $0x268] sm:$0xff] }
 0x189   : > { %3053 = vmatpush.msra.mxu3 %v2614_v48  ;;  %4755 = vmatmul.msk.f32.vlgmr.msrb.gmra.mxu2 %vm2690_vm1, %v5642_v49  ;;  %v3693_v48 = vld [vmem:[%s6069_s15 + $0xe8] sm:$0xff] }
 0x18a   : > { %4780 = vmatpush.msra.mxu2 %v3679_v53  ;;  %3021 = vmatpush.msra.mxu1 %v2476_v62 }
 0x18b   : > { %3054 = vmatpush.msra.mxu3 %v2597_v52  ;;  %4751 = vmatmul.msk.f32.vlgmr.msrb.gmra.mxu0 %vm2690_vm1, %v5642_v49 }
 0x18c   : > { %4781 = vmatpush.msra.mxu2 %v3678_v55  ;;  %3936 = vmatpush.msrb.mxu1 %v3679_v53  ;;  %v3692_v53 = vld [vmem:[%s6069_s15 + $0xe0] sm:$0xff] }
 0x18d   : > { %3055 = vmatpush.msra.mxu3 %v2580_v54  ;;  %4758 = vmatpush.msk.msra.mxu0 %vm2694_vm0, %v2649_v10  ;;  %v2658_v54 = vperm.slane %v6172_v34, 2  ;;  %v3722_v10 = vld [vmem:[%s6069_s15 + $0x1d0] sm:$0xff] }
 0x18e   : > { %4782 = vmatpush.msra.mxu2 %v3677_v60  ;;  %3937 = vmatpush.msrb.mxu1 %v3678_v55  ;;  %v3699_v55 = vld [vmem:[%s6069_s15 + $0x118] sm:$0xff] }
 0x18f   : > { %3056 = vmatpush.msra.mxu3 %v2563_v56  ;;  %3072 = vmatpush.msra.mxu0 %v2632_v13  ;;  %v3725_v56 = vld [vmem:[%s6069_s15 + $0x1e8] sm:$0xff]  ;;  %v3688_v13 = vld [vmem:[%s6069_s15 + $0xc0] sm:$0xff] }
 0x190   : > { %4783 = vmatpush.msra.mxu2 %v3676_v0  ;;  %3938 = vmatpush.msrb.mxu1 %v3677_v60  ;;  %v3698_v60 = vld [vmem:[%s6069_s15 + $0x110] sm:$0xff] }
 0x191   : > { %3057 = vmatpush.msra.mxu3 %v2546_v59  ;;  %3073 = vmatpush.msra.mxu0 %v2615_v16  ;;  %v3743_v59 = vld [vmem:[%s6069_s15 + $0x278] sm:$0xff]  ;;  %v3721_v16 = vld [vmem:[%s6069_s15 + $0x1c8] sm:$0xff] }
 0x192   : > { %4784 = vmatpush.msra.mxu2 %v3675_v3  ;;  %3939 = vmatpush.msrb.mxu1 %v3676_v0  ;;  %v3742_v0 = vld [vmem:[%s6069_s15 + $0x270] sm:$0xff] }
 0x193   : > { %3058 = vmatpush.msra.mxu3 %v2529_v63  ;;  %3074 = vmatpush.msra.mxu0 %v2598_v19  ;;  %v3690_v63 = vld [vmem:[%s6069_s15 + $0xd0] sm:$0xff]  ;;  %v3720_v19 = vld [vmem:[%s6069_s15 + $0x1c0] sm:$0xff] }
 0x194   : > { %4785 = vmatpush.msra.mxu2 %v3674_v6  ;;  %3940 = vmatpush.msrb.mxu1 %v3675_v3  ;;  %v3697_v3 = vld [vmem:[%s6069_s15 + $0x108] sm:$0xff] }
 0x195   : > { %3059 = vmatpush.msra.mxu3 %v2512_v2  ;;  %4753 = vmatmul.msk.f32.vlgmr.msra.gmra.mxu1 %vm2690_vm1, %v5642_v49 }
 0x196   : > { %4786 = vmatpush.msra.mxu2 %v3673_v9  ;;  %3941 = vmatpush.msrb.mxu1 %v3674_v6  ;;  %v3689_v6 = vld [vmem:[%s6069_s15 + $0xc8] sm:$0xff] }
 0x197   : > { %3060 = vmatpush.msra.mxu3 %v2495_v5  ;;  %3075 = vmatpush.msra.mxu0 %v2581_v22  ;;  %v3719_v22 = vld [vmem:[%s6069_s15 + $0x1b8] sm:$0xff] }
 0x198   : > { %4787 = vmatpush.msra.mxu2 %v3672_v12  ;;  %3942 = vmatpush.msrb.mxu1 %v3673_v9  ;;  %v3696_v9 = vld [vmem:[%s6069_s15 + $0x100] sm:$0xff] }
 0x199   : > { %3061 = vmatpush.msra.mxu3 %v2478_v8  ;;  %3076 = vmatpush.msra.mxu0 %v2564_v25  ;;  %v3737_v25 = vld [vmem:[%s6069_s15 + $0x248] sm:$0xff] }
 0x19a   : > { %4788 = vmatpush.msra.mxu2 %v3671_v15  ;;  %3943 = vmatpush.msrb.mxu1 %v3672_v12 }
 0x19b   : > { %4012 = vmatpush.msrb.mxu3 %v3711_v11  ;;  %3077 = vmatpush.msra.mxu0 %v2547_v28 }
 0x19c   : > { %4789 = vmatpush.msra.mxu2 %v3670_v18  ;;  %3944 = vmatpush.msrb.mxu1 %v3671_v15 }
 0x19d   : > { %4013 = vmatpush.msrb.mxu3 %v3710_v14  ;;  %3078 = vmatpush.msra.mxu0 %v2530_v31  ;;  %v3740_v14 = vld [vmem:[%s6069_s15 + $0x260] sm:$0xff] }
 0x19e   : > { %4790 = vmatpush.msra.mxu2 %v3669_v21  ;;  %3945 = vmatpush.msrb.mxu1 %v3670_v18  ;;  %v3739_v18 = vld [vmem:[%s6069_s15 + $0x258] sm:$0xff] }
 0x19f   : > { %4014 = vmatpush.msrb.mxu3 %v3709_v17  ;;  %3079 = vmatpush.msra.mxu0 %v2513_v35  ;;  %v3687_v17 = vld [vmem:[%s6069_s15 + $0xb8] sm:$0xff]  ;;  %v3717_v35 = vld [vmem:[%s6069_s15 + $0x1a8] sm:$0xff] }
 0x1a0   : > { %4791 = vmatpush.msra.mxu2 %v3668_v24  ;;  %3946 = vmatpush.msrb.mxu1 %v3669_v21  ;;  %v3738_v21 = vld [vmem:[%s6069_s15 + $0x250] sm:$0xff] }
 0x1a1   : > { %4015 = vmatpush.msrb.mxu3 %v3708_v20  ;;  %3080 = vmatpush.msra.mxu0 %v2496_v38  ;;  %v3686_v20 = vld [vmem:[%s6069_s15 + $0xb0] sm:$0xff]  ;;  %v3735_v38 = vld [vmem:[%s6069_s15 + $0x238] sm:$0xff] }
 0x1a2   : > { %4792 = vmatpush.msra.mxu2 %v3667_v27  ;;  %3947 = vmatpush.msrb.mxu1 %v3668_v24 }
 0x1a3   : > { %4016 = vmatpush.msrb.mxu3 %v3707_v23  ;;  %3081 = vmatpush.msra.mxu0 %v2479_v42  ;;  %v3685_v23 = vld [vmem:[%s6069_s15 + $0xa8] sm:$0xff]  ;;  %v3682_v42 = vld [vmem:[%s6069_s15 + $0x90] sm:$0xff] }
 0x1a4   : > { %4793 = vmatpush.msra.mxu2 %v3666_v30  ;;  %3948 = vmatpush.msrb.mxu1 %v3667_v27 }
 0x1a5   : > { %4017 = vmatpush.msrb.mxu3 %v3706_v26  ;;  %4050 = vmatpush.msrb.mxu0 %v3727_v46  ;;  %v3718_v26 = vld [vmem:[%s6069_s15 + $0x1b0] sm:$0xff]  ;;  %v3715_v46 = vld [vmem:[%s6069_s15 + $0x198] sm:$0xff] }
 0x1a6   : > { %4794 = vmatpush.msra.mxu2 %v3665_v33  ;;  %3949 = vmatpush.msrb.mxu1 %v3666_v30 }
 0x1a7   : > { %4018 = vmatpush.msrb.mxu3 %v3705_v29  ;;  %4051 = vmatpush.msrb.mxu0 %v3726_v51  ;;  %v3684_v29 = vld [vmem:[%s6069_s15 + $0xa0] sm:$0xff] }
 0x1a8   : > { %4795 = vmatpush.msra.mxu2 %v3664_v37  ;;  %3950 = vmatpush.msrb.mxu1 %v3665_v33  ;;  %v3736_v33 = vld [vmem:[%s6069_s15 + $0x240] sm:$0xff] }
 0x1a9   : > { %4019 = vmatpush.msrb.mxu3 %v3704_v32  ;;  %4052 = vmatpush.msrb.mxu0 %v3725_v56  ;;  %v2660_v32 = vperm.slane %v6172_v34, 4 }
 0x1aa   : > { %3974 = vmatpush.msrb.mxu2 %v3695_v40  ;;  %4757 = vmatmul.msk.f32.vlgmr.msra.gmra.mxu3 %vm2690_vm1, %v5642_v49 }
 0x1ab   : > { %4020 = vmatpush.msrb.mxu3 %v3703_v36  ;;  %3951 = vmatpush.msrb.mxu1 %v3664_v37  ;;  %v3683_v37 = vld [vmem:[%s6069_s15 + $0x98] sm:$0xff] }
 0x1ac   : > { %3975 = vmatpush.msrb.mxu2 %v3694_v43  ;;  %4053 = vmatpush.msrb.mxu0 %v3724_v61 }
 0x1ad   : > { %4021 = vmatpush.msrb.mxu3 %v3702_v41  ;;  %4088 = vmatpush.msra.mxu1 %v3743_v59  ;;  %v3790_v59 = vld [vmem:[%s6069_s15 + $0x3f0] sm:$0xff] }
 0x1ae   : > { %3976 = vmatpush.msrb.mxu2 %v3693_v48  ;;  %4054 = vmatpush.msrb.mxu0 %v3723_v4  ;;  %v2659_v48 = vperm.slane %v6172_v34, 3 }
 0x1af   : > { %4022 = vmatpush.msrb.mxu3 %v3701_v44  ;;  %4089 = vmatpush.msra.mxu1 %v3742_v0  ;;  %v3713_v0 = vld [vmem:[%s6069_s15 + $0x188] sm:$0xff] }
 0x1b0   : > { %3977 = vmatpush.msrb.mxu2 %v3692_v53  ;;  %4055 = vmatpush.msrb.mxu0 %v3722_v10  ;;  %v3714_v53 = vld [vmem:[%s6069_s15 + $0x190] sm:$0xff]  ;;  %v3477_v10 = vld [vmem:[%s7590_s3 + $0x220] sm:$0xff] }
 0x1b1   : > { %4023 = vmatpush.msrb.mxu3 %v3700_v50  ;;  %4090 = vmatpush.msra.mxu1 %v3741_v7  ;;  %v3681_v50 = vld [vmem:[%s6069_s15 + $0x88] sm:$0xff] }
 0x1b2   : > { %3978 = vmatpush.msrb.mxu2 %v3691_v58  ;;  %4056 = vmatpush.msrb.mxu0 %v3721_v16  ;;  %v3769_v16 = vld [vmem:[%s6069_s15 + $0x348] sm:$0xff] }
 0x1b3   : > { %4024 = vmatpush.msrb.mxu3 %v3699_v55  ;;  %4091 = vmatpush.msra.mxu1 %v3740_v14 }
 0x1b4   : > { %3979 = vmatpush.msrb.mxu2 %v3690_v63  ;;  %4057 = vmatpush.msrb.mxu0 %v3720_v19  ;;  %v3732_v63 = vld [vmem:[%s6069_s15 + $0x220] sm:$0xff] }
 0x1b5   : > { %4025 = vmatpush.msrb.mxu3 %v3698_v60  ;;  %4092 = vmatpush.msra.mxu1 %v3739_v18 }
 0x1b6   : > { %3980 = vmatpush.msrb.mxu2 %v3689_v6  ;;  %4058 = vmatpush.msrb.mxu0 %v3719_v22  ;;  %v3775_v6 = vld [vmem:[%s6069_s15 + $0x378] sm:$0xff] }
 0x1b7   : > { %4026 = vmatpush.msrb.mxu3 %v3697_v3  ;;  %4093 = vmatpush.msra.mxu1 %v3738_v21  ;;  %v3730_v21 = vld [vmem:[%s6069_s15 + $0x210] sm:$0xff] }
 0x1b8   : > { %3981 = vmatpush.msrb.mxu2 %v3688_v13  ;;  %4759 = vmatmul.msk.f32.vlgmr.msra.gmra.mxu0 %vm2690_vm1, %v5642_v49 }
 0x1b9   : > { %4027 = vmatpush.msrb.mxu3 %v3696_v9  ;;  %4094 = vmatpush.msra.mxu1 %v3737_v25  ;;  %v2662_v25 = vperm.slane %v6172_v34, 6 }
 0x1ba   : > { %3982 = vmatpush.msrb.mxu2 %v3687_v17  ;;  %4059 = vmatpush.msrb.mxu0 %v3718_v26  ;;  %v3774_v26 = vld [vmem:[%s6069_s15 + $0x370] sm:$0xff] }
 0x1bb   : > { %4095 = vmatpush.msra.mxu1 %v3736_v33  ;;  %4164 = vmatpush.msra.mxu3 %v3775_v6 }
 0x1bc   : > { %3983 = vmatpush.msrb.mxu2 %v3686_v20  ;;  %4060 = vmatpush.msrb.mxu0 %v3717_v35  ;;  %v3759_v20 = vld [vmem:[%s6069_s15 + $0x2f8] sm:$0xff]  ;;  %v3411_v35 = vld [vmem:[%s7590_s3 + $0x10] sm:$0xff] }
 0x1bd   : > { %4096 = vmatpush.msra.mxu1 %v3735_v38  ;;  %4165 = vmatpush.msra.mxu3 %v3774_v26  ;;  %v3768_v26 = vld [vmem:[%s6069_s15 + $0x340] sm:$0xff] }
 0x1be   : > { %3984 = vmatpush.msrb.mxu2 %v3685_v23 }
 0x1bf   : > { %v2763_v45 = vpop.f32.mrf.mxu0 }
 0x1c0   : > { %v2764_v47 = vadd.f32 %v2763_v45, %v2656_v39  ;;  %3985 = vmatpush.msrb.mxu2 %v3684_v29  ;;  %v3716_v39 = vld [vmem:[%s6069_s15 + $0x1a0] sm:$0xff]  ;;  %v3734_v45 = vld [vmem:[%s6069_s15 + $0x230] sm:$0xff] }
 0x1c1   : > { %4061 = vmatpush.msrb.mxu0 %v3716_v39  ;;  %4097 = vmatpush.msra.mxu1 %v3734_v45  ;;  %v3758_v29 = vld [vmem:[%s6069_s15 + $0x2f0] sm:$0xff] }
 0x1c2   : > { %v4760_v52 = vmul.f32 -1.442695, %v2764_v47  ;;  %3986 = vmatpush.msrb.mxu2 %v3683_v37  ;;  %v3757_v37 = vld [vmem:[%s6069_s15 + $0x2e8] sm:$0xff] }
 0x1c3   : > { %4062 = vmatpush.msrb.mxu0 %v3715_v46 }
 0x1c4   : > { %4824 = vpow2.f32 %v4760_v52  ;;  %3987 = vmatpush.msrb.mxu2 %v3682_v42  ;;  %v3733_v52 = vld [vmem:[%s6069_s15 + $0x228] sm:$0xff] }
 0x1c5   : > { %4098 = vmatpush.msra.mxu1 %v3733_v52  ;;  %4063 = vmatpush.msrb.mxu0 %v3714_v53  ;;  %v3756_v52 = vld [vmem:[%s6069_s15 + $0x2e0] sm:$0xff]  ;;  %v3807_v53 = vld [vmem:[%s6069_s15 + $0x478] sm:$0xff] }
 0x1c6   : > { %v2803_v62 = vpop.f32.mrf.mxu2  ;;  %3988 = vmatpush.msrb.mxu2 %v3681_v50 }
 0x1c7   : > { %v2804_v1 = vadd.f32 %v2803_v62, %v2658_v54  ;;  %v2783_v2 = vpop.f32.mrf.mxu3  ;;  %4099 = vmatpush.msra.mxu1 %v3732_v63  ;;  %4064 = vmatpush.msrb.mxu0 %v3713_v0  ;;  %v3806_v63 = vld [vmem:[%s6069_s15 + $0x470] sm:$0xff] }
 0x1c8   : > { %v2784_v5 = vadd.f32 %v2783_v2, %v2657_v57  ;;  %v3680_v57 = vld [vmem:[%s6069_s15 + $0x80] sm:$0xff] }
 0x1c9   : > { %v4762_v8 = vmul.f32 -1.442695, %v2804_v1  ;;  %3989 = vmatpush.msrb.mxu2 %v3680_v57  ;;  %v3772_v57 = vld [vmem:[%s6069_s15 + $0x360] sm:$0xff] }
 0x1ca   : > { %v4825_v11 = vpop.eup %4824  ;;  %v4761_v12 = vmul.f32 -1.442695, %v2784_v5  ;;  %v3409_v5 = vld [vmem:[%s7590_s3] sm:$0xff] }
 0x1cb   : > { %v6215_v15 = vadd.f32 1.0, %v4825_v11  ;;  %4826 = vpow2.f32 %v4762_v8  ;;  %v3731_v11 = vld [vmem:[%s6069_s15 + $0x218] sm:$0xff] }
 0x1cc   : > { %4828 = vpow2.f32 %v4761_v12  ;;  %v3712_v12 = vld [vmem:[%s6069_s15 + $0x180] sm:$0xff]  ;;  %4100 = vmatpush.msra.mxu1 %v3731_v11 }
 0x1cd   : > { %4830 = vrcp.f32 %v6215_v15  ;;  %v3163_v40 = vand.u32 2147483647, %v6215_v15  ;;  %v3165_v43 = vand.u32 2147483648, %v6215_v15  ;;  %vm3159_vm3 = vweird.f32 %v6215_v15  ;;  %4065 = vmatpush.msrb.mxu0 %v3712_v12 }
 0x1ce   : > { %4101 = vmatpush.msra.mxu1 %v3730_v21 }
 0x1cf   : > { %vm6262_vm4 = vcmp.eq.f32.partialorder %v3163_v40, 8.507059e+37  ;;  %v3166_v60 = vor.u32 1.1754944e-38, %v3165_v43  ;;  %v3494_v40 = vld [vmem:[%s7590_s3 + $0x2a8] sm:$0xff] }
 0x1d0   : > { %v3773_v43 = vld [vmem:[%s6069_s15 + $0x368] sm:$0xff] }
 0x1d1   : > { %v4827_v24 = vpop.eup %4826  ;;  %4166 = vmatpush.msra.mxu3 %v3773_v43  ;;  %v3410_v43 = vld [vmem:[%s7590_s3 + $0x8] sm:$0xff] }
 0x1d2   : > { %v4829_v27 = vpop.eup %4828  ;;  %v6228_v28 = vadd.f32 1.0, %v4827_v24 }
 0x1d3   : > { %v6231_v30 = vpop.eup %4830  ;;  %v6233_v31 = vadd.f32 1.0, %v4829_v27  ;;  %4167 = vmatpush.msra.mxu3 %v3772_v57  ;;  %v2663_v57 = vperm.slane %v6172_v34, 7 }
 0x1d4   : > { %v3155_v36 = vmul.f32 %v6231_v30, %v6215_v15  ;;  %4832 = vrcp.f32 %v6228_v28  ;;  %vm3160_vm2 = vweird.f32 %v6231_v30  ;;  %vm3189_vm6 = vweird.f32 %v6228_v28 }
 0x1d5   : > { %4834 = vrcp.f32 %v6233_v31  ;;  %vm6271_vm5 = vmor %vm3159_vm3, %vm3160_vm2  ;;  %v3193_v2 = vand.u32 2147483647, %v6228_v28  ;;  %v3195_v3 = vand.u32 2147483648, %v6228_v28  ;;  %vm3174_vm10 = vweird.f32 %v6233_v31 }
 0x1d6   : > { %v3156_v49 = vsub.f32 1.0, %v3155_v36  ;;  %v2843_v41 = vpop.f32.mrf.mxu0  ;;  %v3728_v36 = vld [vmem:[%s6069_s15 + $0x200] sm:$0xff] }
 0x1d7   : > { %v2844_v44 = vadd.f32 %v2843_v41, %v2660_v32  ;;  %v3196_v17 = vor.u32 1.1754944e-38, %v3195_v3  ;;  %vm3194_vm9 = vcmp.eq.f32.partialorder %v3193_v2, 8.507059e+37  ;;  %v3789_v2 = vld [vmem:[%s6069_s15 + $0x3e8] sm:$0xff] }
 0x1d8   : > { %v3157_v47 = vmul.f32 %v6231_v30, %v3156_v49  ;;  %v3426_v49 = vld [vmem:[%s7590_s3 + $0x88] sm:$0xff] }
 0x1d9   : > { %v4764_v51 = vmul.f32 -1.442695, %v2844_v44  ;;  %v3791_v44 = vld [vmem:[%s6069_s15 + $0x3f8] sm:$0xff] }
 0x1da   : > { %v6258_v54 = vpop.eup %4832  ;;  %v3158_v55 = vadd.f32 %v6231_v30, %v3157_v47  ;;  %v3178_v47 = vand.u32 2147483647, %v6233_v31  ;;  %4202 = vmatpush.msra.mxu0 %v3791_v44 }
 0x1db   : > { %v6267_v58 = vpop.eup %4834  ;;  %v3185_v61 = vmul.f32 %v6258_v54, %v6228_v28  ;;  %4836 = vpow2.f32 %v4764_v51  ;;  %v2823_v62 = vpop.f32.mrf.mxu3  ;;  %vm3190_vm7 = vweird.f32 %v6258_v54 }
 0x1dc   : > { %v3162_v1 = vsel %vm6271_vm5, %v6231_v30, %v3158_v55  ;;  %v2824_v4 = vadd.f32 %v2823_v62, %v2659_v48  ;;  %v3170_v9 = vmul.f32 %v6267_v58, %v6233_v31  ;;  %vm6304_vm8 = vmor %vm3189_vm6, %vm3190_vm7  ;;  %v3729_v30 = vld [vmem:[%s6069_s15 + $0x208] sm:$0xff]  ;;  %vm3175_vm11 = vweird.f32 %v6267_v58  ;;  %v3428_v55 = vld [vmem:[%s7590_s3 + $0x98] sm:$0xff]  ;;  %4203 = vmatpush.msra.mxu0 %v3790_v59 }
 0x1dd   : > { %v3167_v7 = vsel %vm6262_vm4, %v3166_v60, %v3162_v1  ;;  %v3186_v8 = vsub.f32 1.0, %v3185_v61  ;;  %4102 = vmatpush.msra.mxu1 %v3729_v30  ;;  %v3180_v48 = vand.u32 2147483648, %v6233_v31  ;;  %vm6363_vm12 = vmor %vm3174_vm10, %vm3175_vm11  ;;  %v3755_v62 = vld [vmem:[%s6069_s15 + $0x2d8] sm:$0xff]  ;;  %vm6373_vm13 = vcmp.eq.f32.partialorder %v3178_v47, 8.507059e+37 }
 0x1de   : > { %v6299_v13 = vperm.slane %v3167_v7, 0  ;;  %v4763_v14 = vmul.f32 -1.442695, %v2824_v4  ;;  %v3171_v24 = vsub.f32 1.0, %v3170_v9  ;;  %v2883_v28 = vpop.f32.mrf.mxu2  ;;  %v3771_v1 = vld [vmem:[%s6069_s15 + $0x358] sm:$0xff]  ;;  %v3443_v4 = vld [vmem:[%s7590_s3 + $0x110] sm:$0xff]  ;;  %4204 = vmatpush.msra.mxu0 %v3789_v2 }
 0x1df   : > { %v3187_v15 = vmul.f32 %v6258_v54, %v3186_v8  ;;  %v2884_v41 = vadd.f32 %v2883_v28, %v2662_v25  ;;  %4103 = vmatpush.msra.mxu1 %v3728_v36  ;;  %v3181_v31 = vor.u32 1.1754944e-38, %v3180_v48  ;;  %v3770_v9 = vld [vmem:[%s6069_s15 + $0x350] sm:$0xff]  ;;  %4168 = vmatpush.msra.mxu3 %v3771_v1  ;;  %v3753_v25 = vld [vmem:[%s6069_s15 + $0x2c8] sm:$0xff]  ;;  %v3788_v28 = vld [vmem:[%s6069_s15 + $0x3e0] sm:$0xff] }
 0x1e0   : > { %4838 = vpow2.f32 %v4763_v14  ;;  %v3545_v18 = vmul.f32 %v6299_v13, %v3409_v5  ;;  %v3613_v19 = vmul.f32 %v6299_v13, %v3477_v10  ;;  %v3172_v39 = vmul.f32 %v6267_v58, %v3171_v24  ;;  %v3511_v5 = vld [vmem:[%s7590_s3 + $0x330] sm:$0xff]  ;;  %v2863_v24 = vpop.f32.mrf.mxu1  ;;  %v3787_v36 = vld [vmem:[%s6069_s15 + $0x3d8] sm:$0xff]  ;;  %4205 = vmatpush.msra.mxu0 %v3788_v28  ;;  %v3785_v2 = vld [vmem:[%s6069_s15 + $0x3c8] sm:$0xff] }
 0x1e1   : > { %v4837_v22 = vpop.eup %4836  ;;  %v3188_v23 = vadd.f32 %v6258_v54, %v3187_v15  ;;  %v3562_v50 = vmul.f32 %v6299_v13, %v3426_v49  ;;  %v3630_v51 = vmul.f32 %v6299_v13, %v3494_v40  ;;  %v4766_v56 = vmul.f32 -1.442695, %v2884_v41  ;;  %4169 = vmatpush.msra.mxu3 %v3770_v9  ;;  %v3767_v49 = vld [vmem:[%s6069_s15 + $0x338] sm:$0xff]  ;;  %v3752_v40 = vld [vmem:[%s6069_s15 + $0x2c0] sm:$0xff]  ;;  %v3802_v1 = vld [vmem:[%s6069_s15 + $0x450] sm:$0xff] }
 0x1e2   : > { %v6315_v27 = vadd.f32 1.0, %v4837_v22  ;;  %3952 = vmatmul.f32.vlgmr.msrb.gmra.mxu1 %v3545_v18  ;;  %3964 = vmatmul.f32.vlgmr.msra.gmra.mxu2 %v3613_v19  ;;  %v3579_v12 = vmul.f32 %v6299_v13, %v3443_v4  ;;  %v2661_v18 = vperm.slane %v6172_v34, 5  ;;  %v3754_v19 = vld [vmem:[%s6069_s15 + $0x2d0] sm:$0xff]  ;;  %v3765_v4 = vld [vmem:[%s6069_s15 + $0x328] sm:$0xff]  ;;  %v3783_v28 = vld [vmem:[%s6069_s15 + $0x3b8] sm:$0xff] }
 0x1e3   : > { %v3192_v32 = vsel %vm6304_vm8, %v6258_v54, %v3188_v23  ;;  %4126 = vmatpush.msra.mxu2 %v3759_v20  ;;  %v3173_v54 = vadd.f32 %v6267_v58, %v3172_v39  ;;  %4240 = vmatpush.msrb.mxu1 %v3807_v53  ;;  %v3805_v20 = vld [vmem:[%s6069_s15 + $0x468] sm:$0xff]  ;;  %v3786_v53 = vld [vmem:[%s6069_s15 + $0x3d0] sm:$0xff] }
 0x1e4   : > { %v3197_v33 = vsel %vm3194_vm9, %v3196_v17, %v3192_v32  ;;  %4840 = vrcp.f32 %v6315_v27  ;;  %vm3219_vm14 = vweird.f32 %v6315_v27  ;;  %v3225_v17 = vand.u32 2147483648, %v6315_v27  ;;  %4170 = vmatpush.msra.mxu3 %v3769_v16  ;;  %4206 = vmatpush.msra.mxu0 %v3787_v36  ;;  %v3766_v34 = vld [vmem:[%s6069_s15 + $0x330] sm:$0xff]  ;;  %v3749_v16 = vld [vmem:[%s6069_s15 + $0x2a8] sm:$0xff] }
 0x1e5   : > { %v6328_v38 = vperm.slane %v3197_v33, 0  ;;  %4127 = vmatpush.msra.mxu2 %v3758_v29  ;;  %v3177_v6 = vsel %vm6363_vm12, %v6267_v58, %v3173_v54  ;;  %4241 = vmatpush.msrb.mxu1 %v3806_v63  ;;  %v3647_v58 = vmul.f32 %v6299_v13, %v3511_v5  ;;  %v3223_v22 = vand.u32 2147483647, %v6315_v27  ;;  %v3750_v5 = vld [vmem:[%s6069_s15 + $0x2b0] sm:$0xff] }
 0x1e6   : > { %v4839_v42 = vpop.eup %4838  ;;  %v3182_v14 = vsel %vm6373_vm13, %v3181_v31, %v3177_v6  ;;  %v3226_v41 = vor.u32 1.1754944e-38, %v3225_v17  ;;  %v2864_v44 = vadd.f32 %v2863_v24, %v2661_v18  ;;  %4171 = vmatpush.msra.mxu3 %v3768_v26  ;;  %4207 = vmatpush.msra.mxu0 %v3786_v53  ;;  %v3801_v6 = vld [vmem:[%s6069_s15 + $0x448] sm:$0xff]  ;;  %v3784_v17 = vld [vmem:[%s6069_s15 + $0x3c0] sm:$0xff]  ;;  %v3762_v32 = vld [vmem:[%s6069_s15 + $0x310] sm:$0xff] }
 0x1e7   : > { %v6341_v45 = vadd.f32 1.0, %v4839_v42  ;;  %v3547_v46 = vmul.f32 %v6328_v38, %v3411_v35  ;;  %4128 = vmatpush.msra.mxu2 %v3757_v37  ;;  %v3564_v8 = vmul.f32 %v6328_v38, %v3428_v55  ;;  %v6409_v30 = vperm.slane %v3182_v14, 0  ;;  %v3804_v35 = vld [vmem:[%s6069_s15 + $0x460] sm:$0xff]  ;;  %4242 = vmatpush.msrb.mxu1 %v3805_v20  ;;  %v3460_v42 = vld [vmem:[%s7590_s3 + $0x198] sm:$0xff]  ;;  %v3427_v14 = vld [vmem:[%s7590_s3 + $0x90] sm:$0xff] }
 0x1e8   : > { %vm6441_vm3 = vcmp.eq.f32.partialorder %v3223_v22, 8.507059e+37  ;;  %4172 = vmatpush.msra.mxu3 %v3767_v49  ;;  %v4765_v31 = vmul.f32 -1.442695, %v2864_v44  ;;  %4208 = vmatpush.msra.mxu0 %v3785_v2  ;;  %v3429_v26 = vld [vmem:[%s7590_s3 + $0xa0] sm:$0xff]  ;;  %v3798_v44 = vld [vmem:[%s6069_s15 + $0x430] sm:$0xff] }
 0x1e9   : > { %4842 = vrcp.f32 %v6341_v45  ;;  %4028 = vmatmul.f32.vlgmr.msrb.gmra.mxu3 %v3547_v46  ;;  %4129 = vmatpush.msra.mxu2 %v3756_v52  ;;  %v3210_v33 = vand.u32 2147483648, %v6341_v45  ;;  %vm3204_vm1 = vweird.f32 %v6341_v45  ;;  %v3208_v39 = vand.u32 2147483647, %v6341_v45  ;;  %v3803_v46 = vld [vmem:[%s6069_s15 + $0x458] sm:$0xff]  ;;  %v3447_v2 = vld [vmem:[%s7590_s3 + $0x130] sm:$0xff] }
 0x1ea   : > { %v6357_v60 = vpop.eup %4840  ;;  %3955 = vmatmul.f32.gmra.mxu1 %v3562_v50  ;;  %3967 = vmatmul.f32.gmra.mxu2 %v3630_v51  ;;  %4844 = vpow2.f32 %v4766_v56  ;;  %v3751_v52 = vld [vmem:[%s6069_s15 + $0x2b8] sm:$0xff] }
 0x1eb   : > { %v3215_v0 = vmul.f32 %v6357_v60, %v6315_v27  ;;  %4130 = vmatpush.msra.mxu2 %v3755_v62  ;;  %vm3220_vm15 = vweird.f32 %v6357_v60  ;;  %v3445_v27 = vld [vmem:[%s7590_s3 + $0x120] sm:$0xff]  ;;  %4243 = vmatpush.msrb.mxu1 %v3804_v35  ;;  %v3211_v55 = vor.u32 1.1754944e-38, %v3210_v33  ;;  %vm3209_vm5 = vcmp.eq.f32.partialorder %v3208_v39, 8.507059e+37  ;;  %v6468_v62 = vld [vmem:[%s7589_s2 + $0x8] sm:$0xff]  ;;  %v3799_v33 = vld [vmem:[%s6069_s15 + $0x438] sm:$0xff] }
 0x1ec   : > { %vm6415_vm0 = vmor %vm3219_vm14, %vm3220_vm15  ;;  %v3581_v56 = vmul.f32 %v6328_v38, %v3445_v27  ;;  %4173 = vmatpush.msra.mxu3 %v3766_v34  ;;  %4209 = vmatpush.msra.mxu0 %v3784_v17  ;;  %v3782_v35 = vld [vmem:[%s6069_s15 + $0x3b0] sm:$0xff]  ;;  %v3747_v39 = vld [vmem:[%s6069_s15 + $0x298] sm:$0xff] }
 0x1ed   : > { %v3216_v7 = vsub.f32 1.0, %v3215_v0  ;;  %4131 = vmatpush.msra.mxu2 %v3754_v19  ;;  %4244 = vmatpush.msrb.mxu1 %v3803_v46  ;;  %v3781_v46 = vld [vmem:[%s6069_s15 + $0x3a8] sm:$0xff]  ;;  %v3795_v17 = vld [vmem:[%s6069_s15 + $0x418] sm:$0xff] }
 0x1ee   : > { %4174 = vmatpush.msra.mxu3 %v3765_v4  ;;  %4210 = vmatpush.msra.mxu0 %v3783_v28  ;;  %v3796_v4 = vld [vmem:[%s6069_s15 + $0x420] sm:$0xff] }
 0x1ef   : > { %v6388_v10 = vpop.eup %4842  ;;  %v3217_v11 = vmul.f32 %v6357_v60, %v3216_v7  ;;  %4132 = vmatpush.msra.mxu2 %v3753_v25  ;;  %4245 = vmatpush.msrb.mxu1 %v3802_v1  ;;  %v3763_v25 = vld [vmem:[%s6069_s15 + $0x318] sm:$0xff]  ;;  %v3461_v1 = vld [vmem:[%s7590_s3 + $0x1a0] sm:$0xff] }
 0x1f0   : > { %v3200_v15 = vmul.f32 %v6388_v10, %v6341_v45  ;;  %v4845_v29 = vpop.eup %4844  ;;  %vm3205_vm2 = vweird.f32 %v6388_v10  ;;  %v3596_v45 = vmul.f32 %v6299_v13, %v3460_v42  ;;  %v3412_v13 = vld [vmem:[%s7590_s3 + $0x18] sm:$0xff]  ;;  %4211 = vmatpush.msra.mxu0 %v3782_v35 }
 0x1f1   : > { %4031 = vmatmul.f32.gmra.mxu3 %v3564_v8  ;;  %v3218_v21 = vadd.f32 %v6357_v60, %v3217_v11  ;;  %v6446_v51 = vadd.f32 1.0, %v4845_v29  ;;  %vm6454_vm4 = vmor %vm3204_vm1, %vm3205_vm2  ;;  %4133 = vmatpush.msra.mxu2 %v3752_v40  ;;  %v2903_v61 = vpop.f32.mrf.mxu3  ;;  %v2664_v8 = vperm.slane %v6468_v62, 0  ;;  %v3462_v11 = vld [vmem:[%s7590_s3 + $0x1a8] sm:$0xff]  ;;  %v3748_v29 = vld [vmem:[%s6069_s15 + $0x2a0] sm:$0xff] }
 0x1f2   : > { %v3201_v23 = vsub.f32 1.0, %v3200_v15  ;;  %3958 = vmatmul.f32.gmra.mxu1 %v3579_v12  ;;  %3970 = vmatmul.f32.gmra.mxu2 %v3647_v58  ;;  %v2904_v7 = vadd.f32 %v2903_v61, %v2663_v57  ;;  %v2923_v12 = vpop.f32.mrf.mxu0  ;;  %v3764_v58 = vld [vmem:[%s6069_s15 + $0x320] sm:$0xff]  ;;  %v3598_v18 = vmul.f32 %v6328_v38, %v3462_v11  ;;  %v3479_v40 = vld [vmem:[%s7590_s3 + $0x230] sm:$0xff]  ;;  %v3444_v42 = vld [vmem:[%s7590_s3 + $0x118] sm:$0xff] }
 0x1f3   : > { %v3222_v47 = vsel %vm6415_vm0, %v6357_v60, %v3218_v21  ;;  %v3546_v60 = vmul.f32 %v6409_v30, %v3410_v43  ;;  %4134 = vmatpush.msra.mxu2 %v3751_v52  ;;  %4846 = vrcp.f32 %v6446_v51  ;;  %v3413_v15 = vld [vmem:[%s7590_s3 + $0x20] sm:$0xff]  ;;  %4246 = vmatpush.msrb.mxu1 %v3801_v6  ;;  %v2924_v20 = vadd.f32 %v2923_v12, %v2664_v8  ;;  %v3430_v43 = vld [vmem:[%s7590_s3 + $0xa8] sm:$0xff] }
 0x1f4   : > { %v3202_v37 = vmul.f32 %v6388_v10, %v3201_v23  ;;  %v3227_v63 = vsel %vm6441_vm3, %v3226_v41, %v3222_v47  ;;  %4848 = vpow2.f32 %v4765_v31  ;;  %v4767_v19 = vmul.f32 -1.442695, %v2904_v7  ;;  %4175 = vmatpush.msra.mxu3 %v3764_v58  ;;  %v3800_v21 = vld [vmem:[%s6069_s15 + $0x440] sm:$0xff]  ;;  %v3761_v41 = vld [vmem:[%s6069_s15 + $0x308] sm:$0xff]  ;;  %v3746_v47 = vld [vmem:[%s6069_s15 + $0x290] sm:$0xff]  ;;  %4212 = vmatpush.msra.mxu0 %v3781_v46 }
 0x1f5   : > { %v6485_v9 = vperm.slane %v3227_v63, 0  ;;  %4135 = vmatpush.msra.mxu2 %v3750_v5  ;;  %v3563_v23 = vmul.f32 %v6409_v30, %v3427_v14  ;;  %4247 = vmatpush.msrb.mxu1 %v3800_v21  ;;  %v3615_v52 = vmul.f32 %v6328_v38, %v3479_v40  ;;  %v3580_v53 = vmul.f32 %v6409_v30, %v3444_v42  ;;  %v3446_v57 = vld [vmem:[%s7590_s3 + $0x128] sm:$0xff]  ;;  %v3779_v5 = vld [vmem:[%s6069_s15 + $0x398] sm:$0xff]  ;;  %v3744_v6 = vld [vmem:[%s6069_s15 + $0x280] sm:$0xff] }
 0x1f6   : > { %v3203_v50 = vadd.f32 %v6388_v10, %v3202_v37  ;;  %4850 = vpow2.f32 %v4767_v19  ;;  %v4768_v37 = vmul.f32 -1.442695, %v2924_v20  ;;  %4176 = vmatpush.msra.mxu3 %v3763_v25  ;;  %vm3249_vm6 = vweird.f32 %v6446_v51  ;;  %v3777_v19 = vld [vmem:[%s6069_s15 + $0x388] sm:$0xff]  ;;  %v3823_v20 = vld [vmem:[%s6069_s15 + $0x4f8] sm:$0xff]  ;;  %v3792_v46 = vld [vmem:[%s6069_s15 + $0x400] sm:$0xff] }
 0x1f7   : > { %4136 = vmatpush.msra.mxu2 %v3749_v16  ;;  %v3549_v24 = vmul.f32 %v6485_v9, %v3413_v15  ;;  %4248 = vmatpush.msrb.mxu1 %v3799_v33  ;;  %v3566_v54 = vmul.f32 %v6485_v9, %v3430_v43  ;;  %v3255_v31 = vand.u32 2147483648, %v6446_v51  ;;  %v3253_v8 = vand.u32 2147483647, %v6446_v51  ;;  %v3463_v15 = vld [vmem:[%s7590_s3 + $0x1b0] sm:$0xff]  ;;  %v3839_v25 = vld [vmem:[%s6069_s15 + $0x578] sm:$0xff]  ;;  %v3497_v11 = vld [vmem:[%s7590_s3 + $0x2c0] sm:$0xff] }
 0x1f8   : > { %v3207_v59 = vsel %vm6454_vm4, %v6388_v10, %v3203_v50  ;;  %4177 = vmatpush.msra.mxu3 %v3762_v32  ;;  %4852 = vpow2.f32 %v4768_v37  ;;  %v3597_v58 = vmul.f32 %v6409_v30, %v3461_v1  ;;  %v3583_v14 = vmul.f32 %v6485_v9, %v3447_v2  ;;  %v3778_v16 = vld [vmem:[%s6069_s15 + $0x390] sm:$0xff]  ;;  %v3478_v32 = vld [vmem:[%s7590_s3 + $0x228] sm:$0xff]  ;;  %v3464_v33 = vld [vmem:[%s7590_s3 + $0x1b8] sm:$0xff] }
 0x1f9   : > { %v3212_v0 = vsel %vm3209_vm5, %v3211_v55, %v3207_v59  ;;  %4034 = vmatmul.f32.gmra.mxu3 %v3581_v56  ;;  %v6502_v22 = vpop.eup %4846  ;;  %4137 = vmatpush.msra.mxu2 %v3748_v29  ;;  %v3760_v55 = vld [vmem:[%s6069_s15 + $0x300] sm:$0xff]  ;;  %v3797_v59 = vld [vmem:[%s6069_s15 + $0x428] sm:$0xff]  ;;  %vm6588_vm9 = vcmp.eq.f32.partialorder %v3253_v8, 8.507059e+37  ;;  %v3822_v37 = vld [vmem:[%s6069_s15 + $0x4f0] sm:$0xff]  ;;  %v3614_v40 = vmul.f32 %v6409_v30, %v3478_v32 }
 0x1fa   : > { %v6478_v3 = vperm.slane %v3212_v0, 0  ;;  %3961 = vmatmul.f32.gmra.mxu1 %v3596_v45  ;;  %3990 = vmatmul.f32.vlgmr.msrb.gmra.mxu2 %v3546_v60  ;;  %v3245_v36 = vmul.f32 %v6502_v22, %v6446_v51  ;;  %v4849_v27 = vpop.eup %4848  ;;  %v3745_v45 = vld [vmem:[%s6069_s15 + $0x288] sm:$0xff]  ;;  %v3780_v60 = vld [vmem:[%s6069_s15 + $0x3a0] sm:$0xff]  ;;  %v3496_v0 = vld [vmem:[%s7590_s3 + $0x2b8] sm:$0xff]  ;;  %vm3250_vm7 = vweird.f32 %v6502_v22 }
 0x1fb   : > { %4138 = vmatpush.msra.mxu2 %v3747_v39  ;;  %v6532_v50 = vadd.f32 1.0, %v4849_v27  ;;  %4178 = vmatpush.msra.mxu3 %v3761_v41  ;;  %vm6567_vm8 = vmor %vm3249_vm6, %vm3250_vm7  ;;  %v3776_v29 = vld [vmem:[%s6069_s15 + $0x380] sm:$0xff]  ;;  %v3793_v39 = vld [vmem:[%s6069_s15 + $0x408] sm:$0xff]  ;;  %v3600_v41 = vmul.f32 %v6485_v9, %v3464_v33 }
 0x1fc   : > { %v3548_v10 = vmul.f32 %v6478_v3, %v3412_v13  ;;  %v3565_v49 = vmul.f32 %v6478_v3, %v3429_v26  ;;  %v3246_v48 = vsub.f32 1.0, %v3245_v36  ;;  %4249 = vmatpush.msrb.mxu1 %v3798_v44  ;;  %v4851_v56 = vpop.eup %4850  ;;  %v3582_v63 = vmul.f32 %v6478_v3, %v3446_v57  ;;  %4213 = vmatpush.msra.mxu0 %v3780_v60  ;;  %v3480_v42 = vld [vmem:[%s7590_s3 + $0x238] sm:$0xff]  ;;  %v3836_v2 = vld [vmem:[%s6069_s15 + $0x560] sm:$0xff] }
 0x1fd   : > { %4139 = vmatpush.msra.mxu2 %v3746_v47  ;;  %4854 = vrcp.f32 %v6532_v50  ;;  %4179 = vmatpush.msra.mxu3 %v3760_v55  ;;  %v6546_v34 = vadd.f32 1.0, %v4851_v56  ;;  %v3599_v28 = vmul.f32 %v6478_v3, %v3463_v15  ;;  %v3821_v47 = vld [vmem:[%s6069_s15 + $0x4e8] sm:$0xff]  ;;  %v2666_v55 = vperm.slane %v6468_v62, 2  ;;  %v3871_v1 = vld [vmem:[%s6069_s15 + $0x678] sm:$0xff] }
 0x1fe   : > { %4066 = vmatmul.f32.vlgmr.msrb.gmra.mxu0 %v3548_v10  ;;  %v3247_v61 = vmul.f32 %v6502_v22, %v3246_v48  ;;  %4250 = vmatpush.msrb.mxu1 %v3797_v59  ;;  %v4853_v13 = vpop.eup %4852  ;;  %v3632_v10 = vmul.f32 %v6328_v38, %v3496_v0  ;;  %vm3234_vm10 = vweird.f32 %v6532_v50  ;;  %v3616_v57 = vmul.f32 %v6478_v3, %v3480_v42  ;;  %v2963_v59 = vpop.f32.mrf.mxu2  ;;  %v3481_v0 = vld [vmem:[%s7590_s3 + $0x240] sm:$0xff]  ;;  %v3819_v15 = vld [vmem:[%s6069_s15 + $0x4d8] sm:$0xff] }
 0x1ff   : > { %4140 = vmatpush.msra.mxu2 %v3745_v45  ;;  %4214 = vmatpush.msra.mxu0 %v3779_v5  ;;  %4856 = vrcp.f32 %v6546_v34  ;;  %v6572_v12 = vadd.f32 1.0, %v4853_v13  ;;  %v3820_v13 = vld [vmem:[%s6069_s15 + $0x4e0] sm:$0xff]  ;;  %vm3264_vm14 = vweird.f32 %v6546_v34  ;;  %v3268_v33 = vand.u32 2147483647, %v6546_v34 }
 0x200   : > { %v3248_v7 = vadd.f32 %v6502_v22, %v3247_v61  ;;  %4251 = vmatpush.msrb.mxu1 %v3796_v4  ;;  %4316 = vmatpush.msrb.mxu3 %v3839_v25  ;;  %v2964_v4 = vadd.f32 %v2963_v59, %v2666_v55  ;;  %v3852_v42 = vld [vmem:[%s6069_s15 + $0x5e0] sm:$0xff]  ;;  %v3851_v59 = vld [vmem:[%s6069_s15 + $0x5d8] sm:$0xff] }
 0x201   : > { %4037 = vmatmul.f32.gmra.mxu3 %v3598_v18  ;;  %4141 = vmatpush.msra.mxu2 %v3744_v6  ;;  %v3256_v18 = vor.u32 1.1754944e-38, %v3255_v31  ;;  %4858 = vrcp.f32 %v6572_v12  ;;  %v3238_v31 = vand.u32 2147483647, %v6532_v50  ;;  %vm3279_vm1 = vweird.f32 %v6572_v12 }
 0x202   : > { %3993 = vmatmul.f32.gmra.mxu2 %v3563_v23  ;;  %4104 = vmatmul.f32.vlgmr.msra.gmra.mxu1 %v3549_v24  ;;  %v3252_v21 = vsel %vm6567_vm8, %v6502_v22, %v3248_v7  ;;  %v3794_v24 = vld [vmem:[%s6069_s15 + $0x410] sm:$0xff]  ;;  %v3513_v22 = vld [vmem:[%s7590_s3 + $0x340] sm:$0xff]  ;;  %v3240_v7 = vand.u32 2147483648, %v6532_v50  ;;  %vm6722_vm3 = vcmp.eq.f32.partialorder %v3268_v33, 8.507059e+37  ;;  %v3283_v55 = vand.u32 2147483647, %v6572_v12 }
 0x203   : > { %v6576_v51 = vpop.eup %4854  ;;  %4215 = vmatpush.msra.mxu0 %v3778_v16  ;;  %4252 = vmatpush.msrb.mxu1 %v3795_v17  ;;  %v3257_v36 = vsel %vm6588_vm9, %v3256_v18, %v3252_v21  ;;  %v3649_v27 = vmul.f32 %v6328_v38, %v3513_v22  ;;  %v3838_v38 = vld [vmem:[%s6069_s15 + $0x570] sm:$0xff]  ;;  %v3835_v17 = vld [vmem:[%s6069_s15 + $0x558] sm:$0xff]  ;;  %vm6676_vm13 = vcmp.eq.f32.partialorder %v3238_v31, 8.507059e+37  ;;  %v4770_v21 = vmul.f32 -1.442695, %v2964_v4 }
 0x204   : > { %v3230_v26 = vmul.f32 %v6576_v51, %v6532_v50  ;;  %4278 = vmatpush.msrb.mxu2 %v3823_v20  ;;  %v6620_v43 = vperm.slane %v3257_v36, 0  ;;  %4317 = vmatpush.msrb.mxu3 %v3838_v38  ;;  %vm3235_vm11 = vweird.f32 %v6576_v51  ;;  %v3854_v16 = vld [vmem:[%s6069_s15 + $0x5f0] sm:$0xff]  ;;  %v3432_v50 = vld [vmem:[%s7590_s3 + $0xb8] sm:$0xff]  ;;  %v3633_v22 = vmul.f32 %v6478_v3, %v3497_v11 }
 0x205   : > { %4216 = vmatpush.msra.mxu0 %v3777_v19  ;;  %4253 = vmatpush.msrb.mxu1 %v3794_v24  ;;  %v6608_v35 = vpop.eup %4856  ;;  %vm6657_vm12 = vmor %vm3234_vm10, %vm3235_vm11  ;;  %v3870_v18 = vld [vmem:[%s6069_s15 + $0x670] sm:$0xff]  ;;  %v3853_v19 = vld [vmem:[%s6069_s15 + $0x5e8] sm:$0xff]  ;;  %4860 = vpow2.f32 %v4770_v21  ;;  %v3285_v38 = vand.u32 2147483648, %v6572_v12  ;;  %v2665_v31 = vperm.slane %v6468_v62, 1  ;;  %vm3284_vm5 = vcmp.eq.f32.partialorder %v3283_v55, 8.507059e+37 }
 0x206   : > { %4069 = vmatmul.f32.gmra.mxu0 %v3565_v49  ;;  %4279 = vmatpush.msrb.mxu2 %v3822_v37  ;;  %v3231_v49 = vsub.f32 1.0, %v3230_v26  ;;  %v3260_v44 = vmul.f32 %v6608_v35, %v6546_v34  ;;  %vm3265_vm15 = vweird.f32 %v6608_v35  ;;  %v3834_v23 = vld [vmem:[%s6069_s15 + $0x550] sm:$0xff]  ;;  %v3241_v26 = vor.u32 1.1754944e-38, %v3240_v7  ;;  %v3498_v37 = vld [vmem:[%s7590_s3 + $0x2c8] sm:$0xff]  ;;  %v3811_v55 = vld [vmem:[%s6069_s15 + $0x498] sm:$0xff] }
 0x207   : > { %4217 = vmatpush.msra.mxu0 %v3776_v29  ;;  %4254 = vmatpush.msrb.mxu1 %v3793_v39  ;;  %v6627_v48 = vpop.eup %4858  ;;  %v3818_v24 = vld [vmem:[%s6069_s15 + $0x4d0] sm:$0xff]  ;;  %v3512_v29 = vld [vmem:[%s7590_s3 + $0x338] sm:$0xff]  ;;  %v3568_v36 = vmul.f32 %v6620_v43, %v3432_v50  ;;  %vm6703_vm0 = vmor %vm3264_vm14, %vm3265_vm15 }
 0x208   : > { %v3232_v56 = vmul.f32 %v6576_v51, %v3231_v49  ;;  %4280 = vmatpush.msrb.mxu2 %v3821_v47  ;;  %v3261_v45 = vsub.f32 1.0, %v3260_v44  ;;  %v3275_v60 = vmul.f32 %v6627_v48, %v6572_v12  ;;  %vm3280_vm2 = vweird.f32 %v6627_v48  ;;  %v3869_v49 = vld [vmem:[%s6069_s15 + $0x668] sm:$0xff]  ;;  %v3832_v47 = vld [vmem:[%s6069_s15 + $0x540] sm:$0xff]  ;;  %v3867_v12 = vld [vmem:[%s6069_s15 + $0x658] sm:$0xff]  ;;  %v3003_v33 = vpop.f32.mrf.mxu0 }
 0x209   : > { %4040 = vmatmul.f32.gmra.mxu3 %v3615_v52  ;;  %v3415_v52 = vld [vmem:[%s7590_s3 + $0x30] sm:$0xff]  ;;  %4255 = vmatpush.msrb.mxu1 %v3792_v46  ;;  %v3634_v46 = vmul.f32 %v6485_v9, %v3498_v37  ;;  %vm6731_vm4 = vmor %vm3279_vm1, %vm3280_vm2  ;;  %v2983_v50 = vpop.f32.mrf.mxu3  ;;  %v3865_v37 = vld [vmem:[%s6069_s15 + $0x648] sm:$0xff] }
 0x20a   : > { %3996 = vmatmul.f32.gmra.mxu2 %v3580_v53  ;;  %4107 = vmatmul.f32.gmra.mxu1 %v3566_v54  ;;  %v3837_v53 = vld [vmem:[%s6069_s15 + $0x568] sm:$0xff]  ;;  %v3855_v54 = vld [vmem:[%s6069_s15 + $0x5f8] sm:$0xff]  ;;  %v3551_v61 = vmul.f32 %v6620_v43, %v3415_v52  ;;  %v3233_v5 = vadd.f32 %v6576_v51, %v3232_v56  ;;  %v3868_v56 = vld [vmem:[%s6069_s15 + $0x660] sm:$0xff] }
 0x20b   : > { %4354 = vmatpush.msrb.mxu0 %v3855_v54  ;;  %4318 = vmatpush.msrb.mxu3 %v3837_v53  ;;  %v3830_v4 = vld [vmem:[%s6069_s15 + $0x530] sm:$0xff]  ;;  %v3813_v39 = vld [vmem:[%s6069_s15 + $0x4a8] sm:$0xff]  ;;  %v3863_v54 = vld [vmem:[%s6069_s15 + $0x638] sm:$0xff] }
 0x20c   : > { %4281 = vmatpush.msrb.mxu2 %v3820_v13  ;;  %4392 = vmatpush.msra.mxu1 %v3871_v1  ;;  %v3237_v25 = vsel %vm6657_vm12, %v6576_v51, %v3233_v5  ;;  %v3449_v1 = vld [vmem:[%s7590_s3 + $0x140] sm:$0xff]  ;;  %v4861_v5 = vpop.eup %4860 }
 0x20d   : > { %4319 = vmatpush.msrb.mxu3 %v3836_v2  ;;  %4355 = vmatpush.msrb.mxu0 %v3854_v16  ;;  %v3414_v2 = vld [vmem:[%s7590_s3 + $0x28] sm:$0xff]  ;;  %v2667_v16 = vperm.slane %v6468_v62, 3 }
 0x20e   : > { %4072 = vmatmul.f32.gmra.mxu0 %v3582_v63  ;;  %v3495_v63 = vld [vmem:[%s7590_s3 + $0x2b0] sm:$0xff]  ;;  %4282 = vmatpush.msrb.mxu2 %v3819_v15 }
 0x20f   : > { %v3631_v8 = vmul.f32 %v6409_v30, %v3495_v63  ;;  %4320 = vmatpush.msrb.mxu3 %v3835_v17  ;;  %4393 = vmatpush.msra.mxu1 %v3870_v18  ;;  %v3829_v17 = vld [vmem:[%s6069_s15 + $0x528] sm:$0xff]  ;;  %v3815_v18 = vld [vmem:[%s6069_s15 + $0x4b8] sm:$0xff] }
 0x210   : > { %4356 = vmatpush.msrb.mxu0 %v3853_v19  ;;  %4283 = vmatpush.msrb.mxu2 %v3818_v24  ;;  %v3850_v19 = vld [vmem:[%s6069_s15 + $0x5d0] sm:$0xff] }
 0x211   : > { %4043 = vmatmul.f32.gmra.mxu3 %v3632_v10  ;;  %v3617_v10 = vmul.f32 %v6485_v9, %v3481_v0  ;;  %4394 = vmatpush.msra.mxu1 %v3869_v49  ;;  %v3286_v0 = vor.u32 1.1754944e-38, %v3285_v38  ;;  %v3864_v38 = vld [vmem:[%s6069_s15 + $0x640] sm:$0xff] }
 0x212   : > { %3999 = vmatmul.f32.gmra.mxu2 %v3597_v58  ;;  %4110 = vmatmul.f32.gmra.mxu1 %v3583_v14  ;;  %v3262_v58 = vmul.f32 %v6608_v35, %v3261_v45  ;;  %v3276_v14 = vsub.f32 1.0, %v3275_v60  ;;  %v3816_v45 = vld [vmem:[%s6069_s15 + $0x4c0] sm:$0xff] }
 0x213   : > { %4321 = vmatpush.msrb.mxu3 %v3834_v23  ;;  %4357 = vmatpush.msrb.mxu0 %v3852_v42  ;;  %v3431_v23 = vld [vmem:[%s7590_s3 + $0xb0] sm:$0xff] }
 0x214   : > { %v3263_v32 = vadd.f32 %v6608_v35, %v3262_v58  ;;  %v3277_v51 = vmul.f32 %v6627_v48, %v3276_v14  ;;  %4395 = vmatpush.msra.mxu1 %v3868_v56  ;;  %v3416_v14 = vld [vmem:[%s7590_s3 + $0x38] sm:$0xff]  ;;  %v3483_v56 = vld [vmem:[%s7590_s3 + $0x250] sm:$0xff] }
 0x215   : > { %4358 = vmatpush.msrb.mxu0 %v3851_v59  ;;  %v3824_v59 = vld [vmem:[%s6069_s15 + $0x500] sm:$0xff] }
 0x216   : > { %4075 = vmatmul.f32.gmra.mxu0 %v3599_v28  ;;  %v3270_v28 = vand.u32 2147483648, %v6546_v34  ;;  %v3242_v34 = vsel %vm6676_vm13, %v3241_v26, %v3237_v25  ;;  %v3278_v53 = vadd.f32 %v6627_v48, %v3277_v51  ;;  %4396 = vmatpush.msra.mxu1 %v3867_v12  ;;  %v3466_v25 = vld [vmem:[%s7590_s3 + $0x1c8] sm:$0xff]  ;;  %v2984_v26 = vadd.f32 %v2983_v50, %v2667_v16  ;;  %v3448_v12 = vld [vmem:[%s7590_s3 + $0x138] sm:$0xff]  ;;  %v3451_v50 = vld [vmem:[%s7590_s3 + $0x150] sm:$0xff] }
 0x217   : > { %v6743_v60 = vperm.slane %v3242_v34, 0  ;;  %4359 = vmatpush.msrb.mxu0 %v3850_v19  ;;  %v3849_v51 = vld [vmem:[%s6069_s15 + $0x5c8] sm:$0xff] }
 0x218   : > { %v3271_v44 = vor.u32 1.1754944e-38, %v3270_v28  ;;  %v3282_v6 = vsel %vm6731_vm4, %v6627_v48, %v3278_v53  ;;  %v6768_v48 = vadd.f32 1.0, %v4861_v5  ;;  %v2668_v28 = vperm.slane %v6468_v62, 4  ;;  %v3825_v53 = vld [vmem:[%s6069_s15 + $0x508] sm:$0xff] }
 0x219   : > { %4046 = vmatmul.f32.gmra.mxu3 %v3649_v27  ;;  %v3833_v27 = vld [vmem:[%s6069_s15 + $0x548] sm:$0xff]  ;;  %v3550_v11 = vmul.f32 %v6743_v60, %v3414_v2  ;;  %v3287_v58 = vsel %vm3284_vm5, %v3286_v0, %v3282_v6  ;;  %v3567_v49 = vmul.f32 %v6743_v60, %v3431_v23  ;;  %4360 = vmatpush.msrb.mxu0 %v3849_v51  ;;  %v4771_v42 = vmul.f32 -1.442695, %v2984_v26  ;;  %v3467_v51 = vld [vmem:[%s7590_s3 + $0x1d0] sm:$0xff] }
 0x21a   : > { %4002 = vmatmul.f32.gmra.mxu2 %v3614_v40  ;;  %4113 = vmatmul.f32.gmra.mxu1 %v3600_v41  ;;  %v3648_v40 = vmul.f32 %v6409_v30, %v3512_v29  ;;  %v3817_v41 = vld [vmem:[%s6069_s15 + $0x4c8] sm:$0xff]  ;;  %v3267_v30 = vsel %vm6703_vm0, %v6608_v35, %v3263_v32  ;;  %v6778_v20 = vperm.slane %v3287_v58, 0  ;;  %4862 = vrcp.f32 %v6768_v48  ;;  %v3827_v29 = vld [vmem:[%s6069_s15 + $0x518] sm:$0xff]  ;;  %v3417_v32 = vld [vmem:[%s7590_s3 + $0x40] sm:$0xff] }
 0x21b   : > { %4322 = vmatpush.msrb.mxu3 %v3833_v27  ;;  %4284 = vmatpush.msrb.mxu2 %v3817_v41  ;;  %v3514_v35 = vld [vmem:[%s7590_s3 + $0x348] sm:$0xff]  ;;  %v3272_v63 = vsel %vm6722_vm3, %v3271_v44, %v3267_v30  ;;  %v3602_v27 = vmul.f32 %v6620_v43, %v3466_v25  ;;  %v3004_v34 = vadd.f32 %v3003_v33, %v2668_v28  ;;  %v3826_v44 = vld [vmem:[%s6069_s15 + $0x510] sm:$0xff]  ;;  %v3812_v30 = vld [vmem:[%s6069_s15 + $0x4a0] sm:$0xff]  ;;  %vm3309_vm6 = vweird.f32 %v6768_v48 }
 0x21c   : > { %v3650_v13 = vmul.f32 %v6478_v3, %v3514_v35  ;;  %v2943_v3 = vpop.f32.mrf.mxu1  ;;  %v6763_v7 = vperm.slane %v3272_v63, 0  ;;  %v3553_v41 = vmul.f32 %v6778_v20, %v3417_v32  ;;  %v3434_v63 = vld [vmem:[%s7590_s3 + $0xc8] sm:$0xff]  ;;  %v3315_v25 = vand.u32 2147483648, %v6768_v48 }
 0x21d   : > { %4323 = vmatpush.msrb.mxu3 %v3832_v47  ;;  %4285 = vmatpush.msrb.mxu2 %v3816_v45  ;;  %v2944_v15 = vadd.f32 %v2943_v3, %v2665_v31  ;;  %v3847_v47 = vld [vmem:[%s6069_s15 + $0x5b8] sm:$0xff]  ;;  %v3846_v45 = vld [vmem:[%s6069_s15 + $0x5b0] sm:$0xff]  ;;  %v3845_v2 = vld [vmem:[%s6069_s15 + $0x5a8] sm:$0xff]  ;;  %v3570_v5 = vmul.f32 %v6778_v20, %v3434_v63  ;;  %v3587_v28 = vmul.f32 %v6778_v20, %v3451_v50  ;;  %v3313_v32 = vand.u32 2147483647, %v6768_v48 }
 0x21e   : > { %4078 = vmatmul.f32.gmra.mxu0 %v3616_v57  ;;  %v3831_v57 = vld [vmem:[%s6069_s15 + $0x538] sm:$0xff]  ;;  %v3552_v21 = vmul.f32 %v6763_v7, %v3416_v14  ;;  %v3810_v31 = vld [vmem:[%s6069_s15 + $0x490] sm:$0xff]  ;;  %v3809_v19 = vld [vmem:[%s6069_s15 + $0x488] sm:$0xff] }
 0x21f   : > { %4324 = vmatpush.msrb.mxu3 %v3831_v57  ;;  %4286 = vmatpush.msrb.mxu2 %v3815_v18  ;;  %v4769_v24 = vmul.f32 -1.442695, %v2944_v15  ;;  %v4772_v57 = vmul.f32 -1.442695, %v3004_v34  ;;  %v3500_v14 = vld [vmem:[%s7590_s3 + $0x2d8] sm:$0xff]  ;;  %vm3314_vm9 = vcmp.eq.f32.partialorder %v3313_v32, 8.507059e+37 }
 0x220   : > { %v6809_v52 = vpop.eup %4862  ;;  %v3636_v23 = vmul.f32 %v6620_v43, %v3500_v14  ;;  %v3885_v63 = vld [vmem:[%s6069_s15 + $0x6e8] sm:$0xff] }
 0x221   : > { %4180 = vmatmul.f32.vlgmr.msra.gmra.mxu3 %v3551_v61  ;;  %v3515_v61 = vld [vmem:[%s7590_s3 + $0x350] sm:$0xff]  ;;  %4864 = vpow2.f32 %v4769_v24  ;;  %vm3310_vm7 = vweird.f32 %v6809_v52  ;;  %v3843_v24 = vld [vmem:[%s6069_s15 + $0x598] sm:$0xff] }
 0x222   : > { %4005 = vmatmul.f32.gmra.mxu2 %v3631_v8  ;;  %4116 = vmatmul.f32.gmra.mxu1 %v3617_v10  ;;  %v3585_v8 = vmul.f32 %v6620_v43, %v3449_v1  ;;  %v3651_v10 = vmul.f32 %v6485_v9, %v3515_v61  ;;  %v3828_v9 = vld [vmem:[%s6069_s15 + $0x520] sm:$0xff]  ;;  %4866 = vpow2.f32 %v4771_v42  ;;  %v3305_v61 = vmul.f32 %v6809_v52, %v6768_v48  ;;  %vm6879_vm8 = vmor %vm3309_vm6, %vm3310_vm7 }
 0x223   : > { %4325 = vmatpush.msrb.mxu3 %v3830_v4  ;;  %v3619_v1 = vmul.f32 %v6620_v43, %v3483_v56  ;;  %v3584_v4 = vmul.f32 %v6743_v60, %v3448_v12  ;;  %4868 = vpow2.f32 %v4772_v57  ;;  %v3603_v42 = vmul.f32 %v6763_v7, %v3467_v51  ;;  %v3517_v48 = vld [vmem:[%s7590_s3 + $0x360] sm:$0xff]  ;;  %v3903_v56 = vld [vmem:[%s6069_s15 + $0x778] sm:$0xff]  ;;  %v3886_v57 = vld [vmem:[%s6069_s15 + $0x6f0] sm:$0xff] }
 0x224   : > { %v3306_v6 = vsub.f32 1.0, %v3305_v61  ;;  %v3902_v12 = vld [vmem:[%s6069_s15 + $0x770] sm:$0xff]  ;;  %v6943_v50 = vpop.f32.mrf.mxu1 }
 0x225   : > { %4326 = vmatpush.msrb.mxu3 %v3829_v17  ;;  %v3465_v17 = vld [vmem:[%s7590_s3 + $0x1c0] sm:$0xff] }
 0x226   : > { %4081 = vmatmul.f32.gmra.mxu0 %v3633_v22  ;;  %v3866_v22 = vld [vmem:[%s6069_s15 + $0x650] sm:$0xff]  ;;  %v3307_v15 = vmul.f32 %v6809_v52, %v3306_v6  ;;  %v3601_v26 = vmul.f32 %v6743_v60, %v3465_v17  ;;  %v3901_v6 = vld [vmem:[%s6069_s15 + $0x768] sm:$0xff]  ;;  %v3935_v17 = vld [vmem:[%s6069_s15 + $0x878] sm:$0xff] }
 0x227   : > { %4327 = vmatpush.msrb.mxu3 %v3828_v9  ;;  %4397 = vmatpush.msra.mxu1 %v3866_v22  ;;  %v4865_v0 = vpop.eup %4864  ;;  %v3844_v9 = vld [vmem:[%s6069_s15 + $0x5a0] sm:$0xff] }
 0x228   : > { %v6834_v3 = vadd.f32 1.0, %v4865_v0  ;;  %v3808_v22 = vld [vmem:[%s6069_s15 + $0x480] sm:$0xff] }
 0x229   : > { %4183 = vmatmul.f32.gmra.mxu3 %v3568_v36  ;;  %v3814_v36 = vld [vmem:[%s6069_s15 + $0x4b0] sm:$0xff]  ;;  %4398 = vmatpush.msra.mxu1 %v3865_v37  ;;  %v3859_v37 = vld [vmem:[%s6069_s15 + $0x618] sm:$0xff] }
 0x22a   : > { %4008 = vmatmul.f32.gmra.mxu2 %v3648_v40  ;;  %4119 = vmatmul.f32.gmra.mxu1 %v3634_v46  ;;  %v3848_v40 = vld [vmem:[%s6069_s15 + $0x5c0] sm:$0xff]  ;;  %4870 = vrcp.f32 %v6834_v3  ;;  %vm3294_vm10 = vweird.f32 %v6834_v3 }
 0x22b   : > { %4287 = vmatpush.msrb.mxu2 %v3814_v36  ;;  %4328 = vmatpush.msrb.mxu3 %v3827_v29  ;;  %v3433_v46 = vld [vmem:[%s7590_s3 + $0xc0] sm:$0xff]  ;;  %v3308_v29 = vadd.f32 %v6809_v52, %v3307_v15  ;;  %v3842_v36 = vld [vmem:[%s6069_s15 + $0x590] sm:$0xff] }
 0x22c   : > { %4361 = vmatpush.msrb.mxu0 %v3848_v40  ;;  %4399 = vmatpush.msra.mxu1 %v3864_v38  ;;  %v3569_v35 = vmul.f32 %v6763_v7, %v3433_v46  ;;  %v3468_v38 = vld [vmem:[%s7590_s3 + $0x1d8] sm:$0xff]  ;;  %v3884_v15 = vld [vmem:[%s6069_s15 + $0x6e0] sm:$0xff] }
 0x22d   : > { %4288 = vmatpush.msrb.mxu2 %v3813_v39  ;;  %4329 = vmatpush.msrb.mxu3 %v3826_v44  ;;  %v3312_v34 = vsel %vm6879_vm8, %v6809_v52, %v3308_v29  ;;  %v3482_v44 = vld [vmem:[%s7590_s3 + $0x248] sm:$0xff]  ;;  %v3840_v52 = vld [vmem:[%s6069_s15 + $0x580] sm:$0xff] }
 0x22e   : > { %4084 = vmatmul.f32.gmra.mxu0 %v3650_v13  ;;  %4400 = vmatpush.msra.mxu1 %v3863_v54  ;;  %v3862_v13 = vld [vmem:[%s6069_s15 + $0x630] sm:$0xff]  ;;  %v3618_v54 = vmul.f32 %v6743_v60, %v3482_v44 }
 0x22f   : > { %4362 = vmatpush.msrb.mxu0 %v3847_v47  ;;  %4289 = vmatpush.msrb.mxu2 %v3812_v30  ;;  %v3653_v30 = vmul.f32 %v6620_v43, %v3517_v48  ;;  %v3857_v43 = vld [vmem:[%s6069_s15 + $0x608] sm:$0xff]  ;;  %v3882_v48 = vld [vmem:[%s6069_s15 + $0x6d0] sm:$0xff] }
 0x230   : > { %4330 = vmatpush.msrb.mxu3 %v3825_v53  ;;  %4401 = vmatpush.msra.mxu1 %v3862_v13 }
 0x231   : > { %4186 = vmatmul.f32.gmra.mxu3 %v3585_v8  ;;  %4290 = vmatpush.msrb.mxu2 %v3811_v55  ;;  %v3450_v8 = vld [vmem:[%s7590_s3 + $0x148] sm:$0xff]  ;;  %v3604_v55 = vmul.f32 %v6778_v20, %v3468_v38 }
 0x232   : > { %4122 = vmatmul.f32.gmra.mxu1 %v3651_v10  ;;  %4142 = vmatmul.f32.vlgmr.msra.gmra.mxu2 %v3550_v11  ;;  %v3861_v10 = vld [vmem:[%s6069_s15 + $0x628] sm:$0xff]  ;;  %v4867_v11 = vpop.eup %4866  ;;  %v3586_v58 = vmul.f32 %v6763_v7, %v3450_v8  ;;  %v3919_v8 = vld [vmem:[%s6069_s15 + $0x7f8] sm:$0xff] }
 0x233   : > { %4331 = vmatpush.msrb.mxu3 %v3824_v59  ;;  %4363 = vmatpush.msrb.mxu0 %v3846_v45  ;;  %v6846_v16 = vadd.f32 1.0, %v4867_v11  ;;  %v4869_v18 = vpop.eup %4868  ;;  %v3484_v59 = vld [vmem:[%s7590_s3 + $0x258] sm:$0xff] }
 0x234   : > { %4291 = vmatpush.msrb.mxu2 %v3810_v31  ;;  %4402 = vmatpush.msra.mxu1 %v3861_v10  ;;  %v6868_v33 = vadd.f32 1.0, %v4869_v18  ;;  %v6885_v40 = vpop.eup %4870  ;;  %v3043_v31 = vpop.f32.mrf.mxu2  ;;  %v3499_v10 = vld [vmem:[%s7590_s3 + $0x2d0] sm:$0xff] }
 0x235   : > { %4364 = vmatpush.msrb.mxu0 %v3845_v2  ;;  %4872 = vrcp.f32 %v6846_v16  ;;  %v3290_v46 = vmul.f32 %v6885_v40, %v6834_v3  ;;  %4468 = vmatpush.msra.mxu3 %v3903_v56  ;;  %v3856_v2 = vld [vmem:[%s6069_s15 + $0x600] sm:$0xff]  ;;  %vm3295_vm11 = vweird.f32 %v6885_v40  ;;  %vm3324_vm13 = vweird.f32 %v6846_v16 }
 0x236   : > { %4218 = vmatmul.f32.vlgmr.msra.gmra.mxu0 %v3552_v21  ;;  %v3860_v21 = vld [vmem:[%s6069_s15 + $0x620] sm:$0xff]  ;;  %4292 = vmatpush.msrb.mxu2 %v3809_v19  ;;  %4874 = vrcp.f32 %v6868_v33  ;;  %vm6965_vm12 = vmor %vm3294_vm10, %vm3295_vm11  ;;  %v3330_v38 = vand.u32 2147483648, %v6846_v16  ;;  %vm3339_vm1 = vweird.f32 %v6868_v33 }
 0x237   : > { %4365 = vmatpush.msrb.mxu0 %v3844_v9  ;;  %4403 = vmatpush.msra.mxu1 %v3860_v21  ;;  %v3291_v45 = vsub.f32 1.0, %v3290_v46  ;;  %v3635_v9 = vmul.f32 %v6743_v60, %v3499_v10  ;;  %v3516_v46 = vld [vmem:[%s7590_s3 + $0x358] sm:$0xff]  ;;  %v3453_v10 = vld [vmem:[%s7590_s3 + $0x160] sm:$0xff] }
 0x238   : > { %4293 = vmatpush.msrb.mxu2 %v3808_v22  ;;  %4469 = vmatpush.msra.mxu3 %v3902_v12  ;;  %v3918_v22 = vld [vmem:[%s6069_s15 + $0x7f0] sm:$0xff]  ;;  %v3345_v12 = vand.u32 2147483648, %v6868_v33 }
 0x239   : > { %4189 = vmatmul.f32.gmra.mxu3 %v3602_v27  ;;  %4366 = vmatpush.msrb.mxu0 %v3843_v24  ;;  %v3841_v27 = vld [vmem:[%s6069_s15 + $0x588] sm:$0xff]  ;;  %v3292_v11 = vmul.f32 %v6885_v40, %v3291_v45  ;;  %v3298_v24 = vand.u32 2147483647, %v6834_v3 }
 0x23a   : > { %4145 = vmatmul.f32.gmra.mxu2 %v3567_v49  ;;  %4256 = vmatmul.f32.vlgmr.msrb.gmra.mxu1 %v3553_v41  ;;  %v3887_v49 = vld [vmem:[%s6069_s15 + $0x6f8] sm:$0xff]  ;;  %v3316_v41 = vor.u32 1.1754944e-38, %v3315_v25  ;;  %v3300_v25 = vand.u32 2147483648, %v6834_v3  ;;  %v3898_v3 = vld [vmem:[%s6069_s15 + $0x750] sm:$0xff] }
 0x23b   : > { %4367 = vmatpush.msrb.mxu0 %v3842_v36  ;;  %4404 = vmatpush.msra.mxu1 %v3859_v37  ;;  %v6903_v47 = vpop.eup %4872  ;;  %v3293_v29 = vadd.f32 %v6885_v40, %v3292_v11  ;;  %v3899_v36 = vld [vmem:[%s6069_s15 + $0x758] sm:$0xff]  ;;  %vm6979_vm15 = vcmp.eq.f32.partialorder %v3298_v24, 8.507059e+37 }
 0x23c   : > { %4430 = vmatpush.msra.mxu2 %v3887_v49  ;;  %v3317_v53 = vsel %vm3314_vm9, %v3316_v41, %v3312_v34  ;;  %v3320_v61 = vmul.f32 %v6903_v47, %v6846_v16  ;;  %v6920_v0 = vpop.eup %4874  ;;  %4470 = vmatpush.msra.mxu3 %v3901_v6  ;;  %v3934_v49 = vld [vmem:[%s6069_s15 + $0x870] sm:$0xff]  ;;  %vm3325_vm14 = vweird.f32 %v6903_v47  ;;  %v3301_v44 = vor.u32 1.1754944e-38, %v3300_v25  ;;  %v4892_v6 = vld [vmem:[%s7589_s2 + $0x8] sm:$0xff] }
 0x23d   : > { %4368 = vmatpush.msrb.mxu0 %v3841_v27  ;;  %v6922_v13 = vperm.slane %v3317_v53, 0  ;;  %v3335_v14 = vmul.f32 %v6920_v0, %v6868_v33  ;;  %v3436_v27 = vld [vmem:[%s7590_s3 + $0xd8] sm:$0xff]  ;;  %vm7000_vm0 = vmor %vm3324_vm13, %vm3325_vm14  ;;  %vm3340_vm2 = vweird.f32 %v6920_v0  ;;  %v2671_v37 = vperm.slane %v4892_v6, 7  ;;  %v3470_v34 = vld [vmem:[%s7590_s3 + $0x1e8] sm:$0xff] }
 0x23e   : > { %4221 = vmatmul.f32.gmra.mxu0 %v3569_v35  ;;  %v3858_v35 = vld [vmem:[%s6069_s15 + $0x610] sm:$0xff]  ;;  %4431 = vmatpush.msra.mxu2 %v3886_v57  ;;  %v3652_v57 = vmul.f32 %v6743_v60, %v3516_v46  ;;  %vm7033_vm4 = vmor %vm3339_vm1, %vm3340_vm2 }
 0x23f   : > { %4369 = vmatpush.msrb.mxu0 %v3840_v52  ;;  %4405 = vmatpush.msra.mxu1 %v3858_v35  ;;  %v3336_v51 = vsub.f32 1.0, %v3335_v14  ;;  %v3297_v52 = vsel %vm6965_vm12, %v6885_v40, %v3293_v29  ;;  %v3572_v40 = vmul.f32 %v6922_v13, %v3436_v27  ;;  %v3916_v14 = vld [vmem:[%s6069_s15 + $0x7e0] sm:$0xff]  ;;  %v3894_v27 = vld [vmem:[%s6069_s15 + $0x730] sm:$0xff]  ;;  %v3083_v35 = vpop.f32.mrf.mxu0 }
 0x240   : > { %4432 = vmatpush.msra.mxu2 %v3885_v63  ;;  %v3302_v45 = vsel %vm6979_vm15, %v3301_v44, %v3297_v52  ;;  %v3518_v63 = vld [vmem:[%s7590_s3 + $0x368] sm:$0xff]  ;;  %v3435_v44 = vld [vmem:[%s7590_s3 + $0xd0] sm:$0xff] }
 0x241   : > { %4192 = vmatmul.f32.gmra.mxu3 %v3619_v1  ;;  %v2670_v1 = vperm.slane %v6468_v62, 6  ;;  %4406 = vmatpush.msra.mxu1 %v3857_v43  ;;  %v3485_v62 = vld [vmem:[%s7590_s3 + $0x260] sm:$0xff]  ;;  %v3933_v43 = vld [vmem:[%s6069_s15 + $0x868] sm:$0xff]  ;;  %v3654_v11 = vmul.f32 %v6763_v7, %v3518_v63  ;;  %v3910_v25 = vld [vmem:[%s6069_s15 + $0x7b0] sm:$0xff] }
 0x242   : > { %4148 = vmatmul.f32.gmra.mxu2 %v3584_v4  ;;  %4259 = vmatmul.f32.gmra.mxu1 %v3570_v5  ;;  %v3620_v4 = vmul.f32 %v6763_v7, %v3484_v59  ;;  %v3419_v5 = vld [vmem:[%s7590_s3 + $0x50] sm:$0xff]  ;;  %v3621_v21 = vmul.f32 %v6778_v20, %v3485_v62 }
 0x243   : > { %4407 = vmatpush.msra.mxu1 %v3856_v2  ;;  %v3044_v18 = vadd.f32 %v3043_v31, %v2670_v1  ;;  %v3555_v19 = vmul.f32 %v6922_v13, %v3419_v5  ;;  %4506 = vmatpush.msra.mxu0 %v3919_v8  ;;  %v3343_v31 = vand.u32 2147483647, %v6868_v33  ;;  %v3896_v5 = vld [vmem:[%s6069_s15 + $0x740] sm:$0xff]  ;;  %v2669_v8 = vperm.slane %v4892_v6, 5  ;;  %v3519_v62 = vld [vmem:[%s7590_s3 + $0x370] sm:$0xff]  ;;  %v3891_v1 = vld [vmem:[%s6069_s15 + $0x718] sm:$0xff] }
 0x244   : > { %4433 = vmatpush.msra.mxu2 %v3884_v15  ;;  %v7046_v33 = vperm.slane %v3302_v45, 0  ;;  %v3895_v15 = vld [vmem:[%s6069_s15 + $0x738] sm:$0xff]  ;;  %v3606_v45 = vmul.f32 %v6922_v13, %v3470_v34  ;;  %v3487_v6 = vld [vmem:[%s7590_s3 + $0x270] sm:$0xff]  ;;  %v3909_v34 = vld [vmem:[%s6069_s15 + $0x7a8] sm:$0xff] }
 0x245   : > { %4544 = vmatpush.msrb.mxu1 %v3935_v17  ;;  %v4774_v39 = vmul.f32 -1.442695, %v3044_v18  ;;  %4507 = vmatpush.msra.mxu0 %v3918_v22  ;;  %vm7064_vm5 = vcmp.eq.f32.partialorder %v3343_v31, 8.507059e+37  ;;  %v3024_v22 = vadd.f32 %v6943_v50, %v2669_v8  ;;  %v3879_v50 = vld [vmem:[%s6069_s15 + $0x6b8] sm:$0xff]  ;;  %v3912_v31 = vld [vmem:[%s6069_s15 + $0x7c0] sm:$0xff] }
 0x246   : > { %4224 = vmatmul.f32.gmra.mxu0 %v3586_v58  ;;  %v3321_v58 = vsub.f32 1.0, %v3320_v61  ;;  %v3331_v61 = vor.u32 1.1754944e-38, %v3330_v38  ;;  %v3571_v63 = vmul.f32 %v7046_v33, %v3435_v44  ;;  %v3452_v8 = vld [vmem:[%s7590_s3 + $0x158] sm:$0xff]  ;;  %v3874_v44 = vld [vmem:[%s6069_s15 + $0x690] sm:$0xff] }
 0x247   : > { %4545 = vmatpush.msrb.mxu1 %v3934_v49  ;;  %4876 = vpow2.f32 %v4774_v39 }
 0x248   : > { %v3322_v32 = vmul.f32 %v6903_v47, %v3321_v58  ;;  %v3881_v58 = vld [vmem:[%s6069_s15 + $0x6c8] sm:$0xff] }
 0x249   : > { %4195 = vmatmul.f32.gmra.mxu3 %v3636_v23  ;;  %v3900_v23 = vld [vmem:[%s6069_s15 + $0x760] sm:$0xff]  ;;  %4546 = vmatpush.msrb.mxu1 %v3933_v43 }
 0x24a   : > { %4151 = vmatmul.f32.gmra.mxu2 %v3601_v26  ;;  %4262 = vmatmul.f32.gmra.mxu1 %v3587_v28  ;;  %v3501_v26 = vld [vmem:[%s7590_s3 + $0x2e0] sm:$0xff]  ;;  %v3883_v28 = vld [vmem:[%s6069_s15 + $0x6d8] sm:$0xff]  ;;  %v3323_v53 = vadd.f32 %v6903_v47, %v3322_v32  ;;  %v3589_v32 = vmul.f32 %v6922_v13, %v3453_v10  ;;  %v3889_v10 = vld [vmem:[%s6069_s15 + $0x708] sm:$0xff] }
 0x24b   : > { %4471 = vmatpush.msra.mxu3 %v3900_v23  ;;  %4434 = vmatpush.msra.mxu2 %v3883_v28  ;;  %v3637_v41 = vmul.f32 %v6763_v7, %v3501_v26  ;;  %v3932_v23 = vld [vmem:[%s6069_s15 + $0x860] sm:$0xff]  ;;  %v3915_v26 = vld [vmem:[%s6069_s15 + $0x7d8] sm:$0xff] }
 0x24c   : > { %v3327_v60 = vsel %vm7000_vm0, %v6903_v47, %v3323_v53  ;;  %v3880_v7 = vld [vmem:[%s6069_s15 + $0x6c0] sm:$0xff]  ;;  %4547 = vmatpush.msrb.mxu1 %v3932_v23  ;;  %v3931_v28 = vld [vmem:[%s6069_s15 + $0x858] sm:$0xff]  ;;  %v3890_v47 = vld [vmem:[%s6069_s15 + $0x710] sm:$0xff] }
 0x24d   : > { %4472 = vmatpush.msra.mxu3 %v3899_v36  ;;  %4435 = vmatpush.msra.mxu2 %v3882_v48  ;;  %v4877_v17 = vpop.eup %4876  ;;  %v4823_v48 = vld [vmem:[%s7589_s2 + $0x10] ss:$0 sm:$0xff]  ;;  %v3892_v53 = vld [vmem:[%s6069_s15 + $0x720] sm:$0xff]  ;;  %v3438_v23 = vld [vmem:[%s7590_s3 + $0xe8] sm:$0xff] }
 0x24e   : > { %4227 = vmatmul.f32.gmra.mxu0 %v3603_v42  ;;  %v3917_v42 = vld [vmem:[%s6069_s15 + $0x7e8] sm:$0xff]  ;;  %v7077_v36 = vadd.f32 1.0, %v4877_v17  ;;  %4548 = vmatpush.msrb.mxu1 %v3931_v28  ;;  %v3876_v17 = vld [vmem:[%s6069_s15 + $0x6a0] sm:$0xff]  ;;  %v3623_v28 = vmul.f32 %v6922_v13, %v3487_v6 }
 0x24f   : > { %4473 = vmatpush.msra.mxu3 %v3898_v3  ;;  %4508 = vmatpush.msra.mxu0 %v3917_v42  ;;  %v3893_v3 = vld [vmem:[%s6069_s15 + $0x728] sm:$0xff]  ;;  %v4773_v42 = vmul.f32 -1.442695, %v3024_v22  ;;  %v3588_v22 = vmul.f32 %v7046_v33, %v3452_v8 }
 0x250   : > { %4436 = vmatpush.msra.mxu2 %v3881_v58  ;;  %4878 = vrcp.f32 %v7077_v36  ;;  %vm3369_vm6 = vweird.f32 %v7077_v36 }
 0x251   : > { %4198 = vmatmul.f32.gmra.mxu3 %v3653_v30  ;;  %v3502_v30 = vld [vmem:[%s7590_s3 + $0x2e8] sm:$0xff]  ;;  %4509 = vmatpush.msra.mxu0 %v3916_v14  ;;  %4880 = vpow2.f32 %v4773_v42  ;;  %v3928_v14 = vld [vmem:[%s6069_s15 + $0x840] sm:$0xff] }
 0x252   : > { %4154 = vmatmul.f32.gmra.mxu2 %v3618_v54  ;;  %4265 = vmatmul.f32.gmra.mxu1 %v3604_v55  ;;  %v3328_v54 = vand.u32 2147483647, %v6846_v16  ;;  %v3337_v55 = vmul.f32 %v6920_v0, %v3336_v51  ;;  %v3638_v59 = vmul.f32 %v6778_v20, %v3502_v30  ;;  %v3897_v16 = vld [vmem:[%s6069_s15 + $0x748] sm:$0xff]  ;;  %v3655_v51 = vmul.f32 %v6778_v20, %v3519_v62  ;;  %v3420_v20 = vld [vmem:[%s7590_s3 + $0x58] sm:$0xff] }
 0x253   : > { %4474 = vmatpush.msra.mxu3 %v3897_v16  ;;  %4437 = vmatpush.msra.mxu2 %v3880_v7  ;;  %v3929_v16 = vld [vmem:[%s6069_s15 + $0x848] sm:$0xff]  ;;  %v3927_v7 = vld [vmem:[%s6069_s15 + $0x838] sm:$0xff] }
 0x254   : > { %vm7022_vm3 = vcmp.eq.f32.partialorder %v3328_v54, 8.507059e+37  ;;  %v3338_v2 = vadd.f32 %v6920_v0, %v3337_v55  ;;  %4510 = vmatpush.msra.mxu0 %v3915_v26  ;;  %v3930_v54 = vld [vmem:[%s6069_s15 + $0x850] sm:$0xff]  ;;  %v3913_v55 = vld [vmem:[%s6069_s15 + $0x7c8] sm:$0xff] }
 0x255   : > { %v3332_v18 = vsel %vm7022_vm3, %v3331_v61, %v3327_v60  ;;  %4475 = vmatpush.msra.mxu3 %v3896_v5  ;;  %4438 = vmatpush.msra.mxu2 %v3879_v50  ;;  %v3454_v50 = vld [vmem:[%s7590_s3 + $0x168] sm:$0xff] }
 0x256   : > { %4230 = vmatmul.f32.gmra.mxu0 %v3620_v4  ;;  %v3063_v4 = vpop.f32.mrf.mxu3  ;;  %v3342_v24 = vsel %vm7033_vm4, %v6920_v0, %v3338_v2  ;;  %v7075_v0 = vperm.slane %v3332_v18, 0  ;;  %4549 = vmatpush.msrb.mxu1 %v3930_v54  ;;  %v3877_v2 = vld [vmem:[%s6069_s15 + $0x6a8] sm:$0xff]  ;;  %v7125_v5 = vpop.eup %4878 }
 0x257   : > { %4476 = vmatpush.msra.mxu3 %v3895_v15  ;;  %v3064_v46 = vadd.f32 %v3063_v4, %v2671_v37  ;;  %v3437_v4 = vld [vmem:[%s7590_s3 + $0xe0] sm:$0xff]  ;;  %v3911_v15 = vld [vmem:[%s6069_s15 + $0x7b8] sm:$0xff]  ;;  %v4881_v18 = vpop.eup %4880  ;;  %v3926_v37 = vld [vmem:[%s6069_s15 + $0x830] sm:$0xff]  ;;  %vm3370_vm7 = vweird.f32 %v7125_v5 }
 0x258   : > { %v3556_v52 = vmul.f32 %v7075_v0, %v3420_v20  ;;  %4550 = vmatpush.msrb.mxu1 %v3929_v16  ;;  %v3573_v58 = vmul.f32 %v7075_v0, %v3437_v4  ;;  %v3373_v4 = vand.u32 2147483647, %v7077_v36  ;;  %vm7206_vm8 = vmor %vm3369_vm6, %vm3370_vm7 }
 0x259   : > { %4332 = vmatmul.f32.vlgmr.msrb.gmra.mxu3 %v3555_v19  ;;  %v3346_v19 = vor.u32 1.1754944e-38, %v3345_v12  ;;  %v4775_v61 = vmul.f32 -1.442695, %v3064_v46  ;;  %v3084_v12 = vadd.f32 %v4823_v48, %v3083_v35  ;;  %v3590_v48 = vmul.f32 %v7075_v0, %v3454_v50  ;;  %v3925_v46 = vld [vmem:[%s6069_s15 + $0x828] sm:$0xff] }
 0x25a   : > { %4157 = vmatmul.f32.gmra.mxu2 %v3635_v9  ;;  %4268 = vmatmul.f32.gmra.mxu1 %v3621_v21  ;;  %v3418_v21 = vld [vmem:[%s7590_s3 + $0x48] sm:$0xff]  ;;  %vm7227_vm9 = vcmp.eq.f32.partialorder %v3373_v4, 8.507059e+37 }
 0x25b   : > { %v3554_v39 = vmul.f32 %v7046_v33, %v3418_v21  ;;  %v3347_v49 = vsel %vm7064_vm5, %v3346_v19, %v3342_v24  ;;  %4477 = vmatpush.msra.mxu3 %v3894_v27  ;;  %4882 = vpow2.f32 %v4775_v61  ;;  %v4776_v62 = vmul.f32 -1.442695, %v3084_v12  ;;  %4551 = vmatpush.msrb.mxu1 %v3928_v14  ;;  %v3875_v24 = vld [vmem:[%s6069_s15 + $0x698] sm:$0xff]  ;;  %v3873_v35 = vld [vmem:[%s6069_s15 + $0x688] sm:$0xff]  ;;  %v3906_v14 = vld [vmem:[%s6069_s15 + $0x790] sm:$0xff] }
 0x25c   : > { %v7098_v38 = vperm.slane %v3347_v49, 0  ;;  %v3365_v19 = vmul.f32 %v7125_v5, %v7077_v36  ;;  %v3375_v12 = vand.u32 2147483648, %v7077_v36 }
 0x25d   : > { %4478 = vmatpush.msra.mxu3 %v3893_v3  ;;  %4884 = vpow2.f32 %v4776_v62  ;;  %4552 = vmatpush.msrb.mxu1 %v3927_v7  ;;  %v3469_v3 = vld [vmem:[%s7590_s3 + $0x1e0] sm:$0xff]  ;;  %v3905_v7 = vld [vmem:[%s6069_s15 + $0x788] sm:$0xff] }
 0x25e   : > { %4233 = vmatmul.f32.gmra.mxu0 %v3637_v41  ;;  %v3914_v41 = vld [vmem:[%s6069_s15 + $0x7d0] sm:$0xff]  ;;  %v3366_v27 = vsub.f32 1.0, %v3365_v19  ;;  %v3872_v19 = vld [vmem:[%s6069_s15 + $0x680] sm:$0xff] }
 0x25f   : > { %v7004_v56 = vpop.f32.mrf.mxu1  ;;  %4511 = vmatpush.msra.mxu0 %v3914_v41  ;;  %4479 = vmatpush.msra.mxu3 %v3892_v53  ;;  %v3504_v41 = vld [vmem:[%s7590_s3 + $0x2f8] sm:$0xff] }
 0x260   : > { %4553 = vmatpush.msrb.mxu1 %v3926_v37  ;;  %v3640_v61 = vmul.f32 %v6922_v13, %v3504_v41 }
 0x261   : > { %4335 = vmatmul.f32.gmra.mxu3 %v3572_v40  ;;  %4512 = vmatpush.msra.mxu0 %v3913_v55  ;;  %v4883_v49 = vpop.eup %4882  ;;  %v3455_v55 = vld [vmem:[%s7590_s3 + $0x170] sm:$0xff] }
 0x262   : > { %4160 = vmatmul.f32.gmra.mxu2 %v3652_v57  ;;  %4271 = vmatmul.f32.gmra.mxu1 %v3638_v59  ;;  %v3421_v57 = vld [vmem:[%s7590_s3 + $0x60] sm:$0xff]  ;;  %v3878_v59 = vld [vmem:[%s6069_s15 + $0x6b0] sm:$0xff]  ;;  %v7177_v53 = vadd.f32 1.0, %v4883_v49 }
 0x263   : > { %4439 = vmatpush.msra.mxu2 %v3878_v59  ;;  %v3557_v60 = vmul.f32 %v7098_v38, %v3421_v57  ;;  %4480 = vmatpush.msra.mxu3 %v3891_v1  ;;  %v3908_v57 = vld [vmem:[%s6069_s15 + $0x7a0] sm:$0xff]  ;;  %v4885_v59 = vpop.eup %4884  ;;  %v3591_v1 = vmul.f32 %v7098_v38, %v3455_v55 }
 0x264   : > { %4513 = vmatpush.msra.mxu0 %v3912_v31  ;;  %4554 = vmatpush.msrb.mxu1 %v3925_v46  ;;  %vm3384_vm13 = vweird.f32 %v7177_v53 }
 0x265   : > { %v7054_v9 = vpop.f32.mrf.mxu2  ;;  %4440 = vmatpush.msra.mxu2 %v3877_v2  ;;  %4481 = vmatpush.msra.mxu3 %v3890_v47  ;;  %v3907_v2 = vld [vmem:[%s6069_s15 + $0x798] sm:$0xff]  ;;  %v7197_v47 = vadd.f32 1.0, %v4885_v59 }
 0x266   : > { %4236 = vmatmul.f32.gmra.mxu0 %v3654_v11 }
 0x267   : > { %v7071_v29 = vpop.f32.mrf.mxu1  ;;  %4441 = vmatpush.msra.mxu2 %v3876_v17  ;;  %4482 = vmatpush.msra.mxu3 %v3889_v10  ;;  %vm3399_vm1 = vweird.f32 %v7197_v47 }
 0x268   : > { %4514 = vmatpush.msra.mxu0 %v3911_v15  ;;  %v3376_v15 = vor.u32 1.1754944e-38, %v3375_v12  ;;  %v3503_v12 = vld [vmem:[%s7590_s3 + $0x2f0] sm:$0xff] }
 0x269   : > { %4338 = vmatmul.f32.gmra.mxu3 %v3589_v32  ;;  %v3574_v32 = vmul.f32 %v7098_v38, %v3438_v23  ;;  %4442 = vmatpush.msra.mxu2 %v3875_v24  ;;  %v3923_v23 = vld [vmem:[%s6069_s15 + $0x818] sm:$0xff]  ;;  %v3639_v6 = vmul.f32 %v7046_v33, %v3503_v12 }
 0x26a   : > { %4274 = vmatmul.f32.gmra.mxu1 %v3655_v51  ;;  %4294 = vmatmul.f32.vlgmr.msrb.gmra.mxu2 %v3554_v39  ;;  %v3888_v51 = vld [vmem:[%s6069_s15 + $0x700] sm:$0xff]  ;;  %v7158_v39 = vadd.f32 1.0, %v4881_v18 }
 0x26b   : > { %4515 = vmatpush.msra.mxu0 %v3910_v25  ;;  %4483 = vmatpush.msra.mxu3 %v3888_v51  ;;  %v3922_v51 = vld [vmem:[%s6069_s15 + $0x810] sm:$0xff] }
 0x26c   : > { %v7101_v30 = vpop.f32.mrf.mxu3  ;;  %4886 = vrcp.f32 %v7158_v39  ;;  %4443 = vmatpush.msra.mxu2 %v3874_v44  ;;  %vm3354_vm10 = vweird.f32 %v7158_v39 }
 0x26d   : > { %v7107_v40 = vpop.f32.mrf.mxu2  ;;  %4516 = vmatpush.msra.mxu0 %v3909_v34  ;;  %4888 = vrcp.f32 %v7177_v53 }
 0x26e   : > { %4370 = vmatmul.f32.vlgmr.msrb.gmra.mxu0 %v3556_v52  ;;  %v3367_v52 = vmul.f32 %v7125_v5, %v3366_v27  ;;  %4444 = vmatpush.msra.mxu2 %v3873_v35  ;;  %4890 = vrcp.f32 %v7197_v47  ;;  %v3904_v27 = vld [vmem:[%s6069_s15 + $0x780] sm:$0xff] }
 0x26f   : > { %v7114_v43 = vpop.f32.mrf.mxu1  ;;  %4517 = vmatpush.msra.mxu0 %v3908_v57 }
 0x270   : > { %v3368_v31 = vadd.f32 %v7125_v5, %v3367_v52  ;;  %4445 = vmatpush.msra.mxu2 %v3872_v19 }
 0x271   : > { %4341 = vmatmul.f32.gmra.mxu3 %v3606_v45  ;;  %4518 = vmatpush.msra.mxu0 %v3907_v2 }
 0x272   : > { %4297 = vmatmul.f32.gmra.mxu2 %v3571_v63  ;;  %4408 = vmatmul.f32.vlgmr.msra.gmra.mxu1 %v3557_v60  ;;  %v3605_v60 = vmul.f32 %v7046_v33, %v3469_v3  ;;  %v7210_v10 = vpop.eup %4886  ;;  %v3372_v24 = vsel %vm7206_vm8, %v7125_v5, %v3368_v31 }
 0x273   : > { %4519 = vmatpush.msra.mxu0 %v3906_v14  ;;  %v3350_v5 = vmul.f32 %v7210_v10, %v7158_v39  ;;  %v7243_v50 = vpop.eup %4888  ;;  %v3377_v41 = vsel %vm7227_vm9, %v3376_v15, %v3372_v24  ;;  %vm3355_vm11 = vweird.f32 %v7210_v10 }
 0x274   : > { %v7135_v11 = vpop.f32.mrf.mxu3  ;;  %v7257_v52 = vpop.eup %4890  ;;  %vm7295_vm12 = vmor %vm3354_vm10, %vm3355_vm11  ;;  %vm3385_vm14 = vweird.f32 %v7243_v50 }
 0x275   : > { %v7143_v21 = vpop.f32.mrf.mxu2  ;;  %4520 = vmatpush.msra.mxu0 %v3905_v7  ;;  %v3351_v44 = vsub.f32 1.0, %v3350_v5  ;;  %v3390_v5 = vand.u32 2147483648, %v7177_v53  ;;  %vm7331_vm0 = vmor %vm3384_vm13, %vm3385_vm14  ;;  %vm3400_vm2 = vweird.f32 %v7257_v52 }
 0x276   : > { %4373 = vmatmul.f32.gmra.mxu0 %v3573_v58  ;;  %v3521_v58 = vld [vmem:[%s7590_s3 + $0x380] sm:$0xff]  ;;  %vm7360_vm4 = vmor %vm3399_vm1, %vm3400_vm2 }
 0x277   : > { %v7151_v26 = vpop.f32.mrf.mxu1  ;;  %4521 = vmatpush.msra.mxu0 %v3904_v27  ;;  %v3506_v27 = vld [vmem:[%s7590_s3 + $0x308] sm:$0xff] }
 0x279   : > { %4344 = vmatmul.f32.gmra.mxu3 %v3623_v28 }
 0x27a   : > { %4300 = vmatmul.f32.gmra.mxu2 %v3588_v22  ;;  %4411 = vmatmul.f32.gmra.mxu1 %v3574_v32  ;;  %v3486_v22 = vld [vmem:[%s7590_s3 + $0x268] sm:$0xff]  ;;  %v3472_v32 = vld [vmem:[%s7590_s3 + $0x1f8] sm:$0xff] }
 0x27b   : > { %v4067_v20 = vpop.f32.mrf.mxu0  ;;  %v3608_v34 = vmul.f32 %v7098_v38, %v3472_v32 }
 0x27c   : > { %v7169_v42 = vpop.f32.mrf.mxu3 }
 0x27d   : > { %v3991_v54 = vpop.f32.mrf.mxu2 }
 0x27e   : > { %v3992_v16 = vadd.f32 %v3991_v54, %v7004_v56  ;;  %4376 = vmatmul.f32.gmra.mxu0 %v3590_v48  ;;  %v3924_v56 = vld [vmem:[%s6069_s15 + $0x820] sm:$0xff]  ;;  %v3622_v48 = vmul.f32 %v7046_v33, %v3486_v22  ;;  %v7259_v54 = vperm.slane %v3377_v41, 0 }
 0x27f   : > { %v4105_v45 = vpop.f32.mrf.mxu1  ;;  %4555 = vmatpush.msrb.mxu1 %v3924_v56  ;;  %v3395_v56 = vmul.f32 %v7257_v52, %v7197_v47 }
 0x280   : > { %v4030_v63 = vadd.f32 %v7101_v30, %v3992_v16  ;;  %v3471_v30 = vld [vmem:[%s7590_s3 + $0x1f0] sm:$0xff] }
 0x281   : > { %4347 = vmatmul.f32.gmra.mxu3 %v3640_v61  ;;  %v3607_v18 = vmul.f32 %v7075_v0, %v3471_v30  ;;  %4556 = vmatpush.msrb.mxu1 %v3923_v23  ;;  %v3423_v16 = vld [vmem:[%s7590_s3 + $0x70] sm:$0xff] }
 0x282   : > { %v4068_v8 = vadd.f32 %v4067_v20, %v4030_v63  ;;  %4303 = vmatmul.f32.gmra.mxu2 %v3605_v60  ;;  %4414 = vmatmul.f32.gmra.mxu1 %v3591_v1  ;;  %v3657_v20 = vmul.f32 %v6922_v13, %v3521_v58  ;;  %v3380_v13 = vmul.f32 %v7243_v50, %v7177_v53  ;;  %v3489_v63 = vld [vmem:[%s7590_s3 + $0x280] sm:$0xff]  ;;  %v3360_v58 = vand.u32 2147483648, %v7158_v39 }
 0x283   : > { %v4070_v62 = vpop.f32.mrf.mxu0  ;;  %4557 = vmatpush.msrb.mxu1 %v3922_v51  ;;  %v3352_v60 = vmul.f32 %v7210_v10, %v3351_v44  ;;  %v3559_v4 = vmul.f32 %v7259_v54, %v3423_v16  ;;  %v3388_v51 = vand.u32 2147483647, %v7177_v53  ;;  %v3642_v44 = vmul.f32 %v7098_v38, %v3506_v27 }
 0x284   : > { %v7216_v36 = vadd.f32 %v4105_v45, %v4068_v8  ;;  %v7218_v17 = vpop.f32.mrf.mxu3  ;;  %v3920_v45 = vld [vmem:[%s6069_s15 + $0x800] sm:$0xff]  ;;  %v3381_v1 = vsub.f32 1.0, %v3380_v13  ;;  %v3625_v8 = vmul.f32 %v7098_v38, %v3489_v63  ;;  %v3361_v32 = vor.u32 1.1754944e-38, %v3360_v58 }
 0x285   : > { %v3994_v28 = vpop.f32.mrf.mxu2  ;;  %v3353_v14 = vadd.f32 %v7210_v10, %v3352_v60  ;;  %vm7343_vm3 = vcmp.eq.f32.partialorder %v3388_v51, 8.507059e+37 }
 0x286   : > { %v3995_v37 = vadd.f32 %v3994_v28, %v7071_v29  ;;  %4379 = vmatmul.f32.gmra.mxu0 %v3607_v18  ;;  %v3488_v29 = vld [vmem:[%s7590_s3 + $0x278] sm:$0xff]  ;;  %v3382_v15 = vmul.f32 %v7243_v50, %v3381_v1  ;;  %v3396_v18 = vsub.f32 1.0, %v3395_v56  ;;  %v3457_v1 = vld [vmem:[%s7590_s3 + $0x180] sm:$0xff] }
 0x287   : > { %v4108_v49 = vpop.f32.mrf.mxu1  ;;  %v3624_v59 = vmul.f32 %v7075_v0, %v3488_v29  ;;  %v3440_v28 = vld [vmem:[%s7590_s3 + $0xf8] sm:$0xff] }
 0x288   : > { %v4033_v3 = vadd.f32 %v7135_v11, %v3995_v37  ;;  %v3921_v11 = vld [vmem:[%s6069_s15 + $0x808] sm:$0xff]  ;;  %v3397_v41 = vmul.f32 %v7257_v52, %v3396_v18  ;;  %v3576_v29 = vmul.f32 %v7259_v54, %v3440_v28  ;;  %v3439_v28 = vld [vmem:[%s7590_s3 + $0xf0] sm:$0xff] }
 0x289   : > { %4350 = vmatmul.f32.gmra.mxu3 %v3657_v20  ;;  %4558 = vmatpush.msrb.mxu1 %v3921_v11  ;;  %v3383_v20 = vadd.f32 %v7243_v50, %v3382_v15  ;;  %v3405_v11 = vand.u32 2147483648, %v7197_v47 }
 0x28a   : > { %v4071_v46 = vadd.f32 %v4070_v62, %v4033_v3  ;;  %4306 = vmatmul.f32.gmra.mxu2 %v3622_v48  ;;  %4417 = vmatmul.f32.gmra.mxu1 %v3608_v34  ;;  %v3358_v62 = vand.u32 2147483647, %v7158_v39  ;;  %v3520_v39 = vld [vmem:[%s7590_s3 + $0x378] sm:$0xff] }
 0x28b   : > { %v4073_v55 = vpop.f32.mrf.mxu0  ;;  %4559 = vmatpush.msrb.mxu1 %v3920_v45  ;;  %v3508_v45 = vld [vmem:[%s7590_s3 + $0x318] sm:$0xff] }
 0x28c   : > { %v7261_v35 = vadd.f32 %v4108_v49, %v4071_v46  ;;  %v7263_v57 = vpop.f32.mrf.mxu3  ;;  %vm7312_vm15 = vcmp.eq.f32.partialorder %v3358_v62, 8.507059e+37  ;;  %v3357_v49 = vsel %vm7295_vm12, %v7210_v10, %v3353_v14  ;;  %v3656_v10 = vmul.f32 %v7046_v33, %v3520_v39  ;;  %v3522_v33 = vld [vmem:[%s7590_s3 + $0x388] sm:$0xff]  ;;  %v3425_v39 = vld [vmem:[%s7590_s3 + $0x80] sm:$0xff] }
 0x28d   : > { %v3997_v61 = vpop.f32.mrf.mxu2  ;;  %v3362_v53 = vsel %vm7312_vm15, %v3361_v32, %v3357_v49  ;;  %v3391_v46 = vor.u32 1.1754944e-38, %v3390_v5  ;;  %v3658_v60 = vmul.f32 %v7075_v0, %v3522_v33  ;;  %v3441_v49 = vld [vmem:[%s7590_s3 + $0x100] sm:$0xff]  ;;  %v3458_v33 = vld [vmem:[%s7590_s3 + $0x188] sm:$0xff] }
 0x28e   : > { %v3998_v2 = vadd.f32 %v3997_v61, %v7114_v43  ;;  %4382 = vmatmul.f32.gmra.mxu0 %v3624_v59  ;;  %v3505_v43 = vld [vmem:[%s7590_s3 + $0x300] sm:$0xff]  ;;  %v3403_v59 = vand.u32 2147483647, %v7197_v47  ;;  %v7364_v12 = vperm.slane %v3362_v53, 0  ;;  %v3406_v47 = vor.u32 1.1754944e-38, %v3405_v11 }
 0x28f   : > { %v4111_v31 = vpop.f32.mrf.mxu1  ;;  %v3641_v25 = vmul.f32 %v7075_v0, %v3505_v43 }
 0x290   : > { %v4036_v30 = vadd.f32 %v7169_v42, %v3998_v2  ;;  %vm3404_vm5 = vcmp.eq.f32.partialorder %v3403_v59, 8.507059e+37 }
 0x291   : > { %4484 = vmatmul.f32.vlgmr.msra.gmra.mxu3 %v3559_v4  ;;  %v3422_v4 = vld [vmem:[%s7590_s3 + $0x68] sm:$0xff] }
 0x292   : > { %v4074_v19 = vadd.f32 %v4073_v55, %v4036_v30  ;;  %4309 = vmatmul.f32.gmra.mxu2 %v3639_v6  ;;  %4420 = vmatmul.f32.gmra.mxu1 %v3625_v8  ;;  %v3398_v55 = vadd.f32 %v7257_v52, %v3397_v41  ;;  %v3593_v8 = vmul.f32 %v7259_v54, %v3457_v1 }
 0x293   : > { %v4076_v23 = vpop.f32.mrf.mxu0  ;;  %v3558_v14 = vmul.f32 %v7364_v12, %v3422_v4 }
 0x294   : > { %v7301_v7 = vadd.f32 %v4111_v31, %v4074_v19  ;;  %v7303_v24 = vpop.f32.mrf.mxu3  ;;  %v3523_v31 = vld [vmem:[%s7590_s3 + $0x390] sm:$0xff]  ;;  %v3402_v0 = vsel %vm7360_vm4, %v7257_v52, %v3398_v55  ;;  %v3424_v52 = vld [vmem:[%s7590_s3 + $0x78] sm:$0xff] }
 0x295   : > { %v4000_v37 = vpop.f32.mrf.mxu2  ;;  %v3659_v43 = vmul.f32 %v7098_v38, %v3523_v31  ;;  %v3407_v15 = vsel %vm3404_vm5, %v3406_v47, %v3402_v0  ;;  %v3474_v38 = vld [vmem:[%s7590_s3 + $0x208] sm:$0xff]  ;;  %v3644_v47 = vmul.f32 %v7259_v54, %v3508_v45  ;;  %v3475_v0 = vld [vmem:[%s7590_s3 + $0x210] sm:$0xff] }
 0x296   : > { %v4001_v3 = vadd.f32 %v4000_v37, %v7151_v26  ;;  %4385 = vmatmul.f32.gmra.mxu0 %v3641_v25  ;;  %v7393_v19 = vperm.slane %v3407_v15, 0  ;;  %v3610_v51 = vmul.f32 %v7259_v54, %v3474_v38  ;;  %v3575_v37 = vmul.f32 %v7364_v12, %v3439_v28  ;;  %v3490_v15 = vld [vmem:[%s7590_s3 + $0x288] sm:$0xff]  ;;  %v3492_v28 = vld [vmem:[%s7590_s3 + $0x298] sm:$0xff] }
 0x297   : > { %v4114_v34 = vpop.f32.mrf.mxu1  ;;  %v3626_v38 = vmul.f32 %v7364_v12, %v3490_v15 }
 0x298   : > { %v4039_v26 = vadd.f32 %v7218_v17, %v4001_v3  ;;  %v3387_v17 = vsel %vm7331_vm0, %v7243_v50, %v3383_v20  ;;  %v3561_v27 = vmul.f32 %v7393_v19, %v3425_v39 }
 0x299   : > { %4487 = vmatmul.f32.gmra.mxu3 %v3576_v29  ;;  %v3392_v56 = vsel %vm7343_vm3, %v3391_v46, %v3387_v17  ;;  %v3456_v29 = vld [vmem:[%s7590_s3 + $0x178] sm:$0xff] }
 0x29a   : > { %v4077_v16 = vadd.f32 %v4076_v23, %v4039_v26  ;;  %4312 = vmatmul.f32.gmra.mxu2 %v3656_v10  ;;  %4423 = vmatmul.f32.gmra.mxu1 %v3642_v44  ;;  %v7385_v62 = vperm.slane %v3392_v56, 0  ;;  %v3442_v10 = vld [vmem:[%s7590_s3 + $0x108] sm:$0xff]  ;;  %v3592_v46 = vmul.f32 %v7364_v12, %v3456_v29 }
 0x29b   : > { %v4079_v61 = vpop.f32.mrf.mxu0  ;;  %v3578_v11 = vmul.f32 %v7393_v19, %v3442_v10 }
 0x29c   : > { %v7366_v63 = vadd.f32 %v4114_v34, %v4077_v16  ;;  %v4047_v50 = vpop.f32.mrf.mxu3  ;;  %v3577_v48 = vmul.f32 %v7385_v62, %v3441_v49  ;;  %v3594_v16 = vmul.f32 %v7385_v62, %v3458_v33 }
 0x29d   : > { %v4003_v2 = vpop.f32.mrf.mxu2 }
 0x29e   : > { %v4004_v30 = vadd.f32 %v4003_v2, %v7054_v9  ;;  %4388 = vmatmul.f32.gmra.mxu0 %v3658_v60  ;;  %v3459_v60 = vld [vmem:[%s7590_s3 + $0x190] sm:$0xff] }
 0x29f   : > { %v4117_v6 = vpop.f32.mrf.mxu1  ;;  %v3595_v4 = vmul.f32 %v7393_v19, %v3459_v60 }
 0x2a0   : > { %v4042_v58 = vadd.f32 %v7263_v57, %v4004_v30  ;;  %v3560_v57 = vmul.f32 %v7385_v62, %v3424_v52  ;;  %v3476_v52 = vld [vmem:[%s7590_s3 + $0x218] sm:$0xff] }
 0x2a1   : > { %4490 = vmatmul.f32.gmra.mxu3 %v3593_v8 }
 0x2a2   : > { %v4080_v18 = vadd.f32 %v4079_v61, %v4042_v58  ;;  %4426 = vmatmul.f32.gmra.mxu1 %v3659_v43  ;;  %4446 = vmatmul.f32.vlgmr.msra.gmra.mxu2 %v3558_v14  ;;  %v3611_v58 = vmul.f32 %v7385_v62, %v3475_v0  ;;  %v3525_v43 = vld [vmem:[%s7590_s3 + $0x3a0] sm:$0xff] }
 0x2a3   : > { %v4082_v9 = vpop.f32.mrf.mxu0 }
 0x2a4   : > { %v7395_v42 = vadd.f32 %v4117_v6, %v4080_v18  ;;  %v4181_v23 = vpop.f32.mrf.mxu3 }
 0x2a5   : > { %v4006_v25 = vpop.f32.mrf.mxu2 }
 0x2a6   : > { %v4007_v22 = vadd.f32 %v4006_v25, %v7107_v40  ;;  %4522 = vmatmul.f32.vlgmr.msra.gmra.mxu0 %v3560_v57  ;;  %v3612_v25 = vmul.f32 %v7393_v19, %v3476_v52 }
 0x2a7   : > { %v4120_v32 = vpop.f32.mrf.mxu1 }
 0x2a8   : > { %v4045_v5 = vadd.f32 %v7303_v24, %v4007_v22  ;;  %v3491_v24 = vld [vmem:[%s7590_s3 + $0x290] sm:$0xff] }
 0x2a9   : > { %4493 = vmatmul.f32.gmra.mxu3 %v3610_v51  ;;  %v3627_v53 = vmul.f32 %v7259_v54, %v3491_v24  ;;  %v3628_v51 = vmul.f32 %v7385_v62, %v3492_v28 }
 0x2aa   : > { %v4083_v20 = vadd.f32 %v4082_v9, %v4045_v5  ;;  %4449 = vmatmul.f32.gmra.mxu2 %v3575_v37  ;;  %4560 = vmatmul.f32.vlgmr.msrb.gmra.mxu1 %v3561_v27  ;;  %v3507_v5 = vld [vmem:[%s7590_s3 + $0x310] sm:$0xff]  ;;  %v3493_v37 = vld [vmem:[%s7590_s3 + $0x2a0] sm:$0xff] }
 0x2ab   : > { %v4085_v41 = vpop.f32.mrf.mxu0 }
 0x2ac   : > { %v7415_v40 = vadd.f32 %v4120_v32, %v4083_v20  ;;  %v4184_v3 = vpop.f32.mrf.mxu3 }
 0x2ad   : > { %v4009_v34 = vpop.f32.mrf.mxu2 }
 0x2ae   : > { %v4010_v26 = vadd.f32 %v4009_v34, %v7143_v21  ;;  %4525 = vmatmul.f32.gmra.mxu0 %v3577_v48  ;;  %v3509_v48 = vld [vmem:[%s7590_s3 + $0x320] sm:$0xff] }
 0x2af   : > { %v4123_v44 = vpop.f32.mrf.mxu1 }
 0x2b0   : > { %v4048_v13 = vadd.f32 %v4047_v50, %v4010_v26  ;;  %v3473_v50 = vld [vmem:[%s7590_s3 + $0x200] sm:$0xff] }
 0x2b1   : > { %4496 = vmatmul.f32.gmra.mxu3 %v3627_v53  ;;  %v3609_v31 = vmul.f32 %v7364_v12, %v3473_v50  ;;  %v3510_v53 = vld [vmem:[%s7590_s3 + $0x328] sm:$0xff] }
 0x2b2   : > { %v4086_v17 = vadd.f32 %v4085_v41, %v4048_v13  ;;  %4452 = vmatmul.f32.gmra.mxu2 %v3592_v46  ;;  %4563 = vmatmul.f32.gmra.mxu1 %v3578_v11  ;;  %v3643_v41 = vmul.f32 %v7364_v12, %v3507_v5 }
 0x2b3   : > { %v4219_v55 = vpop.f32.mrf.mxu0 }
 0x2b4   : > { %v7434_v59 = vadd.f32 %v4123_v44, %v4086_v17  ;;  %v4187_v21 = vpop.f32.mrf.mxu3  ;;  %v3524_v44 = vld [vmem:[%s7590_s3 + $0x398] sm:$0xff]  ;;  %v3646_v17 = vmul.f32 %v7393_v19, %v3510_v53 }
 0x2b5   : > { %v4143_v61 = vpop.f32.mrf.mxu2  ;;  %v3660_v33 = vmul.f32 %v7364_v12, %v3524_v44  ;;  %v3527_v12 = vld [vmem:[%s7590_s3 + $0x3b0] sm:$0xff] }
 0x2b6   : > { %v4144_v1 = vadd.f32 %v4143_v61, %v7216_v36  ;;  %4528 = vmatmul.f32.gmra.mxu0 %v3594_v16 }
 0x2b7   : > { %v4257_v56 = vpop.f32.mrf.mxu1 }
 0x2b8   : > { %v4182_v2 = vadd.f32 %v4181_v23, %v4144_v1  ;;  %v3661_v23 = vmul.f32 %v7259_v54, %v3525_v43 }
 0x2b9   : > { %4499 = vmatmul.f32.gmra.mxu3 %v3644_v47  ;;  %v3663_v47 = vmul.f32 %v7393_v19, %v3527_v12 }
 0x2ba   : > { %v4220_v30 = vadd.f32 %v4219_v55, %v4182_v2  ;;  %4455 = vmatmul.f32.gmra.mxu2 %v3609_v31  ;;  %4566 = vmatmul.f32.gmra.mxu1 %v3595_v4  ;;  %v3526_v55 = vld [vmem:[%s7590_s3 + $0x3a8] sm:$0xff] }
 0x2bb   : > { %v4222_v6 = vpop.f32.mrf.mxu0 }
 0x2bc   : > { %v7453_v8 = vadd.f32 %v4257_v56, %v4220_v30  ;;  %v4190_v36 = vpop.f32.mrf.mxu3 }
 0x2bd   : > { %v4146_v14 = vpop.f32.mrf.mxu2 }
 0x2be   : > { %v4147_v18 = vadd.f32 %v4146_v14, %v7261_v35  ;;  %4531 = vmatmul.f32.gmra.mxu0 %v3611_v58 }
 0x2bf   : > { %v4260_v9 = vpop.f32.mrf.mxu1 }
 0x2c0   : > { %v4185_v57 = vadd.f32 %v4184_v3, %v4147_v18  ;;  %v3629_v3 = vmul.f32 %v7393_v19, %v3493_v37 }
 0x2c1   : > { %4502 = vmatmul.f32.gmra.mxu3 %v3661_v23 }
 0x2c2   : > { %v4223_v39 = vadd.f32 %v4222_v6, %v4185_v57  ;;  %4458 = vmatmul.f32.gmra.mxu2 %v3626_v38  ;;  %4569 = vmatmul.f32.gmra.mxu1 %v3612_v25 }
 0x2c3   : > { %v4225_v22 = vpop.f32.mrf.mxu0 }
 0x2c4   : > { %v7472_v32 = vadd.f32 %v4260_v9, %v4223_v39  ;;  %v4193_v35 = vpop.f32.mrf.mxu3 }
 0x2c5   : > { %v4149_v54 = vpop.f32.mrf.mxu2 }
 0x2c6   : > { %v4150_v27 = vadd.f32 %v4149_v54, %v7301_v7  ;;  %4534 = vmatmul.f32.gmra.mxu0 %v3628_v51  ;;  %v3645_v7 = vmul.f32 %v7385_v62, %v3509_v48 }
 0x2c7   : > { %v4263_v49 = vpop.f32.mrf.mxu1 }
 0x2c8   : > { %v4188_v20 = vadd.f32 %v4187_v21, %v4150_v27 }
 0x2ca   : > { %v4226_v24 = vadd.f32 %v4225_v22, %v4188_v20  ;;  %4461 = vmatmul.f32.gmra.mxu2 %v3643_v41  ;;  %4572 = vmatmul.f32.gmra.mxu1 %v3629_v3 }
 0x2cb   : > { %v4228_v34 = vpop.f32.mrf.mxu0 }
 0x2cc   : > { %v7487_v29 = vadd.f32 %v4263_v49, %v4226_v24  ;;  %v4196_v10 = vpop.f32.mrf.mxu3 }
 0x2cd   : > { %v4152_v26 = vpop.f32.mrf.mxu2 }
 0x2ce   : > { %v4153_v13 = vadd.f32 %v4152_v26, %v7366_v63  ;;  %4537 = vmatmul.f32.gmra.mxu0 %v3645_v7  ;;  %v3662_v63 = vmul.f32 %v7385_v62, %v3526_v55 }
 0x2cf   : > { %v4266_v46 = vpop.f32.mrf.mxu1 }
 0x2d0   : > { %v4191_v11 = vadd.f32 %v4190_v36, %v4153_v13 }
 0x2d2   : > { %v4229_v21 = vadd.f32 %v4228_v34, %v4191_v11  ;;  %4464 = vmatmul.f32.gmra.mxu2 %v3660_v33  ;;  %4575 = vmatmul.f32.gmra.mxu1 %v3646_v17 }
 0x2d3   : > { %v4231_v16 = vpop.f32.mrf.mxu0 }
 0x2d4   : > { %v7502_v45 = vadd.f32 %v4266_v46, %v4229_v21  ;;  %v4199_v61 = vpop.f32.mrf.mxu3 }
 0x2d5   : > { %v4155_v50 = vpop.f32.mrf.mxu2 }
 0x2d6   : > { %v4156_v60 = vadd.f32 %v4155_v50, %v7395_v42  ;;  %4540 = vmatmul.f32.gmra.mxu0 %v3662_v63 }
 0x2d7   : > { %v4269_v1 = vpop.f32.mrf.mxu1 }
 0x2d8   : > { %v4194_v56 = vadd.f32 %v4193_v35, %v4156_v60 }
 0x2da   : > { %v4232_v2 = vadd.f32 %v4231_v16, %v4194_v56  ;;  %4578 = vmatmul.f32.gmra.mxu1 %v3663_v47 }
 0x2db   : > { %v4234_v31 = vpop.f32.mrf.mxu0 }
 0x2dc   : > { %v7510_v4 = vadd.f32 %v4269_v1, %v4232_v2  ;;  %v4333_v0 = vpop.f32.mrf.mxu3 }
 0x2dd   : > { %v4158_v30 = vpop.f32.mrf.mxu2 }
 0x2de   : > { %v4159_v62 = vadd.f32 %v4158_v30, %v7415_v40 }
 0x2df   : > { %v4272_v6 = vpop.f32.mrf.mxu1 }
 0x2e0   : > { %v4197_v36 = vadd.f32 %v4196_v10, %v4159_v62 }
 0x2e2   : > { %v4235_v58 = vadd.f32 %v4234_v31, %v4197_v36 }
 0x2e3   : > { %v4237_v43 = vpop.f32.mrf.mxu0 }
 0x2e4   : > { %v7513_v14 = vadd.f32 %v4272_v6, %v4235_v58  ;;  %v4336_v42 = vpop.f32.mrf.mxu3 }
 0x2e5   : > { %v4161_v15 = vpop.f32.mrf.mxu2 }
 0x2e6   : > { %v4162_v52 = vadd.f32 %v4161_v15, %v7434_v59 }
 0x2e7   : > { %v4275_v19 = vpop.f32.mrf.mxu1 }
 0x2e8   : > { %v4200_v18 = vadd.f32 %v4199_v61, %v4162_v52 }
 0x2ea   : > { %v4238_v9 = vadd.f32 %v4237_v43, %v4200_v18 }
 0x2eb   : > { %v4371_v23 = vpop.f32.mrf.mxu0 }
 0x2ec   : > { %v7516_v57 = vadd.f32 %v4275_v19, %v4238_v9  ;;  %v4339_v38 = vpop.f32.mrf.mxu3 }
 0x2ed   : > { %v4295_v25 = vpop.f32.mrf.mxu2 }
 0x2ee   : > { %v4296_v26 = vadd.f32 %v4295_v25, %v7453_v8 }
 0x2ef   : > { %v4409_v28 = vpop.f32.mrf.mxu1 }
 0x2f0   : > { %v4334_v13 = vadd.f32 %v4333_v0, %v4296_v26 }
 0x2f2   : > { %v4372_v33 = vadd.f32 %v4371_v23, %v4334_v13 }
 0x2f3   : > { %v4374_v40 = vpop.f32.mrf.mxu0 }
 0x2f4   : > { %v4342_v39 = vpop.f32.mrf.mxu3  ;;  %v4410_v21 = vadd.f32 %v4409_v28, %v4372_v33 }
 0x2f5   : > { %v4298_v22 = vpop.f32.mrf.mxu2 }
 0x2f6   : > { %v4299_v17 = vadd.f32 %v4298_v22, %v7472_v32 }
 0x2f7   : > { %v4412_v35 = vpop.f32.mrf.mxu1 }
 0x2f8   : > { %v4337_v16 = vadd.f32 %v4336_v42, %v4299_v17 }
 0x2fa   : > { %v4375_v12 = vadd.f32 %v4374_v40, %v4337_v16 }
 0x2fb   : > { %v4377_v51 = vpop.f32.mrf.mxu0 }
 0x2fc   : > { %v7518_v54 = vpop.f32.mrf.mxu3  ;;  %v4413_v2 = vadd.f32 %v4412_v35, %v4375_v12 }
 0x2fd   : > { %v4301_v5 = vpop.f32.mrf.mxu2 }
 0x2fe   : > { %v4302_v60 = vadd.f32 %v4301_v5, %v7487_v29 }
 0x2ff   : > { %v4415_v37 = vpop.f32.mrf.mxu1 }
 0x300   : > { %v4340_v31 = vadd.f32 %v4339_v38, %v4302_v60 }
 0x302   : > { %v4378_v36 = vadd.f32 %v4377_v51, %v4340_v31 }
 0x303   : > { %v4380_v27 = vpop.f32.mrf.mxu0 }
 0x304   : > { %v7520_v49 = vpop.f32.mrf.mxu3  ;;  %v4416_v15 = vadd.f32 %v4415_v37, %v4378_v36 }
 0x305   : > { %v4304_v59 = vpop.f32.mrf.mxu2 }
 0x306   : > { %v4305_v58 = vadd.f32 %v4304_v59, %v7502_v45 }
 0x307   : > { %v4418_v20 = vpop.f32.mrf.mxu1 }
 0x308   : > { %v4343_v52 = vadd.f32 %v4342_v39, %v4305_v58 }
 0x30a   : > { %v4381_v38 = vadd.f32 %v4380_v27, %v4343_v52 }
 0x30b   : > { %v4383_v41 = vpop.f32.mrf.mxu0 }
 0x30c   : > { %v7524_v24 = vpop.f32.mrf.mxu3  ;;  %v4419_v51 = vadd.f32 %v4418_v20, %v4381_v38 }
 0x30d   : > { %v4307_v3 = vpop.f32.mrf.mxu2 }
 0x30e   : > { %v4308_v25 = vadd.f32 %v4307_v3, %v7510_v4 }
 0x30f   : > { %v7522_v48 = vpop.f32.mrf.mxu1 }
 0x310   : > { %v4346_v45 = vadd.f32 %v7518_v54, %v4308_v25 }
 0x312   : > { %v4384_v26 = vadd.f32 %v4383_v41, %v4346_v45 }
 0x313   : > { %v7526_v34 = vpop.f32.mrf.mxu0 }
 0x314   : > { %v4485_v44 = vpop.f32.mrf.mxu3  ;;  %v4422_v4 = vadd.f32 %v7522_v48, %v4384_v26 }
 0x315   : > { %v4310_v10 = vpop.f32.mrf.mxu2 }
 0x317   : > { %v7528_v7 = vpop.f32.mrf.mxu1 }
 0x31b   : > { %v7531_v53 = vpop.f32.mrf.mxu0 }
 0x31c   : > { %v4488_v61 = vpop.f32.mrf.mxu3 }
 0x31d   : > { %v7533_v46 = vpop.f32.mrf.mxu2 }
 0x31e   : > { %v4314_v41 = vadd.f32 %v7533_v46, %v7516_v57 }
 0x31f   : > { %v7535_v11 = vpop.f32.mrf.mxu1 }
 0x320   : > { %v4352_v48 = vadd.f32 %v7524_v24, %v4314_v41 }
 0x322   : > { %v4390_v60 = vadd.f32 %v7531_v53, %v4352_v48 }
 0x323   : > { %v4523_v55 = vpop.f32.mrf.mxu0 }
 0x324   : > { %v4491_v62 = vpop.f32.mrf.mxu3  ;;  %v4428_v57 = vadd.f32 %v7535_v11, %v4390_v60 }
 0x325   : > { %v4447_v63 = vpop.f32.mrf.mxu2 }
 0x326   : > { %v4448_v50 = vadd.f32 %v4447_v63, %v4410_v21 }
 0x327   : > { %v4561_v8 = vpop.f32.mrf.mxu1 }
 0x328   : > { %v4486_v1 = vadd.f32 %v4485_v44, %v4448_v50  ;;  %v4311_v44 = vadd.f32 %v4310_v10, %v7513_v14 }
 0x32a   : > { %v4524_v56 = vadd.f32 %v4523_v55, %v4486_v1  ;;  %v4349_v3 = vadd.f32 %v7520_v49, %v4311_v44 }
 0x32b   : > { %v4526_v47 = vpop.f32.mrf.mxu0 }
 0x32c   : > { %v4562_v0 = vadd.f32 %v4561_v8, %v4524_v56  ;;  %v4494_v40 = vpop.f32.mrf.mxu3  ;;  %v4387_v16 = vadd.f32 %v7526_v34, %v4349_v3 }
 0x32d   : > { %v4450_v30 = vpop.f32.mrf.mxu2 }
 0x32e   : > { %4582 = vst [vmem:[%s7541_s28] sm:$0xff] %v4562_v0  ;;  %v4451_v32 = vadd.f32 %v4450_v30, %v4413_v2 }
 0x32f   : > { %v4564_v6 = vpop.f32.mrf.mxu1 }
 0x330   : > { %v4489_v43 = vadd.f32 %v4488_v61, %v4451_v32  ;;  %v4425_v61 = vadd.f32 %v7528_v7, %v4387_v16 }
 0x332   : > { %v4527_v29 = vadd.f32 %v4526_v47, %v4489_v43 }
 0x333   : > { %v4529_v42 = vpop.f32.mrf.mxu0 }
 0x334   : > { %v4565_v19 = vadd.f32 %v4564_v6, %v4527_v29  ;;  %v4497_v33 = vpop.f32.mrf.mxu3 }
 0x335   : > { %v4453_v18 = vpop.f32.mrf.mxu2  ;;  %v4638_v53 = vld [vmem:[%s7541_s28] sm:$0xff] (%p4977_p5) }
 0x336   : > { %4583 = vst [vmem:[%s7541_s28 + $0x8] sm:$0xff] %v4565_v19  ;;  %v4454_v9 = vadd.f32 %v4453_v18, %v4416_v15 }
 0x337   : > { %v4567_v23 = vpop.f32.mrf.mxu1  ;;  %4639 = vst [vmem:[%s4597_s30] sm:$0xff] (%p4977_p5), %v4638_v53 }
 0x338   : > { %v4492_v28 = vadd.f32 %v4491_v62, %v4454_v9 }
 0x33a   : > { %v4530_v22 = vadd.f32 %v4529_v42, %v4492_v28 }
 0x33b   : > { %v4532_v35 = vpop.f32.mrf.mxu0 }
 0x33c   : > { %v4568_v5 = vadd.f32 %v4567_v23, %v4530_v22  ;;  %v4500_v63 = vpop.f32.mrf.mxu3 }
 0x33d   : > { %v4456_v37 = vpop.f32.mrf.mxu2  ;;  %v4640_v11 = vld [vmem:[%s7541_s28 + $0x8] sm:$0xff] (%p4977_p5) }
 0x33e   : > { %4584 = vst [vmem:[%s7541_s28 + $0x10] sm:$0xff] %v4568_v5  ;;  %v4457_v39 = vadd.f32 %v4456_v37, %v4419_v51 }
 0x33f   : > { %v4570_v59 = vpop.f32.mrf.mxu1  ;;  %4641 = vst [vmem:[%s4597_s30 + $0x18] sm:$0xff] (%p4977_p5), %v4640_v11 }
 0x340   : > { %v4495_v13 = vadd.f32 %v4494_v40, %v4457_v39 }
 0x342   : > { %v4533_v27 = vadd.f32 %v4532_v35, %v4495_v13 }
 0x343   : > { %v4535_v17 = vpop.f32.mrf.mxu0 }
 0x344   : > { %v4571_v20 = vadd.f32 %v4570_v59, %v4533_v27  ;;  %v4503_v2 = vpop.f32.mrf.mxu3 }
 0x345   : > { %v4459_v54 = vpop.f32.mrf.mxu2  ;;  %v4642_v62 = vld [vmem:[%s7541_s28 + $0x10] sm:$0xff] (%p4977_p5) }
 0x346   : > { %4585 = vst [vmem:[%s7541_s28 + $0x18] sm:$0xff] %v4571_v20  ;;  %v4460_v55 = vadd.f32 %v4459_v54, %v4422_v4 }
 0x347   : > { %v4573_v21 = vpop.f32.mrf.mxu1  ;;  %4643 = vst [vmem:[%s4597_s30 + $0x30] sm:$0xff] (%p4977_p5), %v4642_v62 }
 0x348   : > { %v4498_v14 = vadd.f32 %v4497_v33, %v4460_v55 }
 0x34a   : > { %v4536_v10 = vadd.f32 %v4535_v17, %v4498_v14 }
 0x34b   : > { %v4538_v12 = vpop.f32.mrf.mxu0 }
 0x34c   : > { %v4574_v49 = vadd.f32 %v4573_v21, %v4536_v10 }
 0x34d   : > { %v4462_v50 = vpop.f32.mrf.mxu2  ;;  %v4644_v6 = vld [vmem:[%s7541_s28 + $0x18] sm:$0xff] (%p4977_p5) }
 0x34e   : > { %4586 = vst [vmem:[%s7541_s28 + $0x20] sm:$0xff] %v4574_v49  ;;  %v4463_v8 = vadd.f32 %v4462_v50, %v4425_v61 }
 0x34f   : > { %v4576_v1 = vpop.f32.mrf.mxu1  ;;  %4645 = vst [vmem:[%s4597_s30 + $0x48] sm:$0xff] (%p4977_p5), %v4644_v6 }
 0x350   : > { %v4501_v34 = vadd.f32 %v4500_v63, %v4463_v8 }
 0x352   : > { %v4539_v56 = vadd.f32 %v4538_v12, %v4501_v34 }
 0x353   : > { %v4541_v31 = vpop.f32.mrf.mxu0 }
 0x354   : > { %v4577_v46 = vadd.f32 %v4576_v1, %v4539_v56 }
 0x355   : > { %v4465_v47 = vpop.f32.mrf.mxu2  ;;  %v4646_v36 = vld [vmem:[%s7541_s28 + $0x20] sm:$0xff] (%p4977_p5) }
 0x356   : > { %4587 = vst [vmem:[%s7541_s28 + $0x28] sm:$0xff] %v4577_v46  ;;  %v4466_v7 = vadd.f32 %v4465_v47, %v4428_v57 }
 0x357   : > { %v4579_v30 = vpop.f32.mrf.mxu1  ;;  %4647 = vst [vmem:[%s4597_s30 + $0x60] sm:$0xff] (%p4977_p5), %v4646_v36 }
 0x358   : > { %v4504_v24 = vadd.f32 %v4503_v2, %v4466_v7 }
 0x35a   : > { %v4542_v0 = vadd.f32 %v4541_v31, %v4504_v24  ;;  %4595 = sbr.rel (!%p4977_p5) target bundleno = 871 (0x367), region = 96 }
 0x35c   : > { %v4580_v32 = vadd.f32 %v4579_v30, %v4542_v0 }
 0x35d   : > { %v4648_v58 = vld [vmem:[%s7541_s28 + $0x28] sm:$0xff] (%p4977_p5) }
 0x35e   : > { %4588 = vst [vmem:[%s7541_s28 + $0x30] sm:$0xff] %v4580_v32 }
 0x35f   : > { %4649 = vst [vmem:[%s4597_s30 + $0x78] sm:$0xff] %v4648_v58 }
 0x365   : > { %v4650_v43 = vld [vmem:[%s7541_s28 + $0x30] sm:$0xff] }
 0x366   : > { %4651 = vst [vmem:[%s4597_s30 + $0x90] sm:$0xff] %v4650_v43 }
 0x367 PF: > { %p12_p10 = scmp.ge.s32.totalorder %s4964_s22, 5   ;;  %s7652_s18 = smov %s4911_s19 }
 0x368   : > { %s7653_s19 = smov %s4975_s25  ;;  %s7654_s20 = smov %s4964_s22 }
 0x369   :  { %14 = sbr.rel (!%p12_p10) target bundleno = 2 (0x2), region = 171 }

</bundles_post_ra>
